<compile_context>
chip_gen: v5e
topology: v5e:2x2
jax: 0.10.0
libtpu: 0.0.40
codegen_flags: <defaults>
</compile_context>

<pallas_src>
import jax
import jax.numpy as jnp
from jax import lax
from jax.experimental import pallas as pl
from jax.experimental.pallas import tpu as pltpu

INPUT_SIZE = 1
HIDDEN1 = 128
HIDDEN2 = 64
FC1 = 25


def _gate_perm(H):
    """Column permutation [i, f, g, o] -> [i, f, o, g]."""
    return jnp.concatenate([jnp.arange(0, 2 * H),
                            jnp.arange(3 * H, 4 * H),
                            jnp.arange(2 * H, 3 * H)])


def stock_predictor_kernel(xproj_ref, whh1_ref, w2_ref, b2_ref,
                           wfc_ref, bfc_ref, out_ref):
    # xproj_ref: (S, B, 4*H1)  -- precomputed x@w_ih1 + b1, gate order [i,f,o,g]
    # whh1_ref : (H1, 4*H1)
    # w2_ref   : (H1+H2, 4*H2) -- stacked [w_ih2; w_hh2]
    # b2_ref   : (1, 4*H2)
    # wfc_ref  : (H2, 1)       -- folded fc1@fc2
    # bfc_ref  : (1, 1)
    S = xproj_ref.shape[0]
    B = xproj_ref.shape[1]

    whh1 = whh1_ref[...]
    w2 = w2_ref[...]
    b2 = b2_ref[...]

    def cell(z, c, H):
        # One contiguous sigmoid over [i|f|o], one tanh over [g].
        sig = jax.nn.sigmoid(z[:, :3 * H])
        i = sig[:, 0 * H:1 * H]
        f = sig[:, 1 * H:2 * H]
        o = sig[:, 2 * H:3 * H]
        g = jnp.tanh(z[:, 3 * H:4 * H])
        c_new = f * c + i * g
        h_new = o * jnp.tanh(c_new)
        return h_new, c_new

    h1 = jnp.zeros((B, HIDDEN1), jnp.float32)
    c1 = jnp.zeros((B, HIDDEN1), jnp.float32)
    h2 = jnp.zeros((B, HIDDEN2), jnp.float32)
    c2 = jnp.zeros((B, HIDDEN2), jnp.float32)

    def body(t, carry):
        h1, c1, h2, c2 = carry
        # Layer 1: input projection already hoisted; only the recurrent matmul.
        z1 = xproj_ref[t] + jnp.dot(h1, whh1, preferred_element_type=jnp.float32)
        h1, c1 = cell(z1, c1, HIDDEN1)
        # Layer 2: single fused gate matmul over concat([h1, h2]).
        hcat = jnp.concatenate([h1, h2], axis=1)            # (B, H1+H2)
        z2 = jnp.dot(hcat, w2, preferred_element_type=jnp.float32) + b2
        h2, c2 = cell(z2, c2, HIDDEN2)
        return h1, c1, h2, c2

    _, _, h2, _ = lax.fori_loop(0, S, body, (h1, c1, h2, c2), unroll=True)

    # Folded fc1∘fc2 epilogue on the last hidden state.
    out_ref[...] = (jnp.dot(h2, wfc_ref[...], preferred_element_type=jnp.float32)
                    + bfc_ref[...])


def stock_predictor(x, params):
    """x: (B, S, I) float32 (batch_first, matching PyTorch). Returns (B, 1)."""
    B, S, I = x.shape
    assert I == INPUT_SIZE

    # Pad batch to a multiple of 8 (sublane fill); slice back after the kernel.
    B_pad = max(8, ((B + 7) // 8) * 8)
    if B_pad != B:
        x = jnp.pad(x, ((0, B_pad - B), (0, 0), (0, 0)))
    x_tm = jnp.transpose(x, (1, 0, 2)).astype(jnp.float32)   # (S, B_pad, I)

    p1 = _gate_perm(HIDDEN1)
    p2 = _gate_perm(HIDDEN2)

    # Layer 1 weights (gate-permuted, transposed to (in, 4H)).
    wih1 = params["w_ih1"].T[:, p1]                           # (I, 4*H1)
    whh1 = params["w_hh1"].T[:, p1]                           # (H1, 4*H1)
    b1 = (params["b_ih1"] + params["b_hh1"])[p1].reshape(1, -1)

    # Hoisted input projection (exact: combined bias folded in here).
    xproj = jnp.einsum("sbi,ig->sbg", x_tm, wih1) + b1        # (S, B_pad, 4*H1)

    # Layer 2: stacked [w_ih2; w_hh2] -> single (H1+H2, 4*H2) matmul per step.
    w2 = jnp.concatenate([params["w_ih2"].T, params["w_hh2"].T], axis=0)[:, p2]
    b2 = (params["b_ih2"] + params["b_hh2"])[p2].reshape(1, -1)

    # Fold fc1∘fc2 (no nonlinearity between them) into one (H2, 1) matvec.
    w_fc = params["w_fc1"].T @ params["w_fc2"].T              # (H2, 1)
    b_fc = (params["b_fc1"] @ params["w_fc2"].T + params["b_fc2"]).reshape(1, 1)

    args = (xproj, whh1, w2, b2, w_fc, b_fc)
    vmem = pl.BlockSpec(memory_space=pltpu.MemorySpace.VMEM)
    out = pl.pallas_call(
        stock_predictor_kernel,
        out_shape=jax.ShapeDtypeStruct((B_pad, 1), jnp.float32),
        in_specs=[vmem] * len(args),
        out_specs=vmem,
    )(*args)
    return out[:B]


def init_params(key):
    """Deterministic PyTorch-style uniform init (U(-1/sqrt(H), 1/sqrt(H)))."""
    ks = jax.random.split(key, 12)
    k1 = 1.0 / jnp.sqrt(HIDDEN1)
    k2 = 1.0 / jnp.sqrt(HIDDEN2)
    kf1 = 1.0 / jnp.sqrt(HIDDEN2)
    kf2 = 1.0 / jnp.sqrt(FC1)
    u = lambda k, shape, b: jax.random.uniform(k, shape, jnp.float32, -b, b)
    return {
        "w_ih1": u(ks[0], (4 * HIDDEN1, INPUT_SIZE), k1),
        "w_hh1": u(ks[1], (4 * HIDDEN1, HIDDEN1), k1),
        "b_ih1": u(ks[2], (4 * HIDDEN1,), k1),
        "b_hh1": u(ks[3], (4 * HIDDEN1,), k1),
        "w_ih2": u(ks[4], (4 * HIDDEN2, HIDDEN1), k2),
        "w_hh2": u(ks[5], (4 * HIDDEN2, HIDDEN2), k2),
        "b_ih2": u(ks[6], (4 * HIDDEN2,), k2),
        "b_hh2": u(ks[7], (4 * HIDDEN2,), k2),
        "w_fc1": u(ks[8], (FC1, HIDDEN2), kf1),
        "b_fc1": u(ks[9], (FC1,), kf1),
        "w_fc2": u(ks[10], (1, FC1), kf2),
        "b_fc2": u(ks[11], (1,), kf2),
    }


def reference_forward(x, p):
    """Pure-JAX reference mirroring the PyTorch forward (for validation)."""
    B, S, _ = x.shape

    def lstm(xs, w_ih, w_hh, b_ih, b_hh, H):
        def step(carry, x_t):
            h, c = carry
            z = x_t @ w_ih.T + h @ w_hh.T + b_ih + b_hh
            i = jax.nn.sigmoid(z[:, 0 * H:1 * H])
            f = jax.nn.sigmoid(z[:, 1 * H:2 * H])
            g = jnp.tanh(z[:, 2 * H:3 * H])
            o = jax.nn.sigmoid(z[:, 3 * H:4 * H])
            c = f * c + i * g
            h = o * jnp.tanh(c)
            return (h, c), h
        init = (jnp.zeros((B, H)), jnp.zeros((B, H)))
        _, hs = lax.scan(step, init, jnp.transpose(xs, (1, 0, 2)))
        return jnp.transpose(hs, (1, 0, 2))

    out = lstm(x, p["w_ih1"], p["w_hh1"], p["b_ih1"], p["b_hh1"], HIDDEN1)
    out = lstm(out, p["w_ih2"], p["w_hh2"], p["b_ih2"], p["b_hh2"], HIDDEN2)
    out = out[:, -1, :] @ p["w_fc1"].T + p["b_fc1"]
    out = out @ p["w_fc2"].T + p["b_fc2"]
    return out


if __name__ == "__main__":
    key = jax.random.PRNGKey(0)
    kx, kp = jax.random.split(key)

    B, S = 2, 8
    x = jax.random.normal(kx, (B, S, INPUT_SIZE), jnp.float32)
    params = init_params(kp)

    out = stock_predictor(x, params)
    out = jax.block_until_ready(out)

    ref = reference_forward(x, params)
    assert out.shape == (B, 1)
    # Tolerance 1e-4: gate permutation / matmul fusion / fc-fold reassociate
    # float sums (exact in real arithmetic); still catches any semantic error.
    assert jnp.allclose(out, ref, rtol=1e-4, atol=1e-4), (out, ref)

    print("KERNEL_OK")
</pallas_src>

<mosaic_0001>
module attributes {stable_mosaic.version = 11 : i64} {
  func.func @stock_predictor_kernel(%arg0: memref<8x8x512xf32, #tpu.memory_space<vmem>>, %arg1: memref<128x512xf32, #tpu.memory_space<vmem>>, %arg2: memref<192x256xf32, #tpu.memory_space<vmem>>, %arg3: memref<1x256xf32, #tpu.memory_space<vmem>>, %arg4: memref<64x1xf32, #tpu.memory_space<vmem>>, %arg5: memref<1x1xf32, #tpu.memory_space<vmem>>, %arg6: memref<8x1xf32, #tpu.memory_space<vmem>>) attributes {dimension_semantics = [], scalar_prefetch = 0 : i64, scratch_operands = 0 : i64, tpu.core_type = #tpu.core_type<tc>} {
    %c0 = arith.constant 0 : index
    %c0_0 = arith.constant 0 : index
    %0 = vector.load %arg1[%c0, %c0_0] : memref<128x512xf32, #tpu.memory_space<vmem>>, vector<128x512xf32>
    %c0_1 = arith.constant 0 : index
    %c0_2 = arith.constant 0 : index
    %1 = vector.load %arg2[%c0_1, %c0_2] : memref<192x256xf32, #tpu.memory_space<vmem>>, vector<192x256xf32>
    %c0_3 = arith.constant 0 : index
    %c0_4 = arith.constant 0 : index
    %2 = vector.load %arg3[%c0_3, %c0_4] : memref<1x256xf32, #tpu.memory_space<vmem>>, vector<1x256xf32>
    %cst = arith.constant 0.000000e+00 : f32
    %3 = vector.broadcast %cst : f32 to vector<8x128xf32>
    %cst_5 = arith.constant 0.000000e+00 : f32
    %4 = vector.broadcast %cst_5 : f32 to vector<8x128xf32>
    %cst_6 = arith.constant 0.000000e+00 : f32
    %5 = vector.broadcast %cst_6 : f32 to vector<8x64xf32>
    %cst_7 = arith.constant 0.000000e+00 : f32
    %6 = vector.broadcast %cst_7 : f32 to vector<8x64xf32>
    %c0_i32 = arith.constant 0 : i32
    %7 = arith.index_cast %c0_i32 : i32 to index
    %c0_8 = arith.constant 0 : index
    %c0_9 = arith.constant 0 : index
    %8 = vector.load %arg0[%7, %c0_8, %c0_9] : memref<8x8x512xf32, #tpu.memory_space<vmem>>, vector<1x8x512xf32>
    %9 = vector.shape_cast %8 : vector<1x8x512xf32> to vector<8x512xf32>
    %cst_10 = arith.constant dense<0.000000e+00> : vector<8x512xf32>
    %10 = tpu.matmul %3, %0, %cst_10 {dimension_numbers = #tpu.dot_dimension_numbers<[1], [0], [0], [1], [0, 0, 1, 1], [], []>} : vector<8x128xf32>, vector<128x512xf32>, vector<8x512xf32> -> vector<8x512xf32>
    %11 = arith.addf %9, %10 : vector<8x512xf32>
    %12 = vector.extract_strided_slice %11 {offsets = [0, 0], sizes = [8, 384], strides = [1, 1]} : vector<8x512xf32> to vector<8x384xf32>
    %13 = arith.negf %12 : vector<8x384xf32>
    %14 = math.exp %13 : vector<8x384xf32>
    %cst_11 = arith.constant 1.000000e+00 : f32
    %15 = vector.broadcast %cst_11 : f32 to vector<8x384xf32>
    %16 = arith.addf %15, %14 : vector<8x384xf32>
    %17 = arith.divf %15, %16 : vector<8x384xf32>
    %18 = vector.extract_strided_slice %17 {offsets = [0, 0], sizes = [8, 128], strides = [1, 1]} : vector<8x384xf32> to vector<8x128xf32>
    %19 = vector.extract_strided_slice %17 {offsets = [0, 128], sizes = [8, 128], strides = [1, 1]} : vector<8x384xf32> to vector<8x128xf32>
    %20 = vector.extract_strided_slice %17 {offsets = [0, 256], sizes = [8, 128], strides = [1, 1]} : vector<8x384xf32> to vector<8x128xf32>
    %21 = vector.extract_strided_slice %11 {offsets = [0, 384], sizes = [8, 128], strides = [1, 1]} : vector<8x512xf32> to vector<8x128xf32>
    %22 = math.tanh %21 : vector<8x128xf32>
    %23 = arith.mulf %19, %4 : vector<8x128xf32>
    %24 = arith.mulf %18, %22 : vector<8x128xf32>
    %25 = arith.addf %23, %24 : vector<8x128xf32>
    %26 = math.tanh %25 : vector<8x128xf32>
    %27 = arith.mulf %20, %26 : vector<8x128xf32>
    %28 = tpu.concatenate %27, %5 in 1 : vector<8x128xf32>, vector<8x64xf32> -> vector<8x192xf32>
    %cst_12 = arith.constant dense<0.000000e+00> : vector<8x256xf32>
    %29 = tpu.matmul %28, %1, %cst_12 {dimension_numbers = #tpu.dot_dimension_numbers<[1], [0], [0], [1], [0, 0, 1, 1], [], []>} : vector<8x192xf32>, vector<192x256xf32>, vector<8x256xf32> -> vector<8x256xf32>
    %30 = vector.broadcast %2 : vector<1x256xf32> to vector<8x256xf32>
    %31 = arith.addf %29, %30 : vector<8x256xf32>
    %32 = vector.extract_strided_slice %31 {offsets = [0, 0], sizes = [8, 192], strides = [1, 1]} : vector<8x256xf32> to vector<8x192xf32>
    %33 = arith.negf %32 : vector<8x192xf32>
    %34 = math.exp %33 : vector<8x192xf32>
    %cst_13 = arith.constant 1.000000e+00 : f32
    %35 = vector.broadcast %cst_13 : f32 to vector<8x192xf32>
    %36 = arith.addf %35, %34 : vector<8x192xf32>
    %37 = arith.divf %35, %36 : vector<8x192xf32>
    %38 = vector.extract_strided_slice %37 {offsets = [0, 0], sizes = [8, 64], strides = [1, 1]} : vector<8x192xf32> to vector<8x64xf32>
    %39 = vector.extract_strided_slice %37 {offsets = [0, 64], sizes = [8, 64], strides = [1, 1]} : vector<8x192xf32> to vector<8x64xf32>
    %40 = vector.extract_strided_slice %37 {offsets = [0, 128], sizes = [8, 64], strides = [1, 1]} : vector<8x192xf32> to vector<8x64xf32>
    %41 = vector.extract_strided_slice %31 {offsets = [0, 192], sizes = [8, 64], strides = [1, 1]} : vector<8x256xf32> to vector<8x64xf32>
    %42 = math.tanh %41 : vector<8x64xf32>
    %43 = arith.mulf %39, %6 : vector<8x64xf32>
    %44 = arith.mulf %38, %42 : vector<8x64xf32>
    %45 = arith.addf %43, %44 : vector<8x64xf32>
    %46 = math.tanh %45 : vector<8x64xf32>
    %47 = arith.mulf %40, %46 : vector<8x64xf32>
    %c1_i32 = arith.constant 1 : i32
    %48 = arith.index_cast %c1_i32 : i32 to index
    %c0_14 = arith.constant 0 : index
    %c0_15 = arith.constant 0 : index
    %49 = vector.load %arg0[%48, %c0_14, %c0_15] : memref<8x8x512xf32, #tpu.memory_space<vmem>>, vector<1x8x512xf32>
    %50 = vector.shape_cast %49 : vector<1x8x512xf32> to vector<8x512xf32>
    %cst_16 = arith.constant dense<0.000000e+00> : vector<8x512xf32>
    %51 = tpu.matmul %27, %0, %cst_16 {dimension_numbers = #tpu.dot_dimension_numbers<[1], [0], [0], [1], [0, 0, 1, 1], [], []>} : vector<8x128xf32>, vector<128x512xf32>, vector<8x512xf32> -> vector<8x512xf32>
    %52 = arith.addf %50, %51 : vector<8x512xf32>
    %53 = vector.extract_strided_slice %52 {offsets = [0, 0], sizes = [8, 384], strides = [1, 1]} : vector<8x512xf32> to vector<8x384xf32>
    %54 = arith.negf %53 : vector<8x384xf32>
    %55 = math.exp %54 : vector<8x384xf32>
    %cst_17 = arith.constant 1.000000e+00 : f32
    %56 = vector.broadcast %cst_17 : f32 to vector<8x384xf32>
    %57 = arith.addf %56, %55 : vector<8x384xf32>
    %58 = arith.divf %56, %57 : vector<8x384xf32>
    %59 = vector.extract_strided_slice %58 {offsets = [0, 0], sizes = [8, 128], strides = [1, 1]} : vector<8x384xf32> to vector<8x128xf32>
    %60 = vector.extract_strided_slice %58 {offsets = [0, 128], sizes = [8, 128], strides = [1, 1]} : vector<8x384xf32> to vector<8x128xf32>
    %61 = vector.extract_strided_slice %58 {offsets = [0, 256], sizes = [8, 128], strides = [1, 1]} : vector<8x384xf32> to vector<8x128xf32>
    %62 = vector.extract_strided_slice %52 {offsets = [0, 384], sizes = [8, 128], strides = [1, 1]} : vector<8x512xf32> to vector<8x128xf32>
    %63 = math.tanh %62 : vector<8x128xf32>
    %64 = arith.mulf %60, %25 : vector<8x128xf32>
    %65 = arith.mulf %59, %63 : vector<8x128xf32>
    %66 = arith.addf %64, %65 : vector<8x128xf32>
    %67 = math.tanh %66 : vector<8x128xf32>
    %68 = arith.mulf %61, %67 : vector<8x128xf32>
    %69 = tpu.concatenate %68, %47 in 1 : vector<8x128xf32>, vector<8x64xf32> -> vector<8x192xf32>
    %cst_18 = arith.constant dense<0.000000e+00> : vector<8x256xf32>
    %70 = tpu.matmul %69, %1, %cst_18 {dimension_numbers = #tpu.dot_dimension_numbers<[1], [0], [0], [1], [0, 0, 1, 1], [], []>} : vector<8x192xf32>, vector<192x256xf32>, vector<8x256xf32> -> vector<8x256xf32>
    %71 = vector.broadcast %2 : vector<1x256xf32> to vector<8x256xf32>
    %72 = arith.addf %70, %71 : vector<8x256xf32>
    %73 = vector.extract_strided_slice %72 {offsets = [0, 0], sizes = [8, 192], strides = [1, 1]} : vector<8x256xf32> to vector<8x192xf32>
    %74 = arith.negf %73 : vector<8x192xf32>
    %75 = math.exp %74 : vector<8x192xf32>
    %cst_19 = arith.constant 1.000000e+00 : f32
    %76 = vector.broadcast %cst_19 : f32 to vector<8x192xf32>
    %77 = arith.addf %76, %75 : vector<8x192xf32>
    %78 = arith.divf %76, %77 : vector<8x192xf32>
    %79 = vector.extract_strided_slice %78 {offsets = [0, 0], sizes = [8, 64], strides = [1, 1]} : vector<8x192xf32> to vector<8x64xf32>
    %80 = vector.extract_strided_slice %78 {offsets = [0, 64], sizes = [8, 64], strides = [1, 1]} : vector<8x192xf32> to vector<8x64xf32>
    %81 = vector.extract_strided_slice %78 {offsets = [0, 128], sizes = [8, 64], strides = [1, 1]} : vector<8x192xf32> to vector<8x64xf32>
    %82 = vector.extract_strided_slice %72 {offsets = [0, 192], sizes = [8, 64], strides = [1, 1]} : vector<8x256xf32> to vector<8x64xf32>
    %83 = math.tanh %82 : vector<8x64xf32>
    %84 = arith.mulf %80, %45 : vector<8x64xf32>
    %85 = arith.mulf %79, %83 : vector<8x64xf32>
    %86 = arith.addf %84, %85 : vector<8x64xf32>
    %87 = math.tanh %86 : vector<8x64xf32>
    %88 = arith.mulf %81, %87 : vector<8x64xf32>
    %c2_i32 = arith.constant 2 : i32
    %89 = arith.index_cast %c2_i32 : i32 to index
    %c0_20 = arith.constant 0 : index
    %c0_21 = arith.constant 0 : index
    %90 = vector.load %arg0[%89, %c0_20, %c0_21] : memref<8x8x512xf32, #tpu.memory_space<vmem>>, vector<1x8x512xf32>
    %91 = vector.shape_cast %90 : vector<1x8x512xf32> to vector<8x512xf32>
    %cst_22 = arith.constant dense<0.000000e+00> : vector<8x512xf32>
    %92 = tpu.matmul %68, %0, %cst_22 {dimension_numbers = #tpu.dot_dimension_numbers<[1], [0], [0], [1], [0, 0, 1, 1], [], []>} : vector<8x128xf32>, vector<128x512xf32>, vector<8x512xf32> -> vector<8x512xf32>
    %93 = arith.addf %91, %92 : vector<8x512xf32>
    %94 = vector.extract_strided_slice %93 {offsets = [0, 0], sizes = [8, 384], strides = [1, 1]} : vector<8x512xf32> to vector<8x384xf32>
    %95 = arith.negf %94 : vector<8x384xf32>
    %96 = math.exp %95 : vector<8x384xf32>
    %cst_23 = arith.constant 1.000000e+00 : f32
    %97 = vector.broadcast %cst_23 : f32 to vector<8x384xf32>
    %98 = arith.addf %97, %96 : vector<8x384xf32>
    %99 = arith.divf %97, %98 : vector<8x384xf32>
    %100 = vector.extract_strided_slice %99 {offsets = [0, 0], sizes = [8, 128], strides = [1, 1]} : vector<8x384xf32> to vector<8x128xf32>
    %101 = vector.extract_strided_slice %99 {offsets = [0, 128], sizes = [8, 128], strides = [1, 1]} : vector<8x384xf32> to vector<8x128xf32>
    %102 = vector.extract_strided_slice %99 {offsets = [0, 256], sizes = [8, 128], strides = [1, 1]} : vector<8x384xf32> to vector<8x128xf32>
    %103 = vector.extract_strided_slice %93 {offsets = [0, 384], sizes = [8, 128], strides = [1, 1]} : vector<8x512xf32> to vector<8x128xf32>
    %104 = math.tanh %103 : vector<8x128xf32>
    %105 = arith.mulf %101, %66 : vector<8x128xf32>
    %106 = arith.mulf %100, %104 : vector<8x128xf32>
    %107 = arith.addf %105, %106 : vector<8x128xf32>
    %108 = math.tanh %107 : vector<8x128xf32>
    %109 = arith.mulf %102, %108 : vector<8x128xf32>
    %110 = tpu.concatenate %109, %88 in 1 : vector<8x128xf32>, vector<8x64xf32> -> vector<8x192xf32>
    %cst_24 = arith.constant dense<0.000000e+00> : vector<8x256xf32>
    %111 = tpu.matmul %110, %1, %cst_24 {dimension_numbers = #tpu.dot_dimension_numbers<[1], [0], [0], [1], [0, 0, 1, 1], [], []>} : vector<8x192xf32>, vector<192x256xf32>, vector<8x256xf32> -> vector<8x256xf32>
    %112 = vector.broadcast %2 : vector<1x256xf32> to vector<8x256xf32>
    %113 = arith.addf %111, %112 : vector<8x256xf32>
    %114 = vector.extract_strided_slice %113 {offsets = [0, 0], sizes = [8, 192], strides = [1, 1]} : vector<8x256xf32> to vector<8x192xf32>
    %115 = arith.negf %114 : vector<8x192xf32>
    %116 = math.exp %115 : vector<8x192xf32>
    %cst_25 = arith.constant 1.000000e+00 : f32
    %117 = vector.broadcast %cst_25 : f32 to vector<8x192xf32>
    %118 = arith.addf %117, %116 : vector<8x192xf32>
    %119 = arith.divf %117, %118 : vector<8x192xf32>
    %120 = vector.extract_strided_slice %119 {offsets = [0, 0], sizes = [8, 64], strides = [1, 1]} : vector<8x192xf32> to vector<8x64xf32>
    %121 = vector.extract_strided_slice %119 {offsets = [0, 64], sizes = [8, 64], strides = [1, 1]} : vector<8x192xf32> to vector<8x64xf32>
    %122 = vector.extract_strided_slice %119 {offsets = [0, 128], sizes = [8, 64], strides = [1, 1]} : vector<8x192xf32> to vector<8x64xf32>
    %123 = vector.extract_strided_slice %113 {offsets = [0, 192], sizes = [8, 64], strides = [1, 1]} : vector<8x256xf32> to vector<8x64xf32>
    %124 = math.tanh %123 : vector<8x64xf32>
    %125 = arith.mulf %121, %86 : vector<8x64xf32>
    %126 = arith.mulf %120, %124 : vector<8x64xf32>
    %127 = arith.addf %125, %126 : vector<8x64xf32>
    %128 = math.tanh %127 : vector<8x64xf32>
    %129 = arith.mulf %122, %128 : vector<8x64xf32>
    %c3_i32 = arith.constant 3 : i32
    %130 = arith.index_cast %c3_i32 : i32 to index
    %c0_26 = arith.constant 0 : index
    %c0_27 = arith.constant 0 : index
    %131 = vector.load %arg0[%130, %c0_26, %c0_27] : memref<8x8x512xf32, #tpu.memory_space<vmem>>, vector<1x8x512xf32>
    %132 = vector.shape_cast %131 : vector<1x8x512xf32> to vector<8x512xf32>
    %cst_28 = arith.constant dense<0.000000e+00> : vector<8x512xf32>
    %133 = tpu.matmul %109, %0, %cst_28 {dimension_numbers = #tpu.dot_dimension_numbers<[1], [0], [0], [1], [0, 0, 1, 1], [], []>} : vector<8x128xf32>, vector<128x512xf32>, vector<8x512xf32> -> vector<8x512xf32>
    %134 = arith.addf %132, %133 : vector<8x512xf32>
    %135 = vector.extract_strided_slice %134 {offsets = [0, 0], sizes = [8, 384], strides = [1, 1]} : vector<8x512xf32> to vector<8x384xf32>
    %136 = arith.negf %135 : vector<8x384xf32>
    %137 = math.exp %136 : vector<8x384xf32>
    %cst_29 = arith.constant 1.000000e+00 : f32
    %138 = vector.broadcast %cst_29 : f32 to vector<8x384xf32>
    %139 = arith.addf %138, %137 : vector<8x384xf32>
    %140 = arith.divf %138, %139 : vector<8x384xf32>
    %141 = vector.extract_strided_slice %140 {offsets = [0, 0], sizes = [8, 128], strides = [1, 1]} : vector<8x384xf32> to vector<8x128xf32>
    %142 = vector.extract_strided_slice %140 {offsets = [0, 128], sizes = [8, 128], strides = [1, 1]} : vector<8x384xf32> to vector<8x128xf32>
    %143 = vector.extract_strided_slice %140 {offsets = [0, 256], sizes = [8, 128], strides = [1, 1]} : vector<8x384xf32> to vector<8x128xf32>
    %144 = vector.extract_strided_slice %134 {offsets = [0, 384], sizes = [8, 128], strides = [1, 1]} : vector<8x512xf32> to vector<8x128xf32>
    %145 = math.tanh %144 : vector<8x128xf32>
    %146 = arith.mulf %142, %107 : vector<8x128xf32>
    %147 = arith.mulf %141, %145 : vector<8x128xf32>
    %148 = arith.addf %146, %147 : vector<8x128xf32>
    %149 = math.tanh %148 : vector<8x128xf32>
    %150 = arith.mulf %143, %149 : vector<8x128xf32>
    %151 = tpu.concatenate %150, %129 in 1 : vector<8x128xf32>, vector<8x64xf32> -> vector<8x192xf32>
    %cst_30 = arith.constant dense<0.000000e+00> : vector<8x256xf32>
    %152 = tpu.matmul %151, %1, %cst_30 {dimension_numbers = #tpu.dot_dimension_numbers<[1], [0], [0], [1], [0, 0, 1, 1], [], []>} : vector<8x192xf32>, vector<192x256xf32>, vector<8x256xf32> -> vector<8x256xf32>
    %153 = vector.broadcast %2 : vector<1x256xf32> to vector<8x256xf32>
    %154 = arith.addf %152, %153 : vector<8x256xf32>
    %155 = vector.extract_strided_slice %154 {offsets = [0, 0], sizes = [8, 192], strides = [1, 1]} : vector<8x256xf32> to vector<8x192xf32>
    %156 = arith.negf %155 : vector<8x192xf32>
    %157 = math.exp %156 : vector<8x192xf32>
    %cst_31 = arith.constant 1.000000e+00 : f32
    %158 = vector.broadcast %cst_31 : f32 to vector<8x192xf32>
    %159 = arith.addf %158, %157 : vector<8x192xf32>
    %160 = arith.divf %158, %159 : vector<8x192xf32>
    %161 = vector.extract_strided_slice %160 {offsets = [0, 0], sizes = [8, 64], strides = [1, 1]} : vector<8x192xf32> to vector<8x64xf32>
    %162 = vector.extract_strided_slice %160 {offsets = [0, 64], sizes = [8, 64], strides = [1, 1]} : vector<8x192xf32> to vector<8x64xf32>
    %163 = vector.extract_strided_slice %160 {offsets = [0, 128], sizes = [8, 64], strides = [1, 1]} : vector<8x192xf32> to vector<8x64xf32>
    %164 = vector.extract_strided_slice %154 {offsets = [0, 192], sizes = [8, 64], strides = [1, 1]} : vector<8x256xf32> to vector<8x64xf32>
    %165 = math.tanh %164 : vector<8x64xf32>
    %166 = arith.mulf %162, %127 : vector<8x64xf32>
    %167 = arith.mulf %161, %165 : vector<8x64xf32>
    %168 = arith.addf %166, %167 : vector<8x64xf32>
    %169 = math.tanh %168 : vector<8x64xf32>
    %170 = arith.mulf %163, %169 : vector<8x64xf32>
    %c4_i32 = arith.constant 4 : i32
    %171 = arith.index_cast %c4_i32 : i32 to index
    %c0_32 = arith.constant 0 : index
    %c0_33 = arith.constant 0 : index
    %172 = vector.load %arg0[%171, %c0_32, %c0_33] : memref<8x8x512xf32, #tpu.memory_space<vmem>>, vector<1x8x512xf32>
    %173 = vector.shape_cast %172 : vector<1x8x512xf32> to vector<8x512xf32>
    %cst_34 = arith.constant dense<0.000000e+00> : vector<8x512xf32>
    %174 = tpu.matmul %150, %0, %cst_34 {dimension_numbers = #tpu.dot_dimension_numbers<[1], [0], [0], [1], [0, 0, 1, 1], [], []>} : vector<8x128xf32>, vector<128x512xf32>, vector<8x512xf32> -> vector<8x512xf32>
    %175 = arith.addf %173, %174 : vector<8x512xf32>
    %176 = vector.extract_strided_slice %175 {offsets = [0, 0], sizes = [8, 384], strides = [1, 1]} : vector<8x512xf32> to vector<8x384xf32>
    %177 = arith.negf %176 : vector<8x384xf32>
    %178 = math.exp %177 : vector<8x384xf32>
    %cst_35 = arith.constant 1.000000e+00 : f32
    %179 = vector.broadcast %cst_35 : f32 to vector<8x384xf32>
    %180 = arith.addf %179, %178 : vector<8x384xf32>
    %181 = arith.divf %179, %180 : vector<8x384xf32>
    %182 = vector.extract_strided_slice %181 {offsets = [0, 0], sizes = [8, 128], strides = [1, 1]} : vector<8x384xf32> to vector<8x128xf32>
    %183 = vector.extract_strided_slice %181 {offsets = [0, 128], sizes = [8, 128], strides = [1, 1]} : vector<8x384xf32> to vector<8x128xf32>
    %184 = vector.extract_strided_slice %181 {offsets = [0, 256], sizes = [8, 128], strides = [1, 1]} : vector<8x384xf32> to vector<8x128xf32>
    %185 = vector.extract_strided_slice %175 {offsets = [0, 384], sizes = [8, 128], strides = [1, 1]} : vector<8x512xf32> to vector<8x128xf32>
    %186 = math.tanh %185 : vector<8x128xf32>
    %187 = arith.mulf %183, %148 : vector<8x128xf32>
    %188 = arith.mulf %182, %186 : vector<8x128xf32>
    %189 = arith.addf %187, %188 : vector<8x128xf32>
    %190 = math.tanh %189 : vector<8x128xf32>
    %191 = arith.mulf %184, %190 : vector<8x128xf32>
    %192 = tpu.concatenate %191, %170 in 1 : vector<8x128xf32>, vector<8x64xf32> -> vector<8x192xf32>
    %cst_36 = arith.constant dense<0.000000e+00> : vector<8x256xf32>
    %193 = tpu.matmul %192, %1, %cst_36 {dimension_numbers = #tpu.dot_dimension_numbers<[1], [0], [0], [1], [0, 0, 1, 1], [], []>} : vector<8x192xf32>, vector<192x256xf32>, vector<8x256xf32> -> vector<8x256xf32>
    %194 = vector.broadcast %2 : vector<1x256xf32> to vector<8x256xf32>
    %195 = arith.addf %193, %194 : vector<8x256xf32>
    %196 = vector.extract_strided_slice %195 {offsets = [0, 0], sizes = [8, 192], strides = [1, 1]} : vector<8x256xf32> to vector<8x192xf32>
    %197 = arith.negf %196 : vector<8x192xf32>
    %198 = math.exp %197 : vector<8x192xf32>
    %cst_37 = arith.constant 1.000000e+00 : f32
    %199 = vector.broadcast %cst_37 : f32 to vector<8x192xf32>
    %200 = arith.addf %199, %198 : vector<8x192xf32>
    %201 = arith.divf %199, %200 : vector<8x192xf32>
    %202 = vector.extract_strided_slice %201 {offsets = [0, 0], sizes = [8, 64], strides = [1, 1]} : vector<8x192xf32> to vector<8x64xf32>
    %203 = vector.extract_strided_slice %201 {offsets = [0, 64], sizes = [8, 64], strides = [1, 1]} : vector<8x192xf32> to vector<8x64xf32>
    %204 = vector.extract_strided_slice %201 {offsets = [0, 128], sizes = [8, 64], strides = [1, 1]} : vector<8x192xf32> to vector<8x64xf32>
    %205 = vector.extract_strided_slice %195 {offsets = [0, 192], sizes = [8, 64], strides = [1, 1]} : vector<8x256xf32> to vector<8x64xf32>
    %206 = math.tanh %205 : vector<8x64xf32>
    %207 = arith.mulf %203, %168 : vector<8x64xf32>
    %208 = arith.mulf %202, %206 : vector<8x64xf32>
    %209 = arith.addf %207, %208 : vector<8x64xf32>
    %210 = math.tanh %209 : vector<8x64xf32>
    %211 = arith.mulf %204, %210 : vector<8x64xf32>
    %c5_i32 = arith.constant 5 : i32
    %212 = arith.index_cast %c5_i32 : i32 to index
    %c0_38 = arith.constant 0 : index
    %c0_39 = arith.constant 0 : index
    %213 = vector.load %arg0[%212, %c0_38, %c0_39] : memref<8x8x512xf32, #tpu.memory_space<vmem>>, vector<1x8x512xf32>
    %214 = vector.shape_cast %213 : vector<1x8x512xf32> to vector<8x512xf32>
    %cst_40 = arith.constant dense<0.000000e+00> : vector<8x512xf32>
    %215 = tpu.matmul %191, %0, %cst_40 {dimension_numbers = #tpu.dot_dimension_numbers<[1], [0], [0], [1], [0, 0, 1, 1], [], []>} : vector<8x128xf32>, vector<128x512xf32>, vector<8x512xf32> -> vector<8x512xf32>
    %216 = arith.addf %214, %215 : vector<8x512xf32>
    %217 = vector.extract_strided_slice %216 {offsets = [0, 0], sizes = [8, 384], strides = [1, 1]} : vector<8x512xf32> to vector<8x384xf32>
    %218 = arith.negf %217 : vector<8x384xf32>
    %219 = math.exp %218 : vector<8x384xf32>
    %cst_41 = arith.constant 1.000000e+00 : f32
    %220 = vector.broadcast %cst_41 : f32 to vector<8x384xf32>
    %221 = arith.addf %220, %219 : vector<8x384xf32>
    %222 = arith.divf %220, %221 : vector<8x384xf32>
    %223 = vector.extract_strided_slice %222 {offsets = [0, 0], sizes = [8, 128], strides = [1, 1]} : vector<8x384xf32> to vector<8x128xf32>
    %224 = vector.extract_strided_slice %222 {offsets = [0, 128], sizes = [8, 128], strides = [1, 1]} : vector<8x384xf32> to vector<8x128xf32>
    %225 = vector.extract_strided_slice %222 {offsets = [0, 256], sizes = [8, 128], strides = [1, 1]} : vector<8x384xf32> to vector<8x128xf32>
    %226 = vector.extract_strided_slice %216 {offsets = [0, 384], sizes = [8, 128], strides = [1, 1]} : vector<8x512xf32> to vector<8x128xf32>
    %227 = math.tanh %226 : vector<8x128xf32>
    %228 = arith.mulf %224, %189 : vector<8x128xf32>
    %229 = arith.mulf %223, %227 : vector<8x128xf32>
    %230 = arith.addf %228, %229 : vector<8x128xf32>
    %231 = math.tanh %230 : vector<8x128xf32>
    %232 = arith.mulf %225, %231 : vector<8x128xf32>
    %233 = tpu.concatenate %232, %211 in 1 : vector<8x128xf32>, vector<8x64xf32> -> vector<8x192xf32>
    %cst_42 = arith.constant dense<0.000000e+00> : vector<8x256xf32>
    %234 = tpu.matmul %233, %1, %cst_42 {dimension_numbers = #tpu.dot_dimension_numbers<[1], [0], [0], [1], [0, 0, 1, 1], [], []>} : vector<8x192xf32>, vector<192x256xf32>, vector<8x256xf32> -> vector<8x256xf32>
    %235 = vector.broadcast %2 : vector<1x256xf32> to vector<8x256xf32>
    %236 = arith.addf %234, %235 : vector<8x256xf32>
    %237 = vector.extract_strided_slice %236 {offsets = [0, 0], sizes = [8, 192], strides = [1, 1]} : vector<8x256xf32> to vector<8x192xf32>
    %238 = arith.negf %237 : vector<8x192xf32>
    %239 = math.exp %238 : vector<8x192xf32>
    %cst_43 = arith.constant 1.000000e+00 : f32
    %240 = vector.broadcast %cst_43 : f32 to vector<8x192xf32>
    %241 = arith.addf %240, %239 : vector<8x192xf32>
    %242 = arith.divf %240, %241 : vector<8x192xf32>
    %243 = vector.extract_strided_slice %242 {offsets = [0, 0], sizes = [8, 64], strides = [1, 1]} : vector<8x192xf32> to vector<8x64xf32>
    %244 = vector.extract_strided_slice %242 {offsets = [0, 64], sizes = [8, 64], strides = [1, 1]} : vector<8x192xf32> to vector<8x64xf32>
    %245 = vector.extract_strided_slice %242 {offsets = [0, 128], sizes = [8, 64], strides = [1, 1]} : vector<8x192xf32> to vector<8x64xf32>
    %246 = vector.extract_strided_slice %236 {offsets = [0, 192], sizes = [8, 64], strides = [1, 1]} : vector<8x256xf32> to vector<8x64xf32>
    %247 = math.tanh %246 : vector<8x64xf32>
    %248 = arith.mulf %244, %209 : vector<8x64xf32>
    %249 = arith.mulf %243, %247 : vector<8x64xf32>
    %250 = arith.addf %248, %249 : vector<8x64xf32>
    %251 = math.tanh %250 : vector<8x64xf32>
    %252 = arith.mulf %245, %251 : vector<8x64xf32>
    %c6_i32 = arith.constant 6 : i32
    %253 = arith.index_cast %c6_i32 : i32 to index
    %c0_44 = arith.constant 0 : index
    %c0_45 = arith.constant 0 : index
    %254 = vector.load %arg0[%253, %c0_44, %c0_45] : memref<8x8x512xf32, #tpu.memory_space<vmem>>, vector<1x8x512xf32>
    %255 = vector.shape_cast %254 : vector<1x8x512xf32> to vector<8x512xf32>
    %cst_46 = arith.constant dense<0.000000e+00> : vector<8x512xf32>
    %256 = tpu.matmul %232, %0, %cst_46 {dimension_numbers = #tpu.dot_dimension_numbers<[1], [0], [0], [1], [0, 0, 1, 1], [], []>} : vector<8x128xf32>, vector<128x512xf32>, vector<8x512xf32> -> vector<8x512xf32>
    %257 = arith.addf %255, %256 : vector<8x512xf32>
    %258 = vector.extract_strided_slice %257 {offsets = [0, 0], sizes = [8, 384], strides = [1, 1]} : vector<8x512xf32> to vector<8x384xf32>
    %259 = arith.negf %258 : vector<8x384xf32>
    %260 = math.exp %259 : vector<8x384xf32>
    %cst_47 = arith.constant 1.000000e+00 : f32
    %261 = vector.broadcast %cst_47 : f32 to vector<8x384xf32>
    %262 = arith.addf %261, %260 : vector<8x384xf32>
    %263 = arith.divf %261, %262 : vector<8x384xf32>
    %264 = vector.extract_strided_slice %263 {offsets = [0, 0], sizes = [8, 128], strides = [1, 1]} : vector<8x384xf32> to vector<8x128xf32>
    %265 = vector.extract_strided_slice %263 {offsets = [0, 128], sizes = [8, 128], strides = [1, 1]} : vector<8x384xf32> to vector<8x128xf32>
    %266 = vector.extract_strided_slice %263 {offsets = [0, 256], sizes = [8, 128], strides = [1, 1]} : vector<8x384xf32> to vector<8x128xf32>
    %267 = vector.extract_strided_slice %257 {offsets = [0, 384], sizes = [8, 128], strides = [1, 1]} : vector<8x512xf32> to vector<8x128xf32>
    %268 = math.tanh %267 : vector<8x128xf32>
    %269 = arith.mulf %265, %230 : vector<8x128xf32>
    %270 = arith.mulf %264, %268 : vector<8x128xf32>
    %271 = arith.addf %269, %270 : vector<8x128xf32>
    %272 = math.tanh %271 : vector<8x128xf32>
    %273 = arith.mulf %266, %272 : vector<8x128xf32>
    %274 = tpu.concatenate %273, %252 in 1 : vector<8x128xf32>, vector<8x64xf32> -> vector<8x192xf32>
    %cst_48 = arith.constant dense<0.000000e+00> : vector<8x256xf32>
    %275 = tpu.matmul %274, %1, %cst_48 {dimension_numbers = #tpu.dot_dimension_numbers<[1], [0], [0], [1], [0, 0, 1, 1], [], []>} : vector<8x192xf32>, vector<192x256xf32>, vector<8x256xf32> -> vector<8x256xf32>
    %276 = vector.broadcast %2 : vector<1x256xf32> to vector<8x256xf32>
    %277 = arith.addf %275, %276 : vector<8x256xf32>
    %278 = vector.extract_strided_slice %277 {offsets = [0, 0], sizes = [8, 192], strides = [1, 1]} : vector<8x256xf32> to vector<8x192xf32>
    %279 = arith.negf %278 : vector<8x192xf32>
    %280 = math.exp %279 : vector<8x192xf32>
    %cst_49 = arith.constant 1.000000e+00 : f32
    %281 = vector.broadcast %cst_49 : f32 to vector<8x192xf32>
    %282 = arith.addf %281, %280 : vector<8x192xf32>
    %283 = arith.divf %281, %282 : vector<8x192xf32>
    %284 = vector.extract_strided_slice %283 {offsets = [0, 0], sizes = [8, 64], strides = [1, 1]} : vector<8x192xf32> to vector<8x64xf32>
    %285 = vector.extract_strided_slice %283 {offsets = [0, 64], sizes = [8, 64], strides = [1, 1]} : vector<8x192xf32> to vector<8x64xf32>
    %286 = vector.extract_strided_slice %283 {offsets = [0, 128], sizes = [8, 64], strides = [1, 1]} : vector<8x192xf32> to vector<8x64xf32>
    %287 = vector.extract_strided_slice %277 {offsets = [0, 192], sizes = [8, 64], strides = [1, 1]} : vector<8x256xf32> to vector<8x64xf32>
    %288 = math.tanh %287 : vector<8x64xf32>
    %289 = arith.mulf %285, %250 : vector<8x64xf32>
    %290 = arith.mulf %284, %288 : vector<8x64xf32>
    %291 = arith.addf %289, %290 : vector<8x64xf32>
    %292 = math.tanh %291 : vector<8x64xf32>
    %293 = arith.mulf %286, %292 : vector<8x64xf32>
    %c7_i32 = arith.constant 7 : i32
    %294 = arith.index_cast %c7_i32 : i32 to index
    %c0_50 = arith.constant 0 : index
    %c0_51 = arith.constant 0 : index
    %295 = vector.load %arg0[%294, %c0_50, %c0_51] : memref<8x8x512xf32, #tpu.memory_space<vmem>>, vector<1x8x512xf32>
    %296 = vector.shape_cast %295 : vector<1x8x512xf32> to vector<8x512xf32>
    %cst_52 = arith.constant dense<0.000000e+00> : vector<8x512xf32>
    %297 = tpu.matmul %273, %0, %cst_52 {dimension_numbers = #tpu.dot_dimension_numbers<[1], [0], [0], [1], [0, 0, 1, 1], [], []>} : vector<8x128xf32>, vector<128x512xf32>, vector<8x512xf32> -> vector<8x512xf32>
    %298 = arith.addf %296, %297 : vector<8x512xf32>
    %299 = vector.extract_strided_slice %298 {offsets = [0, 0], sizes = [8, 384], strides = [1, 1]} : vector<8x512xf32> to vector<8x384xf32>
    %300 = arith.negf %299 : vector<8x384xf32>
    %301 = math.exp %300 : vector<8x384xf32>
    %cst_53 = arith.constant 1.000000e+00 : f32
    %302 = vector.broadcast %cst_53 : f32 to vector<8x384xf32>
    %303 = arith.addf %302, %301 : vector<8x384xf32>
    %304 = arith.divf %302, %303 : vector<8x384xf32>
    %305 = vector.extract_strided_slice %304 {offsets = [0, 0], sizes = [8, 128], strides = [1, 1]} : vector<8x384xf32> to vector<8x128xf32>
    %306 = vector.extract_strided_slice %304 {offsets = [0, 128], sizes = [8, 128], strides = [1, 1]} : vector<8x384xf32> to vector<8x128xf32>
    %307 = vector.extract_strided_slice %304 {offsets = [0, 256], sizes = [8, 128], strides = [1, 1]} : vector<8x384xf32> to vector<8x128xf32>
    %308 = vector.extract_strided_slice %298 {offsets = [0, 384], sizes = [8, 128], strides = [1, 1]} : vector<8x512xf32> to vector<8x128xf32>
    %309 = math.tanh %308 : vector<8x128xf32>
    %310 = arith.mulf %306, %271 : vector<8x128xf32>
    %311 = arith.mulf %305, %309 : vector<8x128xf32>
    %312 = arith.addf %310, %311 : vector<8x128xf32>
    %313 = math.tanh %312 : vector<8x128xf32>
    %314 = arith.mulf %307, %313 : vector<8x128xf32>
    %315 = tpu.concatenate %314, %293 in 1 : vector<8x128xf32>, vector<8x64xf32> -> vector<8x192xf32>
    %cst_54 = arith.constant dense<0.000000e+00> : vector<8x256xf32>
    %316 = tpu.matmul %315, %1, %cst_54 {dimension_numbers = #tpu.dot_dimension_numbers<[1], [0], [0], [1], [0, 0, 1, 1], [], []>} : vector<8x192xf32>, vector<192x256xf32>, vector<8x256xf32> -> vector<8x256xf32>
    %317 = vector.broadcast %2 : vector<1x256xf32> to vector<8x256xf32>
    %318 = arith.addf %316, %317 : vector<8x256xf32>
    %319 = vector.extract_strided_slice %318 {offsets = [0, 0], sizes = [8, 192], strides = [1, 1]} : vector<8x256xf32> to vector<8x192xf32>
    %320 = arith.negf %319 : vector<8x192xf32>
    %321 = math.exp %320 : vector<8x192xf32>
    %cst_55 = arith.constant 1.000000e+00 : f32
    %322 = vector.broadcast %cst_55 : f32 to vector<8x192xf32>
    %323 = arith.addf %322, %321 : vector<8x192xf32>
    %324 = arith.divf %322, %323 : vector<8x192xf32>
    %325 = vector.extract_strided_slice %324 {offsets = [0, 0], sizes = [8, 64], strides = [1, 1]} : vector<8x192xf32> to vector<8x64xf32>
    %326 = vector.extract_strided_slice %324 {offsets = [0, 64], sizes = [8, 64], strides = [1, 1]} : vector<8x192xf32> to vector<8x64xf32>
    %327 = vector.extract_strided_slice %324 {offsets = [0, 128], sizes = [8, 64], strides = [1, 1]} : vector<8x192xf32> to vector<8x64xf32>
    %328 = vector.extract_strided_slice %318 {offsets = [0, 192], sizes = [8, 64], strides = [1, 1]} : vector<8x256xf32> to vector<8x64xf32>
    %329 = math.tanh %328 : vector<8x64xf32>
    %330 = arith.mulf %326, %291 : vector<8x64xf32>
    %331 = arith.mulf %325, %329 : vector<8x64xf32>
    %332 = arith.addf %330, %331 : vector<8x64xf32>
    %333 = math.tanh %332 : vector<8x64xf32>
    %334 = arith.mulf %327, %333 : vector<8x64xf32>
    %c8_i32 = arith.constant 8 : i32
    %c0_56 = arith.constant 0 : index
    %c0_57 = arith.constant 0 : index
    %335 = vector.load %arg4[%c0_56, %c0_57] : memref<64x1xf32, #tpu.memory_space<vmem>>, vector<64x1xf32>
    %cst_58 = arith.constant dense<0.000000e+00> : vector<8x1xf32>
    %336 = tpu.matmul %334, %335, %cst_58 {dimension_numbers = #tpu.dot_dimension_numbers<[1], [0], [0], [1], [0, 0, 1, 1], [], []>} : vector<8x64xf32>, vector<64x1xf32>, vector<8x1xf32> -> vector<8x1xf32>
    %c0_59 = arith.constant 0 : index
    %c0_60 = arith.constant 0 : index
    %337 = vector.load %arg5[%c0_59, %c0_60] : memref<1x1xf32, #tpu.memory_space<vmem>>, vector<1x1xf32>
    %338 = vector.broadcast %337 : vector<1x1xf32> to vector<8x1xf32>
    %339 = arith.addf %336, %338 : vector<8x1xf32>
    %c0_61 = arith.constant 0 : index
    %c0_62 = arith.constant 0 : index
    %340 = vector.load %arg6[%c0_61, %c0_62] : memref<8x1xf32, #tpu.memory_space<vmem>>, vector<8x1xf32>
    tpu.vector_store %arg6[%c0_61, %c0_62], %339 {strides = array<i32>} : memref<8x1xf32, #tpu.memory_space<vmem>>, vector<8x1xf32>,
    return
  }
}

</mosaic_0001>

<bundles_post_ra>
// kernel: tpu_custom_call.1
= control target key start
LH: loop header
LB: loop body
LE: loop exit
PB: predicated region body
PF: predicated region fallthrough
CT: control target
= control target key end

     0   :  { %s5110_s0 = inlined_call_operand.hbm [shape: f32[8,8,512], index: 0, kind: input, shape index: {}]   ;;  %s5111_s1 = inlined_call_operand.hbm [shape: f32[128,512], index: 1, kind: input, shape index: {}]   ;;  %s5112_s2 = inlined_call_operand.hbm [shape: f32[192,256], index: 2, kind: input, shape index: {}]   ;;  %s5113_s3 = inlined_call_operand.vmem [shape: f32[1,256], index: 3, kind: input, shape index: {}]   ;;  %s5114_s4 = inlined_call_operand.vmem [shape: f32[64,1], index: 4, kind: input, shape index: {}]   ;;  %s5115_s5 = inlined_call_operand.<no memory space> [shape: f32[1,1], index: 5, kind: input, shape index: {}]   ;;  %s5116_s6 = inlined_call_operand.vmem [shape: f32[8,1], index: 6, kind: output, shape index: {}]  }
   0x1   :  { %v11_v0 = vstv %s5115_s5 }
   0x2   :  { %12 = vst [vmem:[#allocation2] sm:$0x1] %v11_v0 }
   0x3   :  { %13 = vsyncpa [#allocation4], 0 }
   0x4   :  { %14 = vsyncpa [#allocation6], 0  ;;  %s32_s25 = sshll.u32 %s5111_s1, 4  ;;  %s3250_s26 = smov [#allocation5]   ;;  %s33_s25 = int_to_ptr.hbm [resolvable:$true] %s32_s25 }
   0x5   :  { %s34_s27 = sshll.u32 %s3250_s26, 4  ;;  %s19_s30 = sshll.u32 %s5110_s0, 4  ;;  %s35_s27 = int_to_ptr.vmem [resolvable:$true] %s34_s27  ;;  %s20_s30 = int_to_ptr.hbm [resolvable:$true] %s19_s30 }
   0x6   :  { %s3251_s7 = smov 512   ;;  %s3252_s8 = smov 32  }
   0x7   :  { %40 = dma.hbm_to_vmem [thread:$0]  %s33_s25, 8192, %s35_s27, [#allocation6], %s3251_s7, %s3251_s7, %s3252_s8  }
   0x8   :  { %s3253_s5 = smov [#allocation3]   ;;  %s45_s12 = sshll.u32 %s5112_s2, 4  ;;  %s46_s12 = int_to_ptr.hbm [resolvable:$true] %s45_s12 }
   0x9   :  { %s21_s9 = sshll.u32 %s3253_s5, 4  ;;  %s3254_s1 = smov [#allocation7]   ;;  %s22_s9 = int_to_ptr.vmem [resolvable:$true] %s21_s9 }
   0xa   :  { %27 = dma.hbm_to_vmem [thread:$0]  %s20_s30, 4096, %s22_s9, [#allocation4], %s3251_s7, %s3251_s7, %s3252_s8  }
   0xb   :  { %s47_s13 = sshll.u32 %s3254_s1, 4  ;;  %s3255_s14 = smov 256   ;;  %s48_s13 = int_to_ptr.vmem [resolvable:$true] %s47_s13 }
   0xc   :  { %s3256_s15 = smov 16  }
   0xd   :  { %53 = dma.hbm_to_vmem [thread:$0]  %s46_s12, 6144, %s48_s13, [#allocation6], %s3255_s14, %s3255_s14, %s3256_s15  }
   0xe   :  { %3246 = dma.done.wait [#allocation4], 4096  }
   0xf   :  { %3247 = vsyncadd [#allocation4], 4294963200 }
  0x10   :  { %3248 = dma.done.wait [#allocation6], 14336  }
  0x11   :  { %3249 = vsyncadd [#allocation6], 4294952960  ;;  %v3306_v1 = vld [vmem:[#allocation5 + $0x1e0] sm:$0xff]  ;;  %v3308_v2 = vld [vmem:[#allocation5 + $0x1e8] sm:$0xff]  ;;  %v5127_v62 = vmov 0.0  }
  0x12   :  { %v3310_v3 = vld [vmem:[#allocation5 + $0x1f0] sm:$0xff]  ;;  %189 = vmatpush.msra.mxu0 %v3306_v1  ;;  %209 = vmatpush.msra.mxu1 %v3308_v2  ;;  %v3314_v4 = vld [vmem:[#allocation5 + $0x1c0] sm:$0xff]  ;;  %v3316_v5 = vld [vmem:[#allocation5 + $0x1c8] sm:$0xff] }
  0x13   :  { %5327 = vst [vmem:[#allocation10_spill] sm:$0xff] %v3314_v4  ;;  %v3318_v6 = vld [vmem:[#allocation5 + $0x1d0] sm:$0xff]  ;;  %229 = vmatpush.msra.mxu2 %v3310_v3  ;;  %v3321_v7 = vld [vmem:[#allocation5 + $0x1a0] sm:$0xff]  ;;  %v3323_v8 = vld [vmem:[#allocation5 + $0x1a8] sm:$0xff] }
  0x14   :  { %190 = vmatpush.msra.mxu0 %v3314_v4  ;;  %210 = vmatpush.msra.mxu1 %v3316_v5  ;;  %v3327_v9 = vld [vmem:[#allocation5 + $0x1b0] sm:$0xff]  ;;  %v3330_v10 = vld [vmem:[#allocation5 + $0x180] sm:$0xff]  ;;  %v3332_v11 = vld [vmem:[#allocation5 + $0x188] sm:$0xff] }
  0x15   :  { %230 = vmatpush.msra.mxu2 %v3318_v6  ;;  %v3336_v12 = vld [vmem:[#allocation5 + $0x190] sm:$0xff]  ;;  %v3339_v13 = vld [vmem:[#allocation5 + $0x160] sm:$0xff]  ;;  %v3341_v14 = vld [vmem:[#allocation5 + $0x168] sm:$0xff] }
  0x16   :  { %191 = vmatpush.msra.mxu0 %v3321_v7  ;;  %211 = vmatpush.msra.mxu1 %v3323_v8  ;;  %5328 = vst [vmem:[#allocation11_spill] sm:$0xff] %v3336_v12  ;;  %v3345_v15 = vld [vmem:[#allocation5 + $0x170] sm:$0xff]  ;;  %v3348_v16 = vld [vmem:[#allocation5 + $0x140] sm:$0xff]  ;;  %v3350_v17 = vld [vmem:[#allocation5 + $0x148] sm:$0xff] }
  0x17   :  { %231 = vmatpush.msra.mxu2 %v3327_v9  ;;  %v3352_v18 = vld [vmem:[#allocation5 + $0x1f8] sm:$0xff]  ;;  %v3356_v19 = vld [vmem:[#allocation5 + $0x150] sm:$0xff]  ;;  %v3361_v21 = vld [vmem:[#allocation5 + $0x120] sm:$0xff] }
  0x18   :  { %192 = vmatpush.msra.mxu0 %v3330_v10  ;;  %212 = vmatpush.msra.mxu1 %v3332_v11  ;;  %5329 = vst [vmem:[#allocation12_spill] sm:$0xff] %v3352_v18  ;;  %v3358_v20 = vld [vmem:[#allocation5 + $0x1d8] sm:$0xff]  ;;  %v3363_v22 = vld [vmem:[#allocation5 + $0x128] sm:$0xff]  ;;  %v3368_v23 = vld [vmem:[#allocation5 + $0x130] sm:$0xff] }
  0x19   :  { %232 = vmatpush.msra.mxu2 %v3336_v12  ;;  %5330 = vst [vmem:[#allocation13_spill] sm:$0xff] %v3358_v20  ;;  %249 = vmatpush.msra.mxu3 %v3352_v18  ;;  %v3370_v24 = vld [vmem:[#allocation5 + $0x1b8] sm:$0xff]  ;;  %v3373_v25 = vld [vmem:[#allocation5 + $0x100] sm:$0xff]  ;;  %v3375_v26 = vld [vmem:[#allocation5 + $0x108] sm:$0xff] }
  0x1a   :  { %193 = vmatpush.msra.mxu0 %v3339_v13  ;;  %213 = vmatpush.msra.mxu1 %v3341_v14  ;;  %5331 = vst [vmem:[#allocation14_spill] sm:$0xff] %v3370_v24  ;;  %v3380_v27 = vld [vmem:[#allocation5 + $0x110] sm:$0xff]  ;;  %v3382_v28 = vld [vmem:[#allocation5 + $0x198] sm:$0xff]  ;;  %v3385_v29 = vld [vmem:[#allocation5 + $0xe0] sm:$0xff] }
  0x1b   :  { %233 = vmatpush.msra.mxu2 %v3345_v15  ;;  %250 = vmatpush.msra.mxu3 %v3358_v20  ;;  %5332 = vst [vmem:[#allocation15_spill] sm:$0xff] %v3380_v27  ;;  %v3387_v30 = vld [vmem:[#allocation5 + $0xe8] sm:$0xff]  ;;  %v3392_v31 = vld [vmem:[#allocation5 + $0xf0] sm:$0xff]  ;;  %v3394_v32 = vld [vmem:[#allocation5 + $0x178] sm:$0xff] }
  0x1c   :  { %194 = vmatpush.msra.mxu0 %v3348_v16  ;;  %214 = vmatpush.msra.mxu1 %v3350_v17  ;;  %5333 = vst [vmem:[#allocation16_spill] sm:$0xff] %v3382_v28  ;;  %v3397_v33 = vld [vmem:[#allocation5 + $0xc0] sm:$0xff]  ;;  %v3399_v34 = vld [vmem:[#allocation5 + $0xc8] sm:$0xff]  ;;  %v3404_v35 = vld [vmem:[#allocation5 + $0xd0] sm:$0xff] }
  0x1d   :  { %234 = vmatpush.msra.mxu2 %v3356_v19  ;;  %251 = vmatpush.msra.mxu3 %v3370_v24  ;;  %5334 = vst [vmem:[#allocation17_spill] sm:$0xff] %v3392_v31  ;;  %v3406_v36 = vld [vmem:[#allocation5 + $0x158] sm:$0xff]  ;;  %v3409_v37 = vld [vmem:[#allocation5 + $0xa0] sm:$0xff]  ;;  %v3411_v38 = vld [vmem:[#allocation5 + $0xa8] sm:$0xff] }
  0x1e   :  { %195 = vmatpush.msra.mxu0 %v3361_v21  ;;  %215 = vmatpush.msra.mxu1 %v3363_v22  ;;  %5335 = vst [vmem:[#allocation18_spill] sm:$0xff] %v3394_v32  ;;  %v3416_v39 = vld [vmem:[#allocation5 + $0xb0] sm:$0xff]  ;;  %v3418_v40 = vld [vmem:[#allocation5 + $0x138] sm:$0xff]  ;;  %v3421_v41 = vld [vmem:[#allocation5 + $0x80] sm:$0xff] }
  0x1f   :  { %235 = vmatpush.msra.mxu2 %v3368_v23  ;;  %252 = vmatpush.msra.mxu3 %v3382_v28  ;;  %5336 = vst [vmem:[#allocation19_spill] sm:$0xff] %v3404_v35  ;;  %v3423_v42 = vld [vmem:[#allocation5 + $0x88] sm:$0xff]  ;;  %v3428_v43 = vld [vmem:[#allocation5 + $0x90] sm:$0xff]  ;;  %v3430_v44 = vld [vmem:[#allocation5 + $0x118] sm:$0xff] }
  0x20   :  { %196 = vmatpush.msra.mxu0 %v3373_v25  ;;  %216 = vmatpush.msra.mxu1 %v3375_v26  ;;  %5337 = vst [vmem:[#allocation20_spill] sm:$0xff] %v3406_v36  ;;  %v3433_v45 = vld [vmem:[#allocation5 + $0x60] sm:$0xff]  ;;  %v3435_v46 = vld [vmem:[#allocation5 + $0x68] sm:$0xff]  ;;  %v3440_v47 = vld [vmem:[#allocation5 + $0x70] sm:$0xff] }
  0x21   :  { %236 = vmatpush.msra.mxu2 %v3380_v27  ;;  %253 = vmatpush.msra.mxu3 %v3394_v32  ;;  %5338 = vst [vmem:[#allocation21_spill] sm:$0xff] %v3416_v39  ;;  %v3442_v48 = vld [vmem:[#allocation5 + $0xf8] sm:$0xff]  ;;  %v3445_v49 = vld [vmem:[#allocation5 + $0x40] sm:$0xff]  ;;  %v3447_v50 = vld [vmem:[#allocation5 + $0x48] sm:$0xff] }
  0x22   :  { %197 = vmatpush.msra.mxu0 %v3385_v29  ;;  %217 = vmatpush.msra.mxu1 %v3387_v30  ;;  %5339 = vst [vmem:[#allocation22_spill] sm:$0xff] %v3418_v40  ;;  %v3452_v51 = vld [vmem:[#allocation5 + $0x50] sm:$0xff]  ;;  %v3454_v52 = vld [vmem:[#allocation5 + $0xd8] sm:$0xff]  ;;  %v3457_v53 = vld [vmem:[#allocation5 + $0x20] sm:$0xff] }
  0x23   :  { %237 = vmatpush.msra.mxu2 %v3392_v31  ;;  %254 = vmatpush.msra.mxu3 %v3406_v36  ;;  %5340 = vst [vmem:[#allocation23_spill] sm:$0xff] %v3428_v43  ;;  %v3459_v54 = vld [vmem:[#allocation5 + $0x28] sm:$0xff]  ;;  %v3464_v55 = vld [vmem:[#allocation5 + $0x30] sm:$0xff]  ;;  %v3466_v56 = vld [vmem:[#allocation5 + $0xb8] sm:$0xff] }
  0x24   :  { %198 = vmatpush.msra.mxu0 %v3397_v33  ;;  %218 = vmatpush.msra.mxu1 %v3399_v34  ;;  %5341 = vst [vmem:[#allocation24_spill] sm:$0xff] %v3430_v44  ;;  %v3469_v57 = vld [vmem:[#allocation5] sm:$0xff]  ;;  %v3471_v58 = vld [vmem:[#allocation5 + $0x8] sm:$0xff]  ;;  %v3476_v59 = vld [vmem:[#allocation5 + $0x10] sm:$0xff] }
  0x25   :  { %238 = vmatpush.msra.mxu2 %v3404_v35  ;;  %255 = vmatpush.msra.mxu3 %v3418_v40  ;;  %5342 = vst [vmem:[#allocation25_spill] sm:$0xff] %v3440_v47  ;;  %v3482_v60 = vld [vmem:[#allocation5 + $0x98] sm:$0xff]  ;;  %v3484_v61 = vld [vmem:[#allocation7 + $0xf0] sm:$0xff] }
  0x26   :  { %199 = vmatpush.msra.mxu0 %v3409_v37  ;;  %219 = vmatpush.msra.mxu1 %v3411_v38  ;;  %5343 = vst [vmem:[#allocation26_spill] sm:$0xff] %v3442_v48  ;;  %v3488_v63 = vld [vmem:[#allocation7 + $0xf8] sm:$0xff]  ;;  %v3490_v0 = vld [vmem:[#allocation7 + $0x170] sm:$0xff] }
  0x27   :  { %239 = vmatpush.msra.mxu2 %v3416_v39  ;;  %256 = vmatpush.msra.mxu3 %v3430_v44  ;;  %5344 = vst [vmem:[#allocation27_spill] sm:$0xff] %v3452_v51 }
  0x28   :  { %200 = vmatpush.msra.mxu0 %v3421_v41  ;;  %220 = vmatpush.msra.mxu1 %v3423_v42  ;;  %5345 = vst [vmem:[#allocation28_spill] sm:$0xff] %v3454_v52 }
  0x29   :  { %240 = vmatpush.msra.mxu2 %v3428_v43  ;;  %5346 = vst [vmem:[#allocation29_spill] sm:$0xff] %v3457_v53  ;;  %257 = vmatpush.msra.mxu3 %v3442_v48  ;;  %v3505_v43 = vld [vmem:[#allocation7 + $0xd0] sm:$0xff] }
  0x2a   :  { %201 = vmatpush.msra.mxu0 %v3433_v45  ;;  %221 = vmatpush.msra.mxu1 %v3435_v46  ;;  %5347 = vst [vmem:[#allocation30_spill] sm:$0xff] %v3464_v55 }
  0x2b   :  { %241 = vmatpush.msra.mxu2 %v3440_v47  ;;  %5348 = vst [vmem:[#allocation31_spill] sm:$0xff] %v3466_v56  ;;  %258 = vmatpush.msra.mxu3 %v3454_v52  ;;  %v3502_v47 = vld [vmem:[#allocation5 + $0x58] sm:$0xff] }
  0x2c   :  { %202 = vmatpush.msra.mxu0 %v3445_v49  ;;  %222 = vmatpush.msra.mxu1 %v3447_v50  ;;  %5349 = vst [vmem:[#allocation32_spill] sm:$0xff] %v3469_v57 }
  0x2d   :  { %242 = vmatpush.msra.mxu2 %v3452_v51  ;;  %5350 = vst [vmem:[#allocation33_spill] sm:$0xff] %v3471_v58  ;;  %259 = vmatpush.msra.mxu3 %v3466_v56  ;;  %v3496_v51 = vld [vmem:[#allocation7 + $0xe0] sm:$0xff] }
  0x2e   :  { %203 = vmatpush.msra.mxu0 %v3457_v53  ;;  %223 = vmatpush.msra.mxu1 %v3459_v54  ;;  %5351 = vst [vmem:[#allocation34_spill] sm:$0xff] %v3476_v59 }
  0x2f   :  { %243 = vmatpush.msra.mxu2 %v3464_v55  ;;  %5352 = vst [vmem:[#allocation35_spill] sm:$0xff] %v3482_v60  ;;  %v3494_v55 = vld [vmem:[#allocation5 + $0x78] sm:$0xff]  ;;  %260 = vmatpush.msra.mxu3 %v3482_v60 }
  0x30   :  { %204 = vmatpush.msra.mxu0 %v3469_v57  ;;  %224 = vmatpush.msra.mxu1 %v3471_v58  ;;  %5353 = vst [vmem:[#allocation36_spill] sm:$0xff] %v3484_v61  ;;  %v3512_v58 = vld [vmem:[#allocation5 + $0x38] sm:$0xff] }
  0x31   :  { %244 = vmatpush.msra.mxu2 %v3476_v59  ;;  %205 = vmatmul.f32.vlgmr.msra.gmra.mxu0 %v5127_v62  ;;  %5354 = vst [vmem:[#allocation37_spill] sm:$0xff] %v3488_v63  ;;  %v3500_v59 = vld [vmem:[#allocation7 + $0xe8] sm:$0xff]  ;;  %v3521_v60 = vld [vmem:[#allocation5 + $0x18] sm:$0xff] }
  0x32   :  { %5355 = vst [vmem:[#allocation38_spill] sm:$0xff] %v3490_v0  ;;  %225 = vmatmul.f32.vlgmr.msra.gmra.mxu1 %v5127_v62  ;;  %245 = vmatmul.f32.vlgmr.msra.gmra.mxu2 %v5127_v62  ;;  %v3510_v62 = vld [vmem:[#allocation7 + $0xd8] sm:$0xff] }
  0x33   :  { %5356 = vst [vmem:[#allocation39_spill] sm:$0xff] %v3494_v55  ;;  %345 = vmatpush.msrb.mxu0 %v3484_v61  ;;  %385 = vmatpush.msrb.mxu2 %v3488_v63  ;;  %v3515_v61 = vld [vmem:[#allocation7 + $0xc0] sm:$0xff]  ;;  %v3519_v63 = vld [vmem:[#allocation7 + $0xc8] sm:$0xff] }
  0x34   :  { %5357 = vst [vmem:[#allocation40_spill] sm:$0xff] %v3496_v51  ;;  %373 = vmatpush.msrb.mxu1 %v3490_v0  ;;  %261 = vmatpush.msra.mxu3 %v3494_v55  ;;  %v3524_v55 = vld [vmem:[#allocation7 + $0xb0] sm:$0xff] }
  0x35   :  { %5358 = vst [vmem:[#allocation41_spill] sm:$0xff] %v3500_v59  ;;  %346 = vmatpush.msrb.mxu0 %v3496_v51  ;;  %386 = vmatpush.msrb.mxu2 %v3500_v59  ;;  %v3528_v51 = vld [vmem:[#allocation7 + $0xb8] sm:$0xff] }
  0x36   :  { %5359 = vst [vmem:[#allocation42_spill] sm:$0xff] %v3502_v47  ;;  %262 = vmatpush.msra.mxu3 %v3502_v47  ;;  %v3531_v59 = vld [vmem:[#allocation7 + $0x178] sm:$0xff]  ;;  %v3570_v47 = vld [vmem:[#allocation7 + $0x148] sm:$0xff] }
  0x37   :  { %5360 = vst [vmem:[#allocation43_spill] sm:$0xff] %v3505_v43  ;;  %347 = vmatpush.msrb.mxu0 %v3505_v43  ;;  %387 = vmatpush.msrb.mxu2 %v3510_v62  ;;  %v5369_v43 = vmov 0.0  }
  0x38   :  { %5361 = vst [vmem:[#allocation44_spill] sm:$0xff] %v3510_v62  ;;  %263 = vmatpush.msra.mxu3 %v3512_v58  ;;  %v3538_v62 = vld [vmem:[#allocation7 + $0xa0] sm:$0xff] }
  0x39   :  { %5362 = vst [vmem:[#allocation45_spill] sm:$0xff] %v3512_v58  ;;  %348 = vmatpush.msrb.mxu0 %v3515_v61  ;;  %388 = vmatpush.msrb.mxu2 %v3519_v63  ;;  %v3540_v58 = vld [vmem:[#allocation7 + $0x160] sm:$0xff] }
  0x3a   :  { %5363 = vst [vmem:[#allocation46_spill] sm:$0xff] %v3515_v61  ;;  %264 = vmatpush.msra.mxu3 %v3521_v60  ;;  %v3542_v61 = vld [vmem:[#allocation7 + $0xa8] sm:$0xff]  ;;  %374 = vmatpush.msrb.mxu1 %v3540_v58 }
  0x3b   :  { %5364 = vst [vmem:[#allocation47_spill] sm:$0xff] %v3519_v63  ;;  %349 = vmatpush.msrb.mxu0 %v3524_v55  ;;  %265 = vmatmul.f32.vlgmr.msra.gmra.mxu3 %v5369_v43  ;;  %v3546_v63 = vld [vmem:[#allocation7 + $0x168] sm:$0xff] }
  0x3c   :  { %5365 = vst [vmem:[#allocation48_spill] sm:$0xff] %v3521_v60  ;;  %389 = vmatpush.msrb.mxu2 %v3528_v51  ;;  %413 = vmatpush.msrb.mxu3 %v3531_v59  ;;  %v3558_v60 = vld [vmem:[#allocation7 + $0x158] sm:$0xff] }
  0x3d   :  { %5366 = vst [vmem:[#allocation49_spill] sm:$0xff] %v3524_v55  ;;  %350 = vmatpush.msrb.mxu0 %v3538_v62  ;;  %v3550_v55 = vld [vmem:[#allocation7 + $0x90] sm:$0xff] }
  0x3e   :  { %5367 = vst [vmem:[#allocation50_spill] sm:$0xff] %v3528_v51  ;;  %390 = vmatpush.msrb.mxu2 %v3542_v61  ;;  %414 = vmatpush.msrb.mxu3 %v3546_v63  ;;  %v3552_v51 = vld [vmem:[#allocation7 + $0x150] sm:$0xff] }
  0x3f   :  { %5368 = vst [vmem:[#allocation51_spill] sm:$0xff] %v3531_v59  ;;  %v3554_v59 = vld [vmem:[#allocation7 + $0x98] sm:$0xff]  ;;  %351 = vmatpush.msrb.mxu0 %v3550_v55  ;;  %375 = vmatpush.msrb.mxu1 %v3552_v51 }
  0x40   :  { %5370 = vst [vmem:[#allocation52_spill] sm:$0xff] %v3538_v62  ;;  %391 = vmatpush.msrb.mxu2 %v3554_v59  ;;  %415 = vmatpush.msrb.mxu3 %v3558_v60  ;;  %v3562_v62 = vld [vmem:[#allocation7 + $0x80] sm:$0xff] }
  0x41   :  { %5371 = vst [vmem:[#allocation53_spill] sm:$0xff] %v3540_v58  ;;  %352 = vmatpush.msrb.mxu0 %v3562_v62 }
  0x42   :  { %5372 = vst [vmem:[#allocation54_spill] sm:$0xff] %v3542_v61  ;;  %v3564_v61 = vld [vmem:[#allocation7 + $0x140] sm:$0xff]  ;;  %416 = vmatpush.msrb.mxu3 %v3570_v47 }
  0x43   :  { %5373 = vst [vmem:[#allocation55_spill] sm:$0xff] %v3546_v63  ;;  %v3566_v63 = vld [vmem:[#allocation7 + $0x88] sm:$0xff]  ;;  %376 = vmatpush.msrb.mxu1 %v3564_v61 }
  0x44   :  { %5374 = vst [vmem:[#allocation56_spill] sm:$0xff] %v3550_v55  ;;  %392 = vmatpush.msrb.mxu2 %v3566_v63  ;;  %v3574_v55 = vld [vmem:[#allocation7 + $0x70] sm:$0xff] }
  0x45   :  { %5375 = vst [vmem:[#allocation57_spill] sm:$0xff] %v3552_v51  ;;  %353 = vmatpush.msrb.mxu0 %v3574_v55  ;;  %v3582_v51 = vld [vmem:[#allocation7 + $0x138] sm:$0xff] }
  0x46   :  { %5376 = vst [vmem:[#allocation58_spill] sm:$0xff] %v3554_v59  ;;  %v3576_v59 = vld [vmem:[#allocation7 + $0x130] sm:$0xff]  ;;  %417 = vmatpush.msrb.mxu3 %v3582_v51 }
  0x47   :  { %5377 = vst [vmem:[#allocation59_spill] sm:$0xff] %v3558_v60  ;;  %v3578_v60 = vld [vmem:[#allocation7 + $0x78] sm:$0xff]  ;;  %377 = vmatpush.msrb.mxu1 %v3576_v59 }
  0x48   :  { %5378 = vst [vmem:[#allocation60_spill] sm:$0xff] %v3562_v62  ;;  %393 = vmatpush.msrb.mxu2 %v3578_v60  ;;  %v3586_v62 = vld [vmem:[#allocation7 + $0x60] sm:$0xff] }
  0x49   :  { %5379 = vst [vmem:[#allocation61_spill] sm:$0xff] %v3564_v61  ;;  %354 = vmatpush.msrb.mxu0 %v3586_v62  ;;  %v3594_v61 = vld [vmem:[#allocation7 + $0x128] sm:$0xff] }
  0x4a   :  { %5380 = vst [vmem:[#allocation62_spill] sm:$0xff] %v3566_v63  ;;  %v3588_v63 = vld [vmem:[#allocation7 + $0x120] sm:$0xff]  ;;  %418 = vmatpush.msrb.mxu3 %v3594_v61 }
  0x4b   :  { %5381 = vst [vmem:[#allocation63_spill] sm:$0xff] %v3570_v47  ;;  %v3590_v47 = vld [vmem:[#allocation7 + $0x68] sm:$0xff]  ;;  %378 = vmatpush.msrb.mxu1 %v3588_v63 }
  0x4c   :  { %5382 = vst [vmem:[#allocation64_spill] sm:$0xff] %v3574_v55  ;;  %394 = vmatpush.msrb.mxu2 %v3590_v47  ;;  %v3598_v55 = vld [vmem:[#allocation7 + $0x50] sm:$0xff] }
  0x4d   :  { %5383 = vst [vmem:[#allocation65_spill] sm:$0xff] %v3576_v59  ;;  %355 = vmatpush.msrb.mxu0 %v3598_v55  ;;  %v3606_v59 = vld [vmem:[#allocation7 + $0x118] sm:$0xff] }
  0x4e   :  { %5384 = vst [vmem:[#allocation66_spill] sm:$0xff] %v3578_v60  ;;  %v3600_v60 = vld [vmem:[#allocation7 + $0x110] sm:$0xff]  ;;  %419 = vmatpush.msrb.mxu3 %v3606_v59 }
  0x4f   :  { %5385 = vst [vmem:[#allocation67_spill] sm:$0xff] %v3582_v51  ;;  %v3602_v51 = vld [vmem:[#allocation7 + $0x58] sm:$0xff]  ;;  %379 = vmatpush.msrb.mxu1 %v3600_v60 }
  0x50   :  { %5386 = vst [vmem:[#allocation68_spill] sm:$0xff] %v3586_v62  ;;  %395 = vmatpush.msrb.mxu2 %v3602_v51  ;;  %v3610_v62 = vld [vmem:[#allocation7 + $0x40] sm:$0xff] }
  0x51   :  { %5387 = vst [vmem:[#allocation69_spill] sm:$0xff] %v3588_v63  ;;  %356 = vmatpush.msrb.mxu0 %v3610_v62  ;;  %v3618_v63 = vld [vmem:[#allocation7 + $0x108] sm:$0xff] }
  0x52   :  { %5388 = vst [vmem:[#allocation70_spill] sm:$0xff] %v3590_v47  ;;  %v3612_v47 = vld [vmem:[#allocation7 + $0x100] sm:$0xff]  ;;  %420 = vmatpush.msrb.mxu3 %v3618_v63 }
  0x53   :  { %5389 = vst [vmem:[#allocation71_spill] sm:$0xff] %v3594_v61  ;;  %v3614_v61 = vld [vmem:[#allocation7 + $0x48] sm:$0xff]  ;;  %380 = vmatpush.msrb.mxu1 %v3612_v47  ;;  %421 = vmatmul.f32.vlgmr.msrb.gmra.mxu3 %v5369_v43 }
  0x54   :  { %5390 = vst [vmem:[#allocation72_spill] sm:$0xff] %v3598_v55  ;;  %396 = vmatpush.msrb.mxu2 %v3614_v61  ;;  %v3622_v55 = vld [vmem:[#allocation7 + $0x30] sm:$0xff]  ;;  %506 = vmatpush.msra.mxu3 %v3308_v2 }
  0x55   :  { %5391 = vst [vmem:[#allocation73_spill] sm:$0xff] %v3600_v60  ;;  %486 = vmatpush.msra.mxu1 %v3306_v1  ;;  %357 = vmatpush.msrb.mxu0 %v3622_v55 }
  0x56   :  { %5392 = vst [vmem:[#allocation74_spill] sm:$0xff] %v3602_v51  ;;  %v3624_v51 = vld [vmem:[#allocation7 + $0x38] sm:$0xff]  ;;  %507 = vmatpush.msra.mxu3 %v3316_v5  ;;  %381 = vmatmul.f32.vlgmr.msrb.gmra.mxu1 %v5369_v43 }
  0x57   :  { %5393 = vst [vmem:[#allocation75_spill] sm:$0xff] %v3606_v59  ;;  %397 = vmatpush.msrb.mxu2 %v3624_v51  ;;  %v3630_v59 = vld [vmem:[#allocation7 + $0x20] sm:$0xff]  ;;  %487 = vmatpush.msra.mxu1 %v3314_v4  ;;  %v3648_v4 = vld [vmem:[#allocation7 + $0x8] sm:$0xff] }
  0x58   :  { %5394 = vst [vmem:[#allocation76_spill] sm:$0xff] %v3610_v62  ;;  %v3632_v62 = vld [vmem:[#allocation7 + $0x28] sm:$0xff]  ;;  %358 = vmatpush.msrb.mxu0 %v3630_v59  ;;  %508 = vmatpush.msra.mxu3 %v3323_v8 }
  0x59   :  { %5395 = vst [vmem:[#allocation77_spill] sm:$0xff] %v3614_v61  ;;  %398 = vmatpush.msrb.mxu2 %v3632_v62  ;;  %v3638_v61 = vld [vmem:[#allocation7 + $0x10] sm:$0xff]  ;;  %488 = vmatpush.msra.mxu1 %v3321_v7 }
  0x5a   :  { %5396 = vst [vmem:[#allocation78_spill] sm:$0xff] %v3618_v63  ;;  %v3640_v63 = vld [vmem:[#allocation7 + $0x18] sm:$0xff]  ;;  %359 = vmatpush.msrb.mxu0 %v3638_v61  ;;  %509 = vmatpush.msra.mxu3 %v3332_v11 }
  0x5b   :  { %5397 = vst [vmem:[#allocation79_spill] sm:$0xff] %v3624_v51  ;;  %399 = vmatpush.msrb.mxu2 %v3640_v63  ;;  %v3646_v51 = vld [vmem:[#allocation7] sm:$0xff]  ;;  %489 = vmatpush.msra.mxu1 %v3330_v10 }
  0x5c   :  { %5398 = vst [vmem:[#allocation80_spill] sm:$0xff] %v3632_v62  ;;  %360 = vmatpush.msrb.mxu0 %v3646_v51  ;;  %510 = vmatpush.msra.mxu3 %v3341_v14 }
  0x5d   :  { %5399 = vst [vmem:[#allocation81_spill] sm:$0xff] %v3640_v63  ;;  %400 = vmatpush.msrb.mxu2 %v3648_v4  ;;  %490 = vmatpush.msra.mxu1 %v3339_v13 }
  0x5e   :  { %5400 = vst [vmem:[#allocation82_spill] sm:$0xff] %v3648_v4  ;;  %526 = vmatpush.msra.mxu0 %v3310_v3  ;;  %511 = vmatpush.msra.mxu3 %v3350_v17  ;;  %v186_v4 = vld [vmem:[#allocation3 + $0x8] sm:$0xff] }
  0x5f   :  { %546 = vmatpush.msra.mxu2 %v3352_v18  ;;  %491 = vmatpush.msra.mxu1 %v3348_v16  ;;  %v185_v18 = vld [vmem:[#allocation3] sm:$0xff] }
  0x60   :  { %527 = vmatpush.msra.mxu0 %v3318_v6  ;;  %512 = vmatpush.msra.mxu3 %v3363_v22 }
  0x61   :  { %547 = vmatpush.msra.mxu2 %v3358_v20  ;;  %492 = vmatpush.msra.mxu1 %v3361_v21 }
  0x62   :  { %528 = vmatpush.msra.mxu0 %v3327_v9  ;;  %513 = vmatpush.msra.mxu3 %v3375_v26 }
  0x63   :  { %548 = vmatpush.msra.mxu2 %v3370_v24  ;;  %493 = vmatpush.msra.mxu1 %v3373_v25 }
  0x64   :  { %529 = vmatpush.msra.mxu0 %v3336_v12  ;;  %514 = vmatpush.msra.mxu3 %v3387_v30 }
  0x65   :  { %549 = vmatpush.msra.mxu2 %v3382_v28  ;;  %494 = vmatpush.msra.mxu1 %v3385_v29 }
  0x66   :  { %530 = vmatpush.msra.mxu0 %v3345_v15  ;;  %515 = vmatpush.msra.mxu3 %v3399_v34 }
  0x67   :  { %550 = vmatpush.msra.mxu2 %v3394_v32  ;;  %495 = vmatpush.msra.mxu1 %v3397_v33 }
  0x68   :  { %531 = vmatpush.msra.mxu0 %v3356_v19  ;;  %516 = vmatpush.msra.mxu3 %v3411_v38 }
  0x69   :  { %551 = vmatpush.msra.mxu2 %v3406_v36  ;;  %496 = vmatpush.msra.mxu1 %v3409_v37  ;;  %v5408_v36 = vld [vmem:[#allocation27_spill] sm:$0xff] }
  0x6a   :  { %532 = vmatpush.msra.mxu0 %v3368_v23  ;;  %517 = vmatpush.msra.mxu3 %v3423_v42 }
  0x6b   :  { %552 = vmatpush.msra.mxu2 %v3418_v40  ;;  %497 = vmatpush.msra.mxu1 %v3421_v41 }
  0x6c   :  { %533 = vmatpush.msra.mxu0 %v3380_v27  ;;  %518 = vmatpush.msra.mxu3 %v3435_v46 }
  0x6d   :  { %553 = vmatpush.msra.mxu2 %v3430_v44  ;;  %498 = vmatpush.msra.mxu1 %v3433_v45  ;;  %v5407_v44 = vld [vmem:[#allocation40_spill] sm:$0xff] }
  0x6e   :  { %534 = vmatpush.msra.mxu0 %v3392_v31  ;;  %519 = vmatpush.msra.mxu3 %v3447_v50 }
  0x6f   :  { %554 = vmatpush.msra.mxu2 %v3442_v48  ;;  %499 = vmatpush.msra.mxu1 %v3445_v49 }
  0x70   :  { %535 = vmatpush.msra.mxu0 %v3404_v35  ;;  %520 = vmatpush.msra.mxu3 %v3459_v54 }
  0x71   :  { %555 = vmatpush.msra.mxu2 %v3454_v52  ;;  %500 = vmatpush.msra.mxu1 %v3457_v53  ;;  %v5423_v53 = vld [vmem:[#allocation60_spill] sm:$0xff] }
  0x72   :  { %536 = vmatpush.msra.mxu0 %v3416_v39  ;;  %v5418_v39 = vld [vmem:[#allocation49_spill] sm:$0xff] }
  0x73   :  { %556 = vmatpush.msra.mxu2 %v3466_v56  ;;  %501 = vmatpush.msra.mxu1 %v3469_v57  ;;  %v5406_v56 = vld [vmem:[#allocation39_spill] sm:$0xff] }
  0xae   :  { %v206_v20 = vpop.f32.mrf.mxu0 }
  0xaf   :  { %v269_v24 = vadd.f32 %v206_v20, %v185_v18  ;;  %v226_v63 = vpop.f32.mrf.mxu1  ;;  %v187_v18 = vld [vmem:[#allocation3 + $0x10] sm:$0xff] }
  0xb0   :  { %v270_v62 = vadd.f32 %v226_v63, %v186_v4  ;;  %v5401_v63 = vld [vmem:[#allocation33_spill] sm:$0xff] }
  0xb1   :  { %v2561_v28 = vmul.f32 -1.442695, %v269_v24  ;;  %521 = vmatpush.msra.mxu3 %v5401_v63 }
  0xb2   :  { %v2562_v12 = vmul.f32 -1.442695, %v270_v62 }
  0xb3   :  { %2626 = vpow2.f32 %v2561_v28  ;;  %664 = vmatpush.msrb.mxu3 %v3490_v0  ;;  %v5411_v0 = vld [vmem:[#allocation57_spill] sm:$0xff] }
  0xb4   :  { %2628 = vpow2.f32 %v2562_v12 }
  0xb5   :  { %v246_v4 = vpop.f32.mrf.mxu2  ;;  %665 = vmatpush.msrb.mxu3 %v3540_v58  ;;  %v5415_v58 = vld [vmem:[#allocation61_spill] sm:$0xff] }
  0xb6   :  { %v271_v20 = vadd.f32 %v246_v4, %v187_v18  ;;  %v188_v18 = vld [vmem:[#allocation3 + $0x18] sm:$0xff]  ;;  %v5402_v4 = vld [vmem:[#allocation23_spill] sm:$0xff] }
  0xb7   :  { %537 = vmatpush.msra.mxu0 %v5402_v4  ;;  %v5410_v4 = vld [vmem:[#allocation43_spill] sm:$0xff]  ;;  %666 = vmatpush.msrb.mxu3 %v5411_v0  ;;  %v5417_v0 = vld [vmem:[#allocation48_spill] sm:$0xff] }
  0xb8   :  { %v2563_v24 = vmul.f32 -1.442695, %v271_v20  ;;  %v5403_v20 = vld [vmem:[#allocation35_spill] sm:$0xff] }
  0xb9   :  { %v2627_v12 = vpop.eup %2626  ;;  %557 = vmatpush.msra.mxu2 %v5403_v20  ;;  %v5409_v20 = vld [vmem:[#allocation42_spill] sm:$0xff]  ;;  %667 = vmatpush.msrb.mxu3 %v5415_v58  ;;  %v5420_v58 = vld [vmem:[#allocation52_spill] sm:$0xff] }
  0xba   :  { %v2629_v28 = vpop.eup %2628  ;;  %v3696_v43 = vadd.f32 1.0, %v2627_v12  ;;  %2630 = vpow2.f32 %v2563_v24  ;;  %v5404_v24 = vld [vmem:[#allocation36_spill] sm:$0xff] }
  0xbb   :  { %v3700_v62 = vadd.f32 1.0, %v2629_v28  ;;  %636 = vmatpush.msrb.mxu1 %v5404_v24  ;;  %v5405_v28 = vld [vmem:[#allocation25_spill] sm:$0xff]  ;;  %558 = vmatpush.msra.mxu2 %v5406_v56 }
  0xbc   :  { %2632 = vrcp.f32 %v3696_v43  ;;  %538 = vmatpush.msra.mxu0 %v5405_v28  ;;  %v296_v32 = vand.u32 2147483648, %v3696_v43  ;;  %vm290_vm2 = vweird.f32 %v3696_v43 }
  0xbd   :  { %2634 = vrcp.f32 %v3700_v62  ;;  %637 = vmatpush.msrb.mxu1 %v5407_v44  ;;  %559 = vmatpush.msra.mxu2 %v5409_v20  ;;  %v5413_v44 = vld [vmem:[#allocation45_spill] sm:$0xff]  ;;  %vm305_vm3 = vweird.f32 %v3700_v62 }
  0xbe   :  { %v266_v12 = vpop.f32.mrf.mxu3  ;;  %539 = vmatpush.msra.mxu0 %v5408_v36 }
  0xbf   :  { %v272_v48 = vadd.f32 %v266_v12, %v188_v18  ;;  %638 = vmatpush.msrb.mxu1 %v5410_v4  ;;  %v5412_v18 = vld [vmem:[#allocation30_spill] sm:$0xff]  ;;  %560 = vmatpush.msra.mxu2 %v5413_v44  ;;  %v311_v44 = vand.u32 2147483648, %v3700_v62 }
  0xc0   :  { %v2631_v52 = vpop.eup %2630  ;;  %540 = vmatpush.msra.mxu0 %v5412_v18  ;;  %v5414_v12 = vld [vmem:[#allocation46_spill] sm:$0xff]  ;;  %v5419_v18 = vld [vmem:[#allocation65_spill] sm:$0xff] }
  0xc1   :  { %v3716_v40 = vadd.f32 1.0, %v2631_v52  ;;  %639 = vmatpush.msrb.mxu1 %v5414_v12  ;;  %v5416_v4 = vld [vmem:[#allocation34_spill] sm:$0xff]  ;;  %561 = vmatpush.msra.mxu2 %v5417_v0  ;;  %v5421_v0 = vld [vmem:[#allocation69_spill] sm:$0xff]  ;;  %v312_v31 = vor.u32 1.1754944e-38, %v311_v44 }
  0xc2   :  { %v2633_v24 = vpop.eup %2632  ;;  %541 = vmatpush.msra.mxu0 %v5416_v4  ;;  %668 = vmatpush.msrb.mxu3 %v5419_v18  ;;  %v297_v18 = vor.u32 1.1754944e-38, %v296_v32 }
  0xc3   :  { %v2635_v28 = vpop.eup %2634  ;;  %v286_v56 = vmul.f32 %v2633_v24, %v3696_v43  ;;  %2636 = vrcp.f32 %v3716_v40  ;;  %640 = vmatpush.msrb.mxu1 %v5418_v39  ;;  %vm291_vm0 = vweird.f32 %v2633_v24  ;;  %vm320_vm9 = vweird.f32 %v3716_v40 }
  0xc4   :  { %v301_v52 = vmul.f32 %v2635_v28, %v3700_v62  ;;  %2638 = vtanh.f32 %v272_v48  ;;  %v294_v48 = vand.u32 2147483647, %v3696_v43  ;;  %vm306_vm1 = vweird.f32 %v2635_v28  ;;  %669 = vmatpush.msrb.mxu3 %v5421_v0  ;;  %vm292_vm4 = vmor %vm290_vm2, %vm291_vm0 }
  0xc5   :  { %v287_v20 = vsub.f32 1.0, %v286_v56  ;;  %v309_v56 = vand.u32 2147483647, %v3700_v62  ;;  %641 = vmatpush.msrb.mxu1 %v5420_v58  ;;  %vm307_vm6 = vmor %vm305_vm3, %vm306_vm1 }
  0xc6   :  { %v302_v36 = vsub.f32 1.0, %v301_v52  ;;  %670 = vmatpush.msrb.mxu3 %v3600_v60  ;;  %vm295_vm5 = vcmp.eq.f32.partialorder %v294_v48, 8.507059e+37 }
  0xc7   :  { %v288_v35 = vmul.f32 %v2633_v24, %v287_v20  ;;  %vm310_vm7 = vcmp.eq.f32.partialorder %v309_v56, 8.507059e+37  ;;  %v5429_v56 = vld [vmem:[#allocation51_spill] sm:$0xff] }
  0xc8   :  { %v303_v12 = vmul.f32 %v2635_v28, %v302_v36  ;;  %v5422_v36 = vld [vmem:[#allocation56_spill] sm:$0xff]  ;;  %671 = vmatpush.msrb.mxu3 %v3612_v47 }
  0xc9   :  { %v2637_v52 = vpop.eup %2636  ;;  %v289_v4 = vadd.f32 %v2633_v24, %v288_v35  ;;  %642 = vmatpush.msrb.mxu1 %v5422_v36  ;;  %v5424_v36 = vld [vmem:[#allocation64_spill] sm:$0xff] }
  0xca   :  { %v2639_v39 = vpop.eup %2638  ;;  %v316_v20 = vmul.f32 %v2637_v52, %v3716_v40  ;;  %v304_v57 = vadd.f32 %v2635_v28, %v303_v12  ;;  %vm321_vm8 = vweird.f32 %v2637_v52 }
  0xcb   :  { %v293_v58 = vsel %vm292_vm4, %v2633_v24, %v289_v4  ;;  %643 = vmatpush.msrb.mxu1 %v5423_v53  ;;  %v5425_v24 = vld [vmem:[#allocation68_spill] sm:$0xff]  ;;  %vm322_vm10 = vmor %vm320_vm9, %vm321_vm8 }
  0xcc   :  { %v317_v35 = vsub.f32 1.0, %v316_v20  ;;  %v298_v0 = vsel %vm295_vm5, %v297_v18, %v293_v58  ;;  %v308_v43 = vsel %vm307_vm6, %v2635_v28, %v304_v57  ;;  %v326_v18 = vand.u32 2147483648, %v3716_v40  ;;  %v5426_v57 = vld [vmem:[#allocation72_spill] sm:$0xff]  ;;  %v5433_v58 = vld [vmem:[#allocation10_spill] sm:$0xff] }
  0xcd   :  { %v313_v62 = vsel %vm310_vm7, %v312_v31, %v308_v43  ;;  %v332_v32 = vmul.f32 %v2639_v39, %v298_v0  ;;  %644 = vmatpush.msrb.mxu1 %v5424_v36  ;;  %v324_v31 = vand.u32 2147483647, %v3716_v40  ;;  %v5427_v53 = vld [vmem:[#allocation76_spill] sm:$0xff]  ;;  %v5428_v40 = vld [vmem:[#allocation37_spill] sm:$0xff]  ;;  %v5431_v39 = vld [vmem:[#allocation55_spill] sm:$0xff] }
  0xce   :  { %v318_v12 = vmul.f32 %v2637_v52, %v317_v35  ;;  %v331_v27 = vmul.f32 0.0, %v313_v62  ;;  %v5432_v20 = vld [vmem:[#allocation44_spill] sm:$0xff]  ;;  %v5434_v35 = vld [vmem:[#allocation59_spill] sm:$0xff] }
  0xcf   :  { %645 = vmatpush.msrb.mxu1 %v5425_v24  ;;  %vm325_vm11 = vcmp.eq.f32.partialorder %v324_v31, 8.507059e+37  ;;  %v5436_v43 = vld [vmem:[#allocation63_spill] sm:$0xff]  ;;  %v5474_v36 = vld [vmem:[#allocation28_spill] sm:$0xff]  ;;  %v5478_v31 = vld [vmem:[#allocation42_spill] sm:$0xff] }
  0xd0   :  { %v3748_v60 = vadd.f32 %v332_v32, %v331_v27  ;;  %v319_v44 = vadd.f32 %v2637_v52, %v318_v12  ;;  %v327_v27 = vor.u32 1.1754944e-38, %v326_v18  ;;  %v5440_v62 = vld [vmem:[#allocation71_spill] sm:$0xff]  ;;  %v5472_v32 = vld [vmem:[#allocation26_spill] sm:$0xff] }
  0xd1   :  { %646 = vmatpush.msrb.mxu1 %v5426_v57  ;;  %v5473_v12 = vld [vmem:[#allocation34_spill] sm:$0xff]  ;;  %v5475_v24 = vld [vmem:[#allocation31_spill] sm:$0xff] }
  0xd2   :  { %2640 = vtanh.f32 %v3748_v60  ;;  %v323_v0 = vsel %vm322_vm10, %v2637_v52, %v319_v44  ;;  %v5430_v52 = vld [vmem:[#allocation41_spill] sm:$0xff]  ;;  %v5476_v44 = vld [vmem:[#allocation35_spill] sm:$0xff] }
  0xd3   :  { %647 = vmatpush.msrb.mxu1 %v5427_v53  ;;  %v328_v4 = vsel %vm325_vm11, %v327_v27, %v323_v0  ;;  %v5477_v18 = vld [vmem:[#allocation39_spill] sm:$0xff]  ;;  %v5479_v0 = vld [vmem:[#allocation45_spill] sm:$0xff]  ;;  %v5480_v27 = vld [vmem:[#allocation48_spill] sm:$0xff] }
  0xd5   :  { %648 = vmatpush.msrb.mxu1 %v3622_v55 }
  0xd7   :  { %649 = vmatpush.msrb.mxu1 %v3630_v59 }
  0xd8   :  { %v2641_v28 = vpop.eup %2640 }
  0xd9   :  { %v335_v48 = vmul.f32 %v2641_v28, %v328_v4  ;;  %650 = vmatpush.msrb.mxu1 %v3638_v61  ;;  %v382_v28 = vpop.f32.mrf.mxu1  ;;  %v184_v4 = vld [vmem:[%s5113_s3] sm:$0x3]  ;;  %s3258_s3 = smov 64  }
  0xdb   :  { %361 = vmatmul.f32.vlgmr.msrb.gmra.mxu0 %v335_v48  ;;  %401 = vmatmul.f32.vlgmr.msrb.gmra.mxu2 %v335_v48 }
  0xdc   :  { %502 = vmatmul.f32.vlgmr.msra.gmra.mxu1 %v335_v48  ;;  %522 = vmatmul.f32.vlgmr.msra.gmra.mxu3 %v335_v48 }
  0xdd   :  { %676 = vmatpush.msrb.mxu0 %v5428_v40  ;;  %651 = vmatpush.msrb.mxu1 %v3646_v51  ;;  %v3852_v40 = vperm.slane %v184_v4, 0 }
  0xde   :  { %704 = vmatpush.msrb.mxu2 %v5429_v56  ;;  %777 = vmatpush.msra.mxu3 %v3306_v1  ;;  %v5437_v1 = vld [vmem:[#allocation50_spill] sm:$0xff] }
  0xdf   :  { %797 = vmatpush.msra.mxu1 %v3308_v2  ;;  %677 = vmatpush.msrb.mxu0 %v5430_v52  ;;  %v5435_v2 = vld [vmem:[#allocation47_spill] sm:$0xff]  ;;  %5481 = vst [vmem:[#allocation33_spill] sm:$0xff] %v3852_v40  ;;  %v482_v52 = vld [vmem:[#allocation3 + $0x20] sm:$0xff] }
  0xe0   :  { %705 = vmatpush.msrb.mxu2 %v5431_v39  ;;  %778 = vmatpush.msra.mxu3 %v5433_v58 }
  0xe1   :  { %798 = vmatpush.msra.mxu1 %v3316_v5  ;;  %678 = vmatpush.msrb.mxu0 %v5432_v20  ;;  %v5438_v5 = vld [vmem:[#allocation67_spill] sm:$0xff] }
  0xe2   :  { %706 = vmatpush.msrb.mxu2 %v5434_v35  ;;  %779 = vmatpush.msra.mxu3 %v3321_v7  ;;  %v5442_v7 = vld [vmem:[#allocation75_spill] sm:$0xff] }
  0xe3   :  { %799 = vmatpush.msra.mxu1 %v3323_v8  ;;  %542 = vmatmul.f32.vlgmr.msra.gmra.mxu0 %v335_v48  ;;  %v5439_v8 = vld [vmem:[#allocation54_spill] sm:$0xff] }
  0xe4   :  { %562 = vmatmul.f32.vlgmr.msra.gmra.mxu2 %v335_v48  ;;  %679 = vmatpush.msrb.mxu0 %v5435_v2  ;;  %v422_v48 = vpop.f32.mrf.mxu3 }
  0xe5   :  { %800 = vmatpush.msra.mxu1 %v3332_v11  ;;  %707 = vmatpush.msrb.mxu2 %v5436_v43  ;;  %v5441_v11 = vld [vmem:[#allocation58_spill] sm:$0xff] }
  0xe6   :  { %680 = vmatpush.msrb.mxu0 %v5437_v1  ;;  %780 = vmatpush.msra.mxu3 %v3330_v10  ;;  %v5444_v10 = vld [vmem:[#allocation78_spill] sm:$0xff] }
  0xe7   :  { %801 = vmatpush.msra.mxu1 %v3341_v14  ;;  %708 = vmatpush.msrb.mxu2 %v5438_v5  ;;  %v5443_v14 = vld [vmem:[#allocation62_spill] sm:$0xff] }
  0xe8   :  { %681 = vmatpush.msrb.mxu0 %v5439_v8  ;;  %781 = vmatpush.msra.mxu3 %v3339_v13  ;;  %v5446_v13 = vld [vmem:[#allocation70_spill] sm:$0xff] }
  0xe9   :  { %802 = vmatpush.msra.mxu1 %v3350_v17  ;;  %709 = vmatpush.msrb.mxu2 %v5440_v62  ;;  %v5445_v17 = vld [vmem:[#allocation66_spill] sm:$0xff] }
  0xea   :  { %682 = vmatpush.msrb.mxu0 %v5441_v11  ;;  %782 = vmatpush.msra.mxu3 %v3348_v16  ;;  %v5447_v16 = vld [vmem:[#allocation74_spill] sm:$0xff]  ;;  %v3857_v11 = vperm.slane %v184_v4, 1 }
  0xeb   :  { %803 = vmatpush.msra.mxu1 %v3363_v22  ;;  %710 = vmatpush.msrb.mxu2 %v5442_v7  ;;  %v5450_v22 = vld [vmem:[#allocation79_spill] sm:$0xff] }
  0xec   :  { %683 = vmatpush.msrb.mxu0 %v5443_v14  ;;  %783 = vmatpush.msra.mxu3 %v3361_v21  ;;  %v5448_v21 = vld [vmem:[#allocation77_spill] sm:$0xff]  ;;  %5482 = vst [vmem:[#allocation36_spill] sm:$0xff] %v3857_v11 }
  0xed   :  { %804 = vmatpush.msra.mxu1 %v3375_v26  ;;  %711 = vmatpush.msrb.mxu2 %v5444_v10  ;;  %v5455_v26 = vld [vmem:[#allocation15_spill] sm:$0xff] }
  0xee   :  { %684 = vmatpush.msrb.mxu0 %v5445_v17  ;;  %784 = vmatpush.msra.mxu3 %v3373_v25  ;;  %v5453_v25 = vld [vmem:[#allocation82_spill] sm:$0xff]  ;;  %v483_v17 = vld [vmem:[#allocation3 + $0x28] sm:$0xff] }
  0xef   :  { %805 = vmatpush.msra.mxu1 %v3387_v30  ;;  %817 = vmatpush.msra.mxu2 %v3310_v3  ;;  %v5449_v3 = vld [vmem:[#allocation11_spill] sm:$0xff]  ;;  %v5458_v30 = vld [vmem:[#allocation17_spill] sm:$0xff] }
  0xf0   :  { %685 = vmatpush.msrb.mxu0 %v5446_v13  ;;  %785 = vmatpush.msra.mxu3 %v3385_v29  ;;  %v5456_v29 = vld [vmem:[#allocation29_spill] sm:$0xff] }
  0xf1   :  { %806 = vmatpush.msra.mxu1 %v3399_v34  ;;  %818 = vmatpush.msra.mxu2 %v3318_v6  ;;  %v5451_v6 = vld [vmem:[#allocation80_spill] sm:$0xff]  ;;  %v5460_v34 = vld [vmem:[#allocation14_spill] sm:$0xff] }
  0xf2   :  { %686 = vmatpush.msrb.mxu0 %v5447_v16  ;;  %786 = vmatpush.msra.mxu3 %v3397_v33  ;;  %v5459_v33 = vld [vmem:[#allocation32_spill] sm:$0xff] }
  0xf3   :  { %807 = vmatpush.msra.mxu1 %v3411_v38  ;;  %819 = vmatpush.msra.mxu2 %v3327_v9  ;;  %v5452_v9 = vld [vmem:[#allocation81_spill] sm:$0xff] }
  0xf4   :  { %687 = vmatpush.msrb.mxu0 %v5448_v21  ;;  %787 = vmatpush.msra.mxu3 %v3409_v37  ;;  %v5462_v37 = vld [vmem:[#allocation16_spill] sm:$0xff]  ;;  %v5463_v38 = vld [vmem:[#allocation21_spill] sm:$0xff] }
  0xf5   :  { %808 = vmatpush.msra.mxu1 %v3423_v42  ;;  %820 = vmatpush.msra.mxu2 %v5449_v3  ;;  %v5465_v42 = vld [vmem:[#allocation23_spill] sm:$0xff]  ;;  %v484_v3 = vld [vmem:[#allocation3 + $0x30] sm:$0xff] }
  0xf6   :  { %688 = vmatpush.msrb.mxu0 %v5450_v22  ;;  %788 = vmatpush.msra.mxu3 %v3421_v41  ;;  %v5464_v41 = vld [vmem:[#allocation18_spill] sm:$0xff] }
  0xf7   :  { %809 = vmatpush.msra.mxu1 %v3435_v46  ;;  %821 = vmatpush.msra.mxu2 %v3345_v15  ;;  %v5454_v15 = vld [vmem:[#allocation12_spill] sm:$0xff]  ;;  %v5467_v46 = vld [vmem:[#allocation25_spill] sm:$0xff] }
  0xf8   :  { %689 = vmatpush.msrb.mxu0 %v5451_v6  ;;  %789 = vmatpush.msra.mxu3 %v3433_v45  ;;  %v5466_v45 = vld [vmem:[#allocation20_spill] sm:$0xff] }
  0xf9   :  { %810 = vmatpush.msra.mxu1 %v3447_v50  ;;  %822 = vmatpush.msra.mxu2 %v3356_v19  ;;  %v5457_v19 = vld [vmem:[#allocation13_spill] sm:$0xff]  ;;  %v5469_v50 = vld [vmem:[#allocation27_spill] sm:$0xff] }
  0xfa   :  { %690 = vmatpush.msrb.mxu0 %v5452_v9  ;;  %790 = vmatpush.msra.mxu3 %v3445_v49  ;;  %v5468_v49 = vld [vmem:[#allocation22_spill] sm:$0xff] }
  0xfb   :  { %811 = vmatpush.msra.mxu1 %v3459_v54  ;;  %823 = vmatpush.msra.mxu2 %v3368_v23  ;;  %v5461_v23 = vld [vmem:[#allocation19_spill] sm:$0xff]  ;;  %v5470_v54 = vld [vmem:[#allocation24_spill] sm:$0xff] }
  0xfc   :  { %691 = vmatpush.msrb.mxu0 %v5453_v25  ;;  %791 = vmatpush.msra.mxu3 %v5456_v29 }
  0xfd   :  { %812 = vmatpush.msra.mxu1 %v5401_v63  ;;  %824 = vmatpush.msra.mxu2 %v5455_v26  ;;  %v5471_v63 = vld [vmem:[#allocation30_spill] sm:$0xff] }
  0xfe   :  { %837 = vmatpush.msra.mxu0 %v5454_v15  ;;  %792 = vmatpush.msra.mxu3 %v5459_v33 }
  0xff   :  { %825 = vmatpush.msra.mxu2 %v5458_v30 }
 0x100   :  { %838 = vmatpush.msra.mxu0 %v5457_v19 }
 0x101   :  { %826 = vmatpush.msra.mxu2 %v5461_v23 }
 0x102   :  { %839 = vmatpush.msra.mxu0 %v5460_v34 }
 0x103   :  { %827 = vmatpush.msra.mxu2 %v5463_v38 }
 0x104   :  { %840 = vmatpush.msra.mxu0 %v5462_v37 }
 0x105   :  { %828 = vmatpush.msra.mxu2 %v5465_v42 }
 0x106   :  { %841 = vmatpush.msra.mxu0 %v5464_v41 }
 0x107   :  { %829 = vmatpush.msra.mxu2 %v5467_v46 }
 0x108   :  { %842 = vmatpush.msra.mxu0 %v5466_v45 }
 0x109   :  { %830 = vmatpush.msra.mxu2 %v5469_v50 }
 0x10a   :  { %843 = vmatpush.msra.mxu0 %v5468_v49 }
 0x10b   :  { %831 = vmatpush.msra.mxu2 %v5471_v63 }
 0x10c   :  { %844 = vmatpush.msra.mxu0 %v5470_v54 }
 0x10d   :  { %832 = vmatpush.msra.mxu2 %v5473_v12 }
 0x10e   :  { %845 = vmatpush.msra.mxu0 %v5472_v32  ;;  %v485_v32 = vld [vmem:[#allocation3 + $0x38] sm:$0xff] }
 0x110   :  { %846 = vmatpush.msra.mxu0 %v5474_v36 }
 0x112   :  { %847 = vmatpush.msra.mxu0 %v5475_v24 }
 0x114   :  { %848 = vmatpush.msra.mxu0 %v5476_v44 }
 0x116   :  { %849 = vmatpush.msra.mxu0 %v5477_v18 }
 0x118   :  { %850 = vmatpush.msra.mxu0 %v5478_v31 }
 0x11a   :  { %851 = vmatpush.msra.mxu0 %v5479_v0 }
 0x11c   :  { %852 = vmatpush.msra.mxu0 %v5480_v27 }
 0x158   :  { %v362_v20 = vpop.f32.mrf.mxu0 }
 0x159   :  { %v363_v58 = vadd.f32 %v362_v20, %v3852_v40  ;;  %v503_v2 = vpop.f32.mrf.mxu1 }
 0x15a   :  { %v566_v1 = vadd.f32 %v503_v2, %v482_v52 }
 0x15b   :  { %v3855_v8 = vadd.f32 %v382_v28, %v363_v58 }
 0x15c   :  { %v2566_v14 = vmul.f32 -1.442695, %v566_v1 }
 0x15e   :  { %2642 = vpow2.f32 %v2566_v14  ;;  %v402_v13 = vpop.f32.mrf.mxu2 }
 0x15f   :  { %v403_v15 = vadd.f32 %v402_v13, %v3857_v11  ;;  %v523_v26 = vpop.f32.mrf.mxu3 }
 0x160   :  { %v567_v29 = vadd.f32 %v523_v26, %v483_v17  ;;  %v543_v19 = vpop.f32.mrf.mxu0 }
 0x161   :  { %v3860_v30 = vadd.f32 %v422_v48, %v403_v15  ;;  %v568_v33 = vadd.f32 %v543_v19, %v484_v3 }
 0x162   :  { %v2567_v34 = vmul.f32 -1.442695, %v567_v29 }
 0x163   :  { %2644 = vtanh.f32 %v3860_v30  ;;  %v2568_v23 = vmul.f32 -1.442695, %v568_v33 }
 0x164   :  { %v2643_v37 = vpop.eup %2642  ;;  %2646 = vpow2.f32 %v2567_v34 }
 0x165   :  { %v579_v38 = vadd.f32 1.0, %v2643_v37  ;;  %2648 = vpow2.f32 %v2568_v23 }
 0x167   :  { %2650 = vrcp.f32 %v579_v38  ;;  %v563_v12 = vpop.f32.mrf.mxu2  ;;  %v593_v27 = vand.u32 2147483648, %v579_v38  ;;  %vm587_vm13 = vweird.f32 %v579_v38  ;;  %v591_v48 = vand.u32 2147483647, %v579_v38 }
 0x168   :  { %v569_v44 = vadd.f32 %v563_v12, %v485_v32  ;;  %v5486_v32 = vld [vmem:[#allocation61_spill] sm:$0xff] }
 0x169   :  { %v2645_v41 = vpop.eup %2644  ;;  %v594_v14 = vor.u32 1.1754944e-38, %v593_v27  ;;  %vm592_vm1 = vcmp.eq.f32.partialorder %v591_v48, 8.507059e+37  ;;  %v5487_v12 = vld [vmem:[#allocation65_spill] sm:$0xff]  ;;  %v3929_v27 = vld [vmem:[#allocation5 + $0x130] sm:$0xff]  ;;  %v3938_v48 = vld [vmem:[#allocation5 + $0xe0] sm:$0xff] }
 0x16a   :  { %v2647_v42 = vpop.eup %2646  ;;  %466 = vrot.lane.b32.xlu0 %v2645_v41, %s3258_s3 }
 0x16b   :  { %v580_v45 = vadd.f32 1.0, %v2647_v42  ;;  %v2649_v46 = vpop.eup %2648 }
 0x16c   :  { %v581_v50 = vadd.f32 1.0, %v2649_v46 }
 0x16d   :  { %v2651_v49 = vpop.eup %2650  ;;  %2652 = vrcp.f32 %v580_v45  ;;  %v608_v52 = vand.u32 2147483648, %v580_v45  ;;  %v606_v2 = vand.u32 2147483647, %v580_v45  ;;  %vm602_vm0 = vweird.f32 %v580_v45 }
 0x16e   :  { %v583_v54 = vmul.f32 %v2651_v49, %v579_v38  ;;  %2654 = vrcp.f32 %v581_v50  ;;  %vm588_vm12 = vweird.f32 %v2651_v49  ;;  %v623_v38 = vand.u32 2147483648, %v581_v50 }
 0x16f   :  { %vm589_vm14 = vmor %vm587_vm13, %vm588_vm12  ;;  %2656 = vtanh.f32 %v569_v44  ;;  %v609_v13 = vor.u32 1.1754944e-38, %v608_v52  ;;  %vm607_vm3 = vcmp.eq.f32.partialorder %v606_v2, 8.507059e+37  ;;  %vm617_vm5 = vweird.f32 %v581_v50  ;;  %v3917_v44 = vld [vmem:[#allocation5 + $0x170] sm:$0xff] }
 0x170   :  { %v584_v63 = vsub.f32 1.0, %v583_v54  ;;  %v621_v41 = vand.u32 2147483647, %v581_v50  ;;  %v3941_v52 = vld [vmem:[#allocation5 + $0xf0] sm:$0xff]  ;;  %v2564_v2 = vmul.f32 -1.442695, %v3855_v8 }
 0x171   :  { %v3966_v8 = vld [vmem:[#allocation5 + $0x70] sm:$0xff] }
 0x172   :  { %v585_v36 = vmul.f32 %v2651_v49, %v584_v63  ;;  %vm622_vm7 = vcmp.eq.f32.partialorder %v621_v41, 8.507059e+37  ;;  %v5484_v63 = vld [vmem:[#allocation53_spill] sm:$0xff] }
 0x173   :  { %v2653_v24 = vpop.eup %2652 }
 0x174   :  { %v598_v18 = vmul.f32 %v2653_v24, %v580_v45  ;;  %v586_v31 = vadd.f32 %v2651_v49, %v585_v36  ;;  %v2655_v0 = vpop.eup %2654  ;;  %vm603_vm15 = vweird.f32 %v2653_v24  ;;  %v624_v45 = vor.u32 1.1754944e-38, %v623_v38  ;;  %v3911_v36 = vld [vmem:[#allocation5 + $0x190] sm:$0xff] }
 0x175   :  { %v613_v4 = vmul.f32 %v2655_v0, %v581_v50  ;;  %vm604_vm2 = vmor %vm602_vm0, %vm603_vm15  ;;  %v2657_v26 = vpop.eup %2656  ;;  %vm618_vm4 = vweird.f32 %v2655_v0  ;;  %v5485_v50 = vld [vmem:[#allocation57_spill] sm:$0xff]  ;;  %vm341_vm0 = vcmask 523264  }
 0x176   :  { %v599_v28 = vsub.f32 1.0, %v598_v18  ;;  %v590_v58 = vsel %vm589_vm14, %v2651_v49, %v586_v31  ;;  %vm619_vm6 = vmor %vm617_vm5, %vm618_vm4  ;;  %v3920_v18 = vld [vmem:[#allocation5 + $0x140] sm:$0xff]  ;;  %v3923_v31 = vld [vmem:[#allocation5 + $0x150] sm:$0xff] }
 0x177   :  { %v614_v1 = vsub.f32 1.0, %v613_v4  ;;  %v595_v3 = vsel %vm592_vm1, %v594_v14, %v590_v58  ;;  %v3935_v4 = vld [vmem:[#allocation5 + $0x110] sm:$0xff] }
 0x178   :  { %v600_v20 = vmul.f32 %v2653_v24, %v599_v28  ;;  %v629_v34 = vmul.f32 %v2657_v26, %v595_v3  ;;  %v3932_v28 = vld [vmem:[#allocation5 + $0x100] sm:$0xff]  ;;  %v3947_v58 = vld [vmem:[#allocation5 + $0xd0] sm:$0xff] }
 0x179   :  { %v615_v29 = vmul.f32 %v2655_v0, %v614_v1  ;;  %v3951_v1 = vld [vmem:[#allocation5 + $0xa0] sm:$0xff]  ;;  %v3954_v14 = vld [vmem:[#allocation5 + $0xb0] sm:$0xff] }
 0x17a   :  { %v601_v17 = vadd.f32 %v2653_v24, %v600_v20  ;;  %v3944_v20 = vld [vmem:[#allocation5 + $0xc0] sm:$0xff]  ;;  %v3972_v26 = vld [vmem:[#allocation5 + $0x50] sm:$0xff] }
 0x17b   :  { %v616_v37 = vadd.f32 %v2655_v0, %v615_v29  ;;  %v3963_v3 = vld [vmem:[#allocation5 + $0x60] sm:$0xff] }
 0x17c   :  { %v605_v15 = vsel %vm604_vm2, %v2653_v24, %v601_v17  ;;  %v3914_v24 = vld [vmem:[#allocation5 + $0x160] sm:$0xff] }
 0x17d   :  { %v610_v19 = vsel %vm607_vm3, %v609_v13, %v605_v15  ;;  %v620_v42 = vsel %vm619_vm6, %v2655_v0, %v616_v37  ;;  %v3926_v0 = vld [vmem:[#allocation5 + $0x120] sm:$0xff]  ;;  %v3960_v13 = vld [vmem:[#allocation5 + $0x90] sm:$0xff] }
 0x17e   :  { %v628_v33 = vmul.f32 %v610_v19, %v3748_v60  ;;  %v625_v49 = vsel %vm622_vm7, %v624_v45, %v620_v42  ;;  %v5483_v60 = vld [vmem:[#allocation38_spill] sm:$0xff]  ;;  %v3978_v19 = vld [vmem:[#allocation5 + $0x30] sm:$0xff] }
 0x17f   :  { %v3957_v17 = vld [vmem:[#allocation5 + $0x80] sm:$0xff]  ;;  %v3984_v37 = vld [vmem:[#allocation5 + $0x10] sm:$0xff] }
 0x180   :  { %v3865_v23 = vadd.f32 %v629_v34, %v628_v33  ;;  %v3969_v15 = vld [vmem:[#allocation5 + $0x40] sm:$0xff]  ;;  %5490 = vst [vmem:[#allocation40_spill] sm:$0xff] %v3984_v37 }
 0x181   :  { %v3975_v29 = vld [vmem:[#allocation5 + $0x20] sm:$0xff] }
 0x182   :  { %2658 = vtanh.f32 %v3865_v23  ;;  %v3981_v34 = vld [vmem:[#allocation5] sm:$0xff] }
 0x183   :  { %2660 = vpow2.f32 %v2564_v2 }
 0x188   :  { %v2659_v46 = vpop.eup %2658 }
 0x189   :  { %v3868_v54 = vmul.f32 %v2659_v46, %v625_v49  ;;  %v2661_v33 = vpop.eup %2660 }
 0x18a   :  { %v431_v38 = vadd.f32 1.0, %v2661_v33 }
 0x18b   :  { %652 = vmatmul.f32.vlgmr.msrb.gmra.mxu1 %v3868_v54  ;;  %692 = vmatmul.f32.vlgmr.msrb.gmra.mxu0 %v3868_v54 }
 0x18c   :  { %955 = vmatpush.msrb.mxu1 %v5483_v60  ;;  %995 = vmatpush.msrb.mxu0 %v5429_v56  ;;  %v5488_v56 = vld [vmem:[#allocation69_spill] sm:$0xff]  ;;  %2662 = vrcp.f32 %v431_v38  ;;  %v444_v60 = vand.u32 2147483648, %v431_v38  ;;  %vm438_vm9 = vweird.f32 %v431_v38 }
 0x18e   :  { %956 = vmatpush.msrb.mxu1 %v5484_v63  ;;  %996 = vmatpush.msrb.mxu0 %v5431_v39  ;;  %v5489_v39 = vld [vmem:[#allocation73_spill] sm:$0xff]  ;;  %v442_v63 = vand.u32 2147483647, %v431_v38 }
 0x190   :  { %957 = vmatpush.msrb.mxu1 %v5485_v50  ;;  %997 = vmatpush.msrb.mxu0 %v5434_v35  ;;  %v3890_v35 = vld [vmem:[#allocation5 + $0x1e0] sm:$0xff]  ;;  %vm443_vm11 = vcmp.eq.f32.partialorder %v442_v63, 8.507059e+37 }
 0x192   :  { %958 = vmatpush.msrb.mxu1 %v5486_v32  ;;  %998 = vmatpush.msrb.mxu0 %v5436_v43  ;;  %v3893_v43 = vld [vmem:[#allocation5 + $0x1f0] sm:$0xff]  ;;  %v2663_v41 = vpop.eup %2662  ;;  %v445_v32 = vor.u32 1.1754944e-38, %v444_v60 }
 0x193   :  { %813 = vmatmul.f32.vlgmr.msra.gmra.mxu1 %v3868_v54  ;;  %853 = vmatmul.f32.vlgmr.msra.gmra.mxu0 %v3868_v54  ;;  %v434_v42 = vmul.f32 %v2663_v41, %v431_v38  ;;  %vm439_vm8 = vweird.f32 %v2663_v41  ;;  %v2565_v38 = vmul.f32 -1.442695, %v3860_v30 }
 0x194   :  { %959 = vmatpush.msrb.mxu1 %v5487_v12  ;;  %999 = vmatpush.msrb.mxu0 %v5438_v5  ;;  %v3896_v5 = vld [vmem:[#allocation5 + $0x1c0] sm:$0xff]  ;;  %vm440_vm10 = vmor %vm438_vm9, %vm439_vm8 }
 0x195   :  { %v435_v45 = vsub.f32 1.0, %v434_v42 }
 0x196   :  { %960 = vmatpush.msrb.mxu1 %v5488_v56  ;;  %1000 = vmatpush.msrb.mxu0 %v5440_v62  ;;  %v3899_v62 = vld [vmem:[#allocation5 + $0x1d0] sm:$0xff] }
 0x197   :  { %v436_v46 = vmul.f32 %v2663_v41, %v435_v45 }
 0x198   :  { %961 = vmatpush.msrb.mxu1 %v5489_v39  ;;  %1001 = vmatpush.msrb.mxu0 %v5442_v7  ;;  %v3902_v7 = vld [vmem:[#allocation5 + $0x1a0] sm:$0xff] }
 0x199   :  { %v437_v49 = vadd.f32 %v2663_v41, %v436_v46 }
 0x19a   :  { %962 = vmatpush.msrb.mxu1 %v3612_v47  ;;  %1002 = vmatpush.msrb.mxu0 %v5444_v10  ;;  %v3905_v47 = vld [vmem:[#allocation5 + $0x1b0] sm:$0xff]  ;;  %v3908_v10 = vld [vmem:[#allocation5 + $0x180] sm:$0xff] }
 0x19b   :  { %v441_v50 = vsel %vm440_vm10, %v2663_v41, %v437_v49 }
 0x19c   :  { %1068 = vmatpush.msra.mxu1 %v3890_v35  ;;  %1108 = vmatpush.msra.mxu0 %v3893_v43  ;;  %v446_v56 = vsel %vm443_vm11, %v445_v32, %v441_v50 }
 0x19d   :  { %v464_v2 = vmul.f32 0.0, %v446_v56 }
 0x19e   :  { %1069 = vmatpush.msra.mxu1 %v3896_v5  ;;  %1109 = vmatpush.msra.mxu0 %v3899_v62 }
 0x1a0   :  { %1070 = vmatpush.msra.mxu1 %v3902_v7  ;;  %1110 = vmatpush.msra.mxu0 %v3905_v47 }
 0x1a2   :  { %1071 = vmatpush.msra.mxu1 %v3908_v10  ;;  %1111 = vmatpush.msra.mxu0 %v3911_v36 }
 0x1a4   :  { %1072 = vmatpush.msra.mxu1 %v3914_v24  ;;  %1112 = vmatpush.msra.mxu0 %v3917_v44 }
 0x1a6   :  { %1073 = vmatpush.msra.mxu1 %v3920_v18  ;;  %1113 = vmatpush.msra.mxu0 %v3923_v31 }
 0x1a8   :  { %1074 = vmatpush.msra.mxu1 %v3926_v0  ;;  %1114 = vmatpush.msra.mxu0 %v3929_v27 }
 0x1aa   :  { %1075 = vmatpush.msra.mxu1 %v3932_v28  ;;  %1115 = vmatpush.msra.mxu0 %v3935_v4 }
 0x1ac   :  { %1076 = vmatpush.msra.mxu1 %v3938_v48  ;;  %1116 = vmatpush.msra.mxu0 %v3941_v52 }
 0x1ae   :  { %1077 = vmatpush.msra.mxu1 %v3944_v20  ;;  %1117 = vmatpush.msra.mxu0 %v3947_v58 }
 0x1b0   :  { %1078 = vmatpush.msra.mxu1 %v3951_v1  ;;  %1118 = vmatpush.msra.mxu0 %v3954_v14 }
 0x1b2   :  { %1079 = vmatpush.msra.mxu1 %v3957_v17  ;;  %1119 = vmatpush.msra.mxu0 %v3960_v13 }
 0x1b4   :  { %1080 = vmatpush.msra.mxu1 %v3963_v3  ;;  %1120 = vmatpush.msra.mxu0 %v3966_v8 }
 0x1b6   :  { %1081 = vmatpush.msra.mxu1 %v3969_v15  ;;  %1121 = vmatpush.msra.mxu0 %v3972_v26 }
 0x1b8   :  { %1082 = vmatpush.msra.mxu1 %v3975_v29  ;;  %1122 = vmatpush.msra.mxu0 %v3978_v19 }
 0x1ba   :  { %1083 = vmatpush.msra.mxu1 %v3981_v34  ;;  %1123 = vmatpush.msra.mxu0 %v3984_v37 }
 0x1dc   :  { %v467_v12 = vpop.permute.xlu0 %466 }
 0x1dd   :  { %v469_v39 = vmul.f32 %v467_v12, %v446_v56 }
 0x1df   :  { %471 = vrot.lane.b32.xlu0 %v469_v39, %s3258_s3 }
 0x251   :  { %v472_v33 = vpop.permute.xlu0 %471 }
 0x252   :  { %v3988_v37 = vadd.f32 %v472_v33, %v464_v2 }
 0x254   :  { %2664 = vtanh.f32 %v3988_v37 }
 0x255   :  { %2666 = vpow2.f32 %v2565_v38  ;;  %v3998_v38 = vld [vmem:[#allocation7 + $0xf8] sm:$0xff] }
 0x25a   :  { %v2665_v42 = vpop.eup %2664 }
 0x25b   :  { %477 = vrot.lane.b32.xlu1 %v2665_v42, %s3258_s3  ;;  %v2667_v41 = vpop.eup %2666  ;;  %v3995_v42 = vld [vmem:[#allocation7 + $0xf0] sm:$0xff] }
 0x25c   :  { %v432_v45 = vadd.f32 1.0, %v2667_v41  ;;  %v4001_v41 = vld [vmem:[#allocation7 + $0xe0] sm:$0xff] }
 0x25e   :  { %2668 = vrcp.f32 %v432_v45  ;;  %v459_v32 = vand.u32 2147483648, %v432_v45  ;;  %vm453_vm13 = vweird.f32 %v432_v45  ;;  %v457_v12 = vand.u32 2147483647, %v432_v45 }
 0x260   :  { %v460_v39 = vor.u32 1.1754944e-38, %v459_v32  ;;  %vm458_vm15 = vcmp.eq.f32.partialorder %v457_v12, 8.507059e+37  ;;  %v4024_v32 = vld [vmem:[#allocation7 + $0xb8] sm:$0xff]  ;;  %v4027_v12 = vld [vmem:[#allocation7 + $0xa0] sm:$0xff] }
 0x261   :  { %5496 = vst [vmem:[#allocation60_spill] sm:$0xff] %v4024_v32 }
 0x262   :  { %5497 = vst [vmem:[#allocation64_spill] sm:$0xff] %v4027_v12 }
 0x264   :  { %v2669_v46 = vpop.eup %2668 }
 0x265   :  { %v449_v49 = vmul.f32 %v2669_v46, %v432_v45  ;;  %vm454_vm12 = vweird.f32 %v2669_v46  ;;  %v4004_v45 = vld [vmem:[#allocation7 + $0xe8] sm:$0xff] }
 0x266   :  { %vm455_vm14 = vmor %vm453_vm13, %vm454_vm12 }
 0x267   :  { %v450_v60 = vsub.f32 1.0, %v449_v49  ;;  %v4010_v49 = vld [vmem:[#allocation7 + $0xd8] sm:$0xff] }
 0x268   :  { %5492 = vst [vmem:[#allocation46_spill] sm:$0xff] %v4010_v49 }
 0x269   :  { %v451_v63 = vmul.f32 %v2669_v46, %v450_v60  ;;  %v4013_v60 = vld [vmem:[#allocation7 + $0xc0] sm:$0xff] }
 0x26a   :  { %5493 = vst [vmem:[#allocation49_spill] sm:$0xff] %v4013_v60 }
 0x26b   :  { %v452_v50 = vadd.f32 %v2669_v46, %v451_v63  ;;  %v4016_v63 = vld [vmem:[#allocation7 + $0xc8] sm:$0xff] }
 0x26c   :  { %5494 = vst [vmem:[#allocation52_spill] sm:$0xff] %v4016_v63 }
 0x26d   :  { %v456_v56 = vsel %vm455_vm14, %v2669_v46, %v452_v50  ;;  %v4007_v46 = vld [vmem:[#allocation7 + $0xd0] sm:$0xff] }
 0x26e   :  { %v461_v2 = vsel %vm458_vm15, %v460_v39, %v456_v56  ;;  %5491 = vst [vmem:[#allocation43_spill] sm:$0xff] %v4007_v46  ;;  %v4021_v50 = vld [vmem:[#allocation7 + $0xb0] sm:$0xff]  ;;  %v4030_v56 = vld [vmem:[#allocation7 + $0xa8] sm:$0xff]  ;;  %v4033_v39 = vld [vmem:[#allocation7 + $0x98] sm:$0xff] }
 0x26f   :  { %5495 = vst [vmem:[#allocation56_spill] sm:$0xff] %v4021_v50 }
 0x270   :  { %5498 = vst [vmem:[#allocation68_spill] sm:$0xff] %v4030_v56 }
 0x271   :  { %5499 = vst [vmem:[#allocation72_spill] sm:$0xff] %v4033_v39 }
 0x2cd   :  { %v478_v33 = vpop.permute.xlu1 %477 }
 0x2ce   :  { %v480_v30 = vmul.f32 %v478_v33, %v461_v2  ;;  %v4039_v2 = vld [vmem:[#allocation7 + $0x80] sm:$0xff]  ;;  %v4042_v33 = vld [vmem:[#allocation7 + $0x88] sm:$0xff] }
 0x2cf   :  { %5501 = vst [vmem:[#allocation37_spill] sm:$0xff] %v4039_v2 }
 0x2d0   :  { %2569 = vmatmul.msk.f32.vlgmr.msrb.gmra.mxu3 %vm341_vm0, %v480_v30  ;;  %2570 = vmatmul.msk.f32.vlgmr.msrb.gmra.mxu2 %vm341_vm0, %v480_v30  ;;  %5502 = vst [vmem:[#allocation51_spill] sm:$0xff] %v4042_v33  ;;  %v4045_v30 = vld [vmem:[#allocation7 + $0x70] sm:$0xff] }
 0x2d1   :  { %927 = vmatpush.msrb.mxu3 %v3995_v42  ;;  %967 = vmatpush.msrb.mxu2 %v3998_v38  ;;  %5503 = vst [vmem:[#allocation41_spill] sm:$0xff] %v4045_v30 }
 0x2d3   :  { %928 = vmatpush.msrb.mxu3 %v4001_v41  ;;  %968 = vmatpush.msrb.mxu2 %v4004_v45 }
 0x2d5   :  { %929 = vmatpush.msrb.mxu3 %v4007_v46  ;;  %969 = vmatpush.msrb.mxu2 %v4010_v49 }
 0x2d7   :  { %930 = vmatpush.msrb.mxu3 %v4013_v60  ;;  %970 = vmatpush.msrb.mxu2 %v4016_v63 }
 0x2d8   :  { %793 = vmatmul.f32.vlgmr.msra.gmra.mxu3 %v3868_v54  ;;  %833 = vmatmul.f32.vlgmr.msra.gmra.mxu2 %v3868_v54  ;;  %v4036_v54 = vld [vmem:[#allocation7 + $0x90] sm:$0xff] }
 0x2d9   :  { %931 = vmatpush.msrb.mxu3 %v4021_v50  ;;  %971 = vmatpush.msrb.mxu2 %v4024_v32  ;;  %5500 = vst [vmem:[#allocation76_spill] sm:$0xff] %v4036_v54 }
 0x2db   :  { %932 = vmatpush.msrb.mxu3 %v4027_v12  ;;  %972 = vmatpush.msrb.mxu2 %v4030_v56  ;;  %v4048_v56 = vld [vmem:[#allocation7 + $0x78] sm:$0xff] }
 0x2dc   :  { %5504 = vst [vmem:[#allocation55_spill] sm:$0xff] %v4048_v56  ;;  %v776_v12 = vld [vmem:[#allocation3 + $0x58] sm:$0xff] }
 0x2dd   :  { %973 = vmatpush.msrb.mxu2 %v4033_v39  ;;  %933 = vmatpush.msrb.mxu3 %v4036_v54  ;;  %v4051_v39 = vld [vmem:[#allocation7 + $0x60] sm:$0xff]  ;;  %v4054_v54 = vld [vmem:[#allocation7 + $0x68] sm:$0xff] }
 0x2de   :  { %5505 = vst [vmem:[#allocation44_spill] sm:$0xff] %v4051_v39 }
 0x2df   :  { %934 = vmatpush.msrb.mxu3 %v4039_v2  ;;  %974 = vmatpush.msrb.mxu2 %v4042_v33  ;;  %5506 = vst [vmem:[#allocation10_spill] sm:$0xff] %v4054_v54 }
 0x2e1   :  { %935 = vmatpush.msrb.mxu3 %v4045_v30  ;;  %975 = vmatpush.msrb.mxu2 %v4048_v56  ;;  %v773_v56 = vld [vmem:[#allocation3 + $0x40] sm:$0xff]  ;;  %v775_v30 = vld [vmem:[#allocation3 + $0x50] sm:$0xff] }
 0x2e3   :  { %936 = vmatpush.msrb.mxu3 %v4051_v39  ;;  %976 = vmatpush.msrb.mxu2 %v4054_v54 }
 0x2e5   :  { %937 = vmatpush.msrb.mxu3 %v5426_v57  ;;  %977 = vmatpush.msrb.mxu2 %v5447_v16  ;;  %v4069_v57 = vld [vmem:[#allocation5 + $0x1e8] sm:$0xff] }
 0x2e6   :  { %5507 = vst [vmem:[#allocation59_spill] sm:$0xff] %v4069_v57  ;;  %v4087_v16 = vld [vmem:[#allocation5 + $0x188] sm:$0xff] }
 0x2e7   :  { %938 = vmatpush.msrb.mxu3 %v5427_v53  ;;  %978 = vmatpush.msrb.mxu2 %v5448_v21  ;;  %v4072_v53 = vld [vmem:[#allocation5 + $0x1f8] sm:$0xff]  ;;  %5513 = vst [vmem:[#allocation71_spill] sm:$0xff] %v4087_v16 }
 0x2e8   :  { %5508 = vst [vmem:[#allocation47_spill] sm:$0xff] %v4072_v53  ;;  %v4090_v21 = vld [vmem:[#allocation5 + $0x198] sm:$0xff] }
 0x2e9   :  { %939 = vmatpush.msrb.mxu3 %v3622_v55  ;;  %979 = vmatpush.msrb.mxu2 %v5450_v22  ;;  %v4075_v55 = vld [vmem:[#allocation5 + $0x1c8] sm:$0xff]  ;;  %5514 = vst [vmem:[#allocation58_spill] sm:$0xff] %v4090_v21 }
 0x2ea   :  { %5509 = vst [vmem:[#allocation63_spill] sm:$0xff] %v4075_v55  ;;  %v4093_v22 = vld [vmem:[#allocation5 + $0x168] sm:$0xff] }
 0x2eb   :  { %940 = vmatpush.msrb.mxu3 %v3630_v59  ;;  %980 = vmatpush.msrb.mxu2 %v5451_v6  ;;  %v4078_v59 = vld [vmem:[#allocation5 + $0x1d8] sm:$0xff]  ;;  %5515 = vst [vmem:[#allocation75_spill] sm:$0xff] %v4093_v22 }
 0x2ec   :  { %5510 = vst [vmem:[#allocation50_spill] sm:$0xff] %v4078_v59  ;;  %v4096_v6 = vld [vmem:[#allocation5 + $0x178] sm:$0xff] }
 0x2ed   :  { %941 = vmatpush.msrb.mxu3 %v3638_v61  ;;  %981 = vmatpush.msrb.mxu2 %v5452_v9  ;;  %v4081_v61 = vld [vmem:[#allocation5 + $0x1a8] sm:$0xff]  ;;  %5516 = vst [vmem:[#allocation62_spill] sm:$0xff] %v4096_v6 }
 0x2ee   :  { %5511 = vst [vmem:[#allocation67_spill] sm:$0xff] %v4081_v61  ;;  %v4099_v9 = vld [vmem:[#allocation5 + $0x148] sm:$0xff] }
 0x2ef   :  { %942 = vmatpush.msrb.mxu3 %v3646_v51  ;;  %982 = vmatpush.msrb.mxu2 %v5453_v25  ;;  %v4084_v51 = vld [vmem:[#allocation5 + $0x1b8] sm:$0xff]  ;;  %5517 = vst [vmem:[#allocation78_spill] sm:$0xff] %v4099_v9 }
 0x2f0   :  { %5512 = vst [vmem:[#allocation54_spill] sm:$0xff] %v4084_v51  ;;  %v4102_v25 = vld [vmem:[#allocation5 + $0x158] sm:$0xff] }
 0x2f1   :  { %1088 = vmatpush.msra.mxu3 %v4069_v57  ;;  %1128 = vmatpush.msra.mxu2 %v4072_v53  ;;  %5518 = vst [vmem:[#allocation66_spill] sm:$0xff] %v4102_v25 }
 0x2f3   :  { %1089 = vmatpush.msra.mxu3 %v4075_v55  ;;  %1129 = vmatpush.msra.mxu2 %v4078_v59  ;;  %v693_v55 = vpop.f32.mrf.mxu0 }
 0x2f4   :  { %v694_v53 = vadd.f32 %v693_v55, %v3857_v11 }
 0x2f5   :  { %1090 = vmatpush.msra.mxu3 %v4081_v61  ;;  %1130 = vmatpush.msra.mxu2 %v4084_v51  ;;  %v774_v51 = vld [vmem:[#allocation3 + $0x48] sm:$0xff] }
 0x2f7   :  { %1091 = vmatpush.msra.mxu3 %v4087_v16  ;;  %1131 = vmatpush.msra.mxu2 %v4090_v21  ;;  %v4105_v16 = vld [vmem:[#allocation5 + $0x128] sm:$0xff]  ;;  %v4108_v21 = vld [vmem:[#allocation5 + $0x138] sm:$0xff] }
 0x2f8   :  { %5519 = vst [vmem:[#allocation70_spill] sm:$0xff] %v4105_v16 }
 0x2f9   :  { %1092 = vmatpush.msra.mxu3 %v4093_v22  ;;  %1132 = vmatpush.msra.mxu2 %v4096_v6  ;;  %5520 = vst [vmem:[#allocation74_spill] sm:$0xff] %v4108_v21  ;;  %v4111_v22 = vld [vmem:[#allocation5 + $0x108] sm:$0xff]  ;;  %v4114_v6 = vld [vmem:[#allocation5 + $0x118] sm:$0xff] }
 0x2fa   :  { %5521 = vst [vmem:[#allocation77_spill] sm:$0xff] %v4111_v22 }
 0x2fb   :  { %1093 = vmatpush.msra.mxu3 %v4099_v9  ;;  %1133 = vmatpush.msra.mxu2 %v4102_v25  ;;  %5522 = vst [vmem:[#allocation11_spill] sm:$0xff] %v4114_v6  ;;  %v4117_v9 = vld [vmem:[#allocation5 + $0xe8] sm:$0xff]  ;;  %v4120_v25 = vld [vmem:[#allocation5 + $0xf8] sm:$0xff]  ;;  %v854_v32 = vpop.f32.mrf.mxu0 }
 0x2fc   :  { %5523 = vst [vmem:[#allocation79_spill] sm:$0xff] %v4117_v9 }
 0x2fd   :  { %1094 = vmatpush.msra.mxu3 %v4105_v16  ;;  %1134 = vmatpush.msra.mxu2 %v4108_v21  ;;  %5524 = vst [vmem:[#allocation80_spill] sm:$0xff] %v4120_v25  ;;  %v4123_v16 = vld [vmem:[#allocation5 + $0xc8] sm:$0xff]  ;;  %v4126_v21 = vld [vmem:[#allocation5 + $0xd8] sm:$0xff] }
 0x2fe   :  { %5525 = vst [vmem:[#allocation81_spill] sm:$0xff] %v4123_v16 }
 0x2ff   :  { %1095 = vmatpush.msra.mxu3 %v4111_v22  ;;  %1135 = vmatpush.msra.mxu2 %v4114_v6  ;;  %5526 = vst [vmem:[#allocation82_spill] sm:$0xff] %v4126_v21  ;;  %v4129_v22 = vld [vmem:[#allocation5 + $0xa8] sm:$0xff]  ;;  %v4132_v6 = vld [vmem:[#allocation5 + $0xb8] sm:$0xff] }
 0x300   :  { %5527 = vst [vmem:[#allocation12_spill] sm:$0xff] %v4129_v22 }
 0x301   :  { %1096 = vmatpush.msra.mxu3 %v4117_v9  ;;  %1136 = vmatpush.msra.mxu2 %v4120_v25  ;;  %5528 = vst [vmem:[#allocation15_spill] sm:$0xff] %v4132_v6  ;;  %v4135_v9 = vld [vmem:[#allocation5 + $0x88] sm:$0xff]  ;;  %v4138_v25 = vld [vmem:[#allocation5 + $0x98] sm:$0xff] }
 0x302   :  { %5529 = vst [vmem:[#allocation29_spill] sm:$0xff] %v4135_v9 }
 0x303   :  { %1097 = vmatpush.msra.mxu3 %v4123_v16  ;;  %1137 = vmatpush.msra.mxu2 %v4126_v21  ;;  %5530 = vst [vmem:[#allocation13_spill] sm:$0xff] %v4138_v25  ;;  %v4141_v16 = vld [vmem:[#allocation5 + $0x68] sm:$0xff]  ;;  %v4144_v21 = vld [vmem:[#allocation5 + $0x78] sm:$0xff] }
 0x304   :  { %5531 = vst [vmem:[#allocation17_spill] sm:$0xff] %v4141_v16 }
 0x305   :  { %1098 = vmatpush.msra.mxu3 %v4129_v22  ;;  %1138 = vmatpush.msra.mxu2 %v4132_v6  ;;  %5532 = vst [vmem:[#allocation32_spill] sm:$0xff] %v4144_v21  ;;  %v4147_v22 = vld [vmem:[#allocation5 + $0x48] sm:$0xff]  ;;  %v4150_v6 = vld [vmem:[#allocation5 + $0x58] sm:$0xff] }
 0x306   :  { %5533 = vst [vmem:[#allocation14_spill] sm:$0xff] %v4147_v22 }
 0x307   :  { %1099 = vmatpush.msra.mxu3 %v4135_v9  ;;  %1139 = vmatpush.msra.mxu2 %v4138_v25  ;;  %5534 = vst [vmem:[#allocation19_spill] sm:$0xff] %v4150_v6  ;;  %v4153_v9 = vld [vmem:[#allocation5 + $0x28] sm:$0xff]  ;;  %v4156_v25 = vld [vmem:[#allocation5 + $0x38] sm:$0xff] }
 0x308   :  { %5535 = vst [vmem:[#allocation16_spill] sm:$0xff] %v4153_v9 }
 0x309   :  { %1100 = vmatpush.msra.mxu3 %v4141_v16  ;;  %1140 = vmatpush.msra.mxu2 %v4144_v21  ;;  %5536 = vst [vmem:[#allocation21_spill] sm:$0xff] %v4156_v25  ;;  %v4159_v16 = vld [vmem:[#allocation5 + $0x8] sm:$0xff]  ;;  %v4162_v21 = vld [vmem:[#allocation5 + $0x18] sm:$0xff] }
 0x30a   :  { %5537 = vst [vmem:[#allocation18_spill] sm:$0xff] %v4159_v16 }
 0x30b   :  { %1101 = vmatpush.msra.mxu3 %v4147_v22  ;;  %1141 = vmatpush.msra.mxu2 %v4150_v6  ;;  %5538 = vst [vmem:[#allocation23_spill] sm:$0xff] %v4162_v21  ;;  %v653_v22 = vpop.f32.mrf.mxu1 }
 0x30d   :  { %1102 = vmatpush.msra.mxu3 %v4153_v9  ;;  %1142 = vmatpush.msra.mxu2 %v4156_v25  ;;  %v654_v9 = vadd.f32 %v653_v22, %v3852_v40 }
 0x30f   :  { %1103 = vmatpush.msra.mxu3 %v4159_v16  ;;  %1143 = vmatpush.msra.mxu2 %v4162_v21 }
 0x313   :  { %v814_v61 = vpop.f32.mrf.mxu1 }
 0x314   :  { %v858_v6 = vadd.f32 %v814_v61, %v774_v51 }
 0x316   :  { %v2574_v59 = vmul.f32 -1.442695, %v858_v6 }
 0x318   :  { %2670 = vpow2.f32 %v2574_v59 }
 0x31e   :  { %v2671_v54 = vpop.eup %2670 }
 0x31f   :  { %v871_v21 = vadd.f32 1.0, %v2671_v54 }
 0x321   :  { %vm893_vm2 = vweird.f32 %v871_v21 }
 0x353   :  { %v673_v25 = vpop.f32.mrf.mxu3  ;;  %v713_v57 = vpop.f32.mrf.mxu2 }
 0x354   :  { %v4167_v39 = vadd.f32 %v673_v25, %v654_v9  ;;  %v4169_v16 = vadd.f32 %v713_v57, %v694_v53 }
 0x356   :  { %2672 = vtanh.f32 %v4169_v16 }
 0x357   :  { %2674 = vrcp.f32 %v871_v21 }
 0x35b   :  { %v794_v61 = vpop.f32.mrf.mxu3  ;;  %v834_v59 = vpop.f32.mrf.mxu2 }
 0x35c   :  { %v2673_v51 = vpop.eup %2672  ;;  %v857_v6 = vadd.f32 %v794_v61, %v773_v56  ;;  %v859_v22 = vadd.f32 %v834_v59, %v775_v30  ;;  %v860_v30 = vadd.f32 %v854_v32, %v776_v12 }
 0x35d   :  { %757 = vrot.lane.b32.xlu1 %v2673_v51, %s3258_s3  ;;  %v2675_v9 = vpop.eup %2674  ;;  %v899_v51 = vand.u32 2147483648, %v871_v21 }
 0x35e   :  { %v2573_v55 = vmul.f32 -1.442695, %v857_v6  ;;  %v2575_v11 = vmul.f32 -1.442695, %v859_v22  ;;  %v889_v57 = vmul.f32 %v2675_v9, %v871_v21  ;;  %vm894_vm1 = vweird.f32 %v2675_v9 }
 0x35f   :  { %vm895_vm3 = vmor %vm893_vm2, %vm894_vm1  ;;  %v900_v50 = vor.u32 1.1754944e-38, %v899_v51 }
 0x360   :  { %2676 = vpow2.f32 %v2573_v55  ;;  %v890_v40 = vsub.f32 1.0, %v889_v57 }
 0x361   :  { %2678 = vpow2.f32 %v2575_v11  ;;  %v897_v11 = vand.u32 2147483647, %v871_v21 }
 0x362   :  { %v891_v2 = vmul.f32 %v2675_v9, %v890_v40 }
 0x363   :  { %vm898_vm5 = vcmp.eq.f32.partialorder %v897_v11, 8.507059e+37 }
 0x364   :  { %v892_v61 = vadd.f32 %v2675_v9, %v891_v2 }
 0x366   :  { %v2677_v53 = vpop.eup %2676 }
 0x367   :  { %v870_v25 = vadd.f32 1.0, %v2677_v53  ;;  %v2679_v54 = vpop.eup %2678  ;;  %v896_v53 = vsel %vm895_vm3, %v2675_v9, %v892_v61 }
 0x368   :  { %v872_v33 = vadd.f32 1.0, %v2679_v54  ;;  %v901_v12 = vsel %vm898_vm5, %v900_v50, %v896_v53  ;;  %v4207_v53 = vld [vmem:[#allocation7 + $0x130] sm:$0xff] }
 0x369   :  { %2680 = vrcp.f32 %v870_v25  ;;  %v884_v55 = vand.u32 2147483648, %v870_v25  ;;  %v882_v40 = vand.u32 2147483647, %v870_v25  ;;  %vm878_vm6 = vweird.f32 %v870_v25 }
 0x36a   :  { %2682 = vrcp.f32 %v872_v33  ;;  %v914_v51 = vand.u32 2147483648, %v872_v33  ;;  %vm908_vm10 = vweird.f32 %v872_v33 }
 0x36b   :  { %2684 = vtanh.f32 %v860_v30  ;;  %v885_v2 = vor.u32 1.1754944e-38, %v884_v55  ;;  %vm883_vm8 = vcmp.eq.f32.partialorder %v882_v40, 8.507059e+37  ;;  %v919_v30 = vmul.f32 %v901_v12, %v3865_v23  ;;  %v4181_v23 = vld [vmem:[#allocation7 + $0x170] sm:$0xff]  ;;  %v4199_v55 = vld [vmem:[#allocation7 + $0x140] sm:$0xff] }
 0x36c   :  { %v915_v11 = vor.u32 1.1754944e-38, %v914_v51  ;;  %v4213_v40 = vld [vmem:[#allocation7 + $0x120] sm:$0xff]  ;;  %v4219_v12 = vld [vmem:[#allocation7 + $0x110] sm:$0xff] }
 0x36d   :  { %v5541_v51 = vld [vmem:[#allocation46_spill] sm:$0xff] }
 0x36f   :  { %v2681_v56 = vpop.eup %2680 }
 0x370   :  { %v874_v59 = vmul.f32 %v2681_v56, %v870_v25  ;;  %v2683_v6 = vpop.eup %2682  ;;  %vm879_vm4 = vweird.f32 %v2681_v56  ;;  %v912_v25 = vand.u32 2147483647, %v872_v33 }
 0x371   :  { %v904_v57 = vmul.f32 %v2683_v6, %v872_v33  ;;  %vm880_vm7 = vmor %vm878_vm6, %vm879_vm4  ;;  %v2685_v21 = vpop.eup %2684  ;;  %vm909_vm9 = vweird.f32 %v2683_v6  ;;  %v4193_v33 = vld [vmem:[#allocation7 + $0x150] sm:$0xff] }
 0x372   :  { %v875_v22 = vsub.f32 1.0, %v874_v59  ;;  %vm910_vm11 = vmor %vm908_vm10, %vm909_vm9  ;;  %vm913_vm12 = vcmp.eq.f32.partialorder %v912_v25, 8.507059e+37  ;;  %v5542_v25 = vld [vmem:[#allocation49_spill] sm:$0xff] }
 0x373   :  { %v905_v63 = vsub.f32 1.0, %v904_v57  ;;  %v4202_v57 = vld [vmem:[#allocation7 + $0x148] sm:$0xff] }
 0x374   :  { %v876_v54 = vmul.f32 %v2681_v56, %v875_v22 }
 0x375   :  { %v906_v49 = vmul.f32 %v2683_v6, %v905_v63  ;;  %v4190_v63 = vld [vmem:[#allocation7 + $0x168] sm:$0xff] }
 0x376   :  { %v877_v32 = vadd.f32 %v2681_v56, %v876_v54  ;;  %v4210_v54 = vld [vmem:[#allocation7 + $0x138] sm:$0xff] }
 0x377   :  { %v907_v61 = vadd.f32 %v2683_v6, %v906_v49  ;;  %v4187_v49 = vld [vmem:[#allocation7 + $0x160] sm:$0xff] }
 0x378   :  { %v881_v60 = vsel %vm880_vm7, %v2681_v56, %v877_v32  ;;  %v4216_v32 = vld [vmem:[#allocation7 + $0x128] sm:$0xff] }
 0x379   :  { %v886_v59 = vsel %vm883_vm8, %v885_v2, %v881_v60  ;;  %v911_v50 = vsel %vm910_vm11, %v2683_v6, %v907_v61  ;;  %v4196_v6 = vld [vmem:[#allocation7 + $0x158] sm:$0xff]  ;;  %v5540_v61 = vld [vmem:[#allocation43_spill] sm:$0xff] }
 0x37a   :  { %v920_v46 = vmul.f32 %v2685_v21, %v886_v59  ;;  %v916_v22 = vsel %vm913_vm12, %v915_v11, %v911_v50  ;;  %v4222_v2 = vld [vmem:[#allocation7 + $0x118] sm:$0xff]  ;;  %v4225_v21 = vld [vmem:[#allocation7 + $0x100] sm:$0xff]  ;;  %v4228_v59 = vld [vmem:[#allocation7 + $0x108] sm:$0xff] }
 0x37b   :  { %v5543_v50 = vld [vmem:[#allocation52_spill] sm:$0xff] }
 0x37c   :  { %v4174_v9 = vadd.f32 %v920_v46, %v919_v30  ;;  %v4184_v46 = vld [vmem:[#allocation7 + $0x178] sm:$0xff]  ;;  %v5544_v11 = vld [vmem:[#allocation56_spill] sm:$0xff] }
 0x37e   :  { %2686 = vtanh.f32 %v4174_v9 }
 0x384   :  { %v2687_v56 = vpop.eup %2686 }
 0x385   :  { %v4177_v60 = vmul.f32 %v2687_v56, %v916_v22  ;;  %v5549_v56 = vld [vmem:[#allocation76_spill] sm:$0xff]  ;;  %v5550_v22 = vld [vmem:[#allocation37_spill] sm:$0xff] }
 0x387   :  { %943 = vmatmul.f32.vlgmr.msrb.gmra.mxu3 %v4177_v60  ;;  %983 = vmatmul.f32.vlgmr.msrb.gmra.mxu2 %v4177_v60 }
 0x388   :  { %1246 = vmatpush.msrb.mxu3 %v4181_v23  ;;  %1286 = vmatpush.msrb.mxu2 %v4184_v46 }
 0x38a   :  { %1247 = vmatpush.msrb.mxu3 %v4187_v49  ;;  %1287 = vmatpush.msrb.mxu2 %v4190_v63 }
 0x38c   :  { %1248 = vmatpush.msrb.mxu3 %v4193_v33  ;;  %1288 = vmatpush.msrb.mxu2 %v4196_v6 }
 0x38e   :  { %1249 = vmatpush.msrb.mxu3 %v4199_v55  ;;  %1289 = vmatpush.msrb.mxu2 %v4202_v57 }
 0x38f   :  { %1104 = vmatmul.f32.vlgmr.msra.gmra.mxu3 %v4177_v60  ;;  %1144 = vmatmul.f32.vlgmr.msra.gmra.mxu2 %v4177_v60 }
 0x390   :  { %1250 = vmatpush.msrb.mxu3 %v4207_v53  ;;  %1290 = vmatpush.msrb.mxu2 %v4210_v54 }
 0x392   :  { %1251 = vmatpush.msrb.mxu3 %v4213_v40  ;;  %1291 = vmatpush.msrb.mxu2 %v4216_v32 }
 0x394   :  { %1252 = vmatpush.msrb.mxu3 %v4219_v12  ;;  %1292 = vmatpush.msrb.mxu2 %v4222_v2 }
 0x396   :  { %1253 = vmatpush.msrb.mxu3 %v4225_v21  ;;  %1293 = vmatpush.msrb.mxu2 %v4228_v59 }
 0x398   :  { %1359 = vmatpush.msra.mxu3 %v3890_v35  ;;  %1399 = vmatpush.msra.mxu2 %v3893_v43  ;;  %v2571_v35 = vmul.f32 -1.442695, %v4167_v39 }
 0x39a   :  { %1360 = vmatpush.msra.mxu3 %v3896_v5  ;;  %1400 = vmatpush.msra.mxu2 %v3899_v62  ;;  %2688 = vpow2.f32 %v2571_v35  ;;  %v5539_v62 = vld [vmem:[#allocation40_spill] sm:$0xff]  ;;  %v5551_v35 = vld [vmem:[#allocation51_spill] sm:$0xff] }
 0x39c   :  { %1361 = vmatpush.msra.mxu3 %v3902_v7  ;;  %1401 = vmatpush.msra.mxu2 %v3905_v47 }
 0x39e   :  { %1362 = vmatpush.msra.mxu3 %v3908_v10  ;;  %1402 = vmatpush.msra.mxu2 %v3911_v36 }
 0x3a0   :  { %1363 = vmatpush.msra.mxu3 %v3914_v24  ;;  %1403 = vmatpush.msra.mxu2 %v3917_v44  ;;  %v2689_v43 = vpop.eup %2688 }
 0x3a1   :  { %v722_v5 = vadd.f32 1.0, %v2689_v43  ;;  %v5552_v43 = vld [vmem:[#allocation41_spill] sm:$0xff] }
 0x3a2   :  { %1364 = vmatpush.msra.mxu3 %v3920_v18  ;;  %1404 = vmatpush.msra.mxu2 %v3923_v31 }
 0x3a3   :  { %2690 = vrcp.f32 %v722_v5  ;;  %v735_v44 = vand.u32 2147483648, %v722_v5  ;;  %vm729_vm14 = vweird.f32 %v722_v5  ;;  %v733_v18 = vand.u32 2147483647, %v722_v5 }
 0x3a4   :  { %1365 = vmatpush.msra.mxu3 %v3926_v0  ;;  %1405 = vmatpush.msra.mxu2 %v3929_v27 }
 0x3a5   :  { %v736_v0 = vor.u32 1.1754944e-38, %v735_v44  ;;  %vm734_vm1 = vcmp.eq.f32.partialorder %v733_v18, 8.507059e+37  ;;  %v4310_v44 = vld [vmem:[#allocation7 + $0x38] sm:$0xff]  ;;  %v4313_v18 = vld [vmem:[#allocation7 + $0x20] sm:$0xff] }
 0x3a6   :  { %1366 = vmatpush.msra.mxu3 %v3932_v28  ;;  %1406 = vmatpush.msra.mxu2 %v3935_v4 }
 0x3a8   :  { %1367 = vmatpush.msra.mxu3 %v3938_v48  ;;  %1407 = vmatpush.msra.mxu2 %v3941_v52 }
 0x3a9   :  { %v2691_v7 = vpop.eup %2690 }
 0x3aa   :  { %1368 = vmatpush.msra.mxu3 %v3944_v20  ;;  %1408 = vmatpush.msra.mxu2 %v3947_v58  ;;  %v725_v47 = vmul.f32 %v2691_v7, %v722_v5  ;;  %vm730_vm13 = vweird.f32 %v2691_v7  ;;  %v5553_v5 = vld [vmem:[#allocation55_spill] sm:$0xff] }
 0x3ab   :  { %vm731_vm15 = vmor %vm729_vm14, %vm730_vm13 }
 0x3ac   :  { %1369 = vmatpush.msra.mxu3 %v3951_v1  ;;  %1409 = vmatpush.msra.mxu2 %v3954_v14  ;;  %v726_v10 = vsub.f32 1.0, %v725_v47  ;;  %v2572_v1 = vmul.f32 -1.442695, %v4169_v16  ;;  %v4298_v47 = vld [vmem:[#allocation7 + $0x58] sm:$0xff] }
 0x3ae   :  { %1370 = vmatpush.msra.mxu3 %v3957_v17  ;;  %1410 = vmatpush.msra.mxu2 %v3960_v13  ;;  %v727_v36 = vmul.f32 %v2691_v7, %v726_v10  ;;  %v4301_v10 = vld [vmem:[#allocation7 + $0x40] sm:$0xff] }
 0x3b0   :  { %1371 = vmatpush.msra.mxu3 %v3963_v3  ;;  %1411 = vmatpush.msra.mxu2 %v3966_v8  ;;  %v728_v24 = vadd.f32 %v2691_v7, %v727_v36  ;;  %v4304_v36 = vld [vmem:[#allocation7 + $0x48] sm:$0xff] }
 0x3b2   :  { %1372 = vmatpush.msra.mxu3 %v3969_v15  ;;  %1412 = vmatpush.msra.mxu2 %v3972_v26  ;;  %v732_v31 = vsel %vm731_vm15, %v2691_v7, %v728_v24  ;;  %v4295_v7 = vld [vmem:[#allocation7 + $0x50] sm:$0xff] }
 0x3b3   :  { %v737_v28 = vsel %vm734_vm1, %v736_v0, %v732_v31  ;;  %v4307_v24 = vld [vmem:[#allocation7 + $0x30] sm:$0xff]  ;;  %v4316_v31 = vld [vmem:[#allocation7 + $0x28] sm:$0xff] }
 0x3b4   :  { %1373 = vmatpush.msra.mxu3 %v3975_v29  ;;  %1413 = vmatpush.msra.mxu2 %v3978_v19  ;;  %v755_v48 = vmul.f32 %v737_v28, %v3988_v37  ;;  %v4319_v0 = vld [vmem:[#allocation7 + $0x10] sm:$0xff] }
 0x3b6   :  { %1374 = vmatpush.msra.mxu3 %v3981_v34  ;;  %1414 = vmatpush.msra.mxu2 %v5539_v62  ;;  %v5555_v62 = vld [vmem:[#allocation10_spill] sm:$0xff] }
 0x3cf   :  { %v758_v27 = vpop.permute.xlu1 %757 }
 0x3d0   :  { %v760_v4 = vmul.f32 %v758_v27, %v737_v28  ;;  %v4322_v27 = vld [vmem:[#allocation7 + $0x18] sm:$0xff]  ;;  %v4325_v28 = vld [vmem:[#allocation7] sm:$0xff] }
 0x3d2   :  { %762 = vrot.lane.b32.xlu2 %v760_v4, %s3258_s3  ;;  %v4328_v4 = vld [vmem:[#allocation7 + $0x8] sm:$0xff] }
 0x42c   :  { %v763_v52 = vpop.permute.xlu2 %762 }
 0x42d   :  { %v4266_v20 = vadd.f32 %v763_v52, %v755_v48  ;;  %v5556_v48 = vld [vmem:[#allocation59_spill] sm:$0xff] }
 0x42e   :  { %v5557_v52 = vld [vmem:[#allocation47_spill] sm:$0xff] }
 0x42f   :  { %2692 = vtanh.f32 %v4266_v20 }
 0x430   :  { %2694 = vpow2.f32 %v2572_v1  ;;  %v5559_v1 = vld [vmem:[#allocation50_spill] sm:$0xff] }
 0x435   :  { %v2693_v58 = vpop.eup %2692 }
 0x436   :  { %768 = vrot.lane.b32.xlu2 %v2693_v58, %s3258_s3  ;;  %v2695_v14 = vpop.eup %2694  ;;  %v5558_v58 = vld [vmem:[#allocation63_spill] sm:$0xff] }
 0x437   :  { %v723_v17 = vadd.f32 1.0, %v2695_v14  ;;  %v5560_v14 = vld [vmem:[#allocation67_spill] sm:$0xff] }
 0x439   :  { %2696 = vrcp.f32 %v723_v17  ;;  %v750_v29 = vand.u32 2147483648, %v723_v17  ;;  %vm744_vm3 = vweird.f32 %v723_v17  ;;  %v748_v19 = vand.u32 2147483647, %v723_v17 }
 0x43b   :  { %v751_v37 = vor.u32 1.1754944e-38, %v750_v29  ;;  %vm749_vm5 = vcmp.eq.f32.partialorder %v748_v19, 8.507059e+37  ;;  %v5567_v29 = vld [vmem:[#allocation66_spill] sm:$0xff] }
 0x43c   :  { %v5568_v19 = vld [vmem:[#allocation70_spill] sm:$0xff] }
 0x43f   :  { %v2697_v13 = vpop.eup %2696 }
 0x440   :  { %v740_v3 = vmul.f32 %v2697_v13, %v723_v17  ;;  %vm745_vm2 = vweird.f32 %v2697_v13  ;;  %v5561_v17 = vld [vmem:[#allocation54_spill] sm:$0xff] }
 0x441   :  { %vm746_vm4 = vmor %vm744_vm3, %vm745_vm2 }
 0x442   :  { %v741_v8 = vsub.f32 1.0, %v740_v3  ;;  %v5563_v3 = vld [vmem:[#allocation58_spill] sm:$0xff] }
 0x444   :  { %v742_v15 = vmul.f32 %v2697_v13, %v741_v8  ;;  %v5564_v8 = vld [vmem:[#allocation75_spill] sm:$0xff] }
 0x446   :  { %v743_v26 = vadd.f32 %v2697_v13, %v742_v15  ;;  %v5565_v15 = vld [vmem:[#allocation62_spill] sm:$0xff] }
 0x448   :  { %v747_v34 = vsel %vm746_vm4, %v2697_v13, %v743_v26  ;;  %v5562_v13 = vld [vmem:[#allocation71_spill] sm:$0xff]  ;;  %v5566_v26 = vld [vmem:[#allocation78_spill] sm:$0xff] }
 0x449   :  { %v752_v39 = vsel %vm749_vm5, %v751_v37, %v747_v34  ;;  %v5569_v34 = vld [vmem:[#allocation74_spill] sm:$0xff]  ;;  %v5570_v37 = vld [vmem:[#allocation77_spill] sm:$0xff] }
 0x490   :  { %v769_v30 = vpop.permute.xlu2 %768 }
 0x491   :  { %v771_v16 = vmul.f32 %v769_v30, %v752_v39  ;;  %v5571_v39 = vld [vmem:[#allocation11_spill] sm:$0xff] }
 0x492   :  { %v5572_v30 = vld [vmem:[#allocation79_spill] sm:$0xff] }
 0x493   :  { %2576 = vmatmul.msk.f32.vlgmr.msrb.gmra.mxu1 %vm341_vm0, %v771_v16  ;;  %2577 = vmatmul.msk.f32.vlgmr.msrb.gmra.mxu0 %vm341_vm0, %v771_v16  ;;  %v5573_v16 = vld [vmem:[#allocation80_spill] sm:$0xff] }
 0x494   :  { %1218 = vmatpush.msrb.mxu1 %v3995_v42  ;;  %1258 = vmatpush.msrb.mxu0 %v3998_v38  ;;  %v5545_v42 = vld [vmem:[#allocation60_spill] sm:$0xff] }
 0x495   :  { %v5546_v38 = vld [vmem:[#allocation64_spill] sm:$0xff] }
 0x496   :  { %1219 = vmatpush.msrb.mxu1 %v4001_v41  ;;  %1259 = vmatpush.msrb.mxu0 %v4004_v45  ;;  %v5547_v41 = vld [vmem:[#allocation68_spill] sm:$0xff] }
 0x497   :  { %v5548_v45 = vld [vmem:[#allocation72_spill] sm:$0xff] }
 0x498   :  { %1220 = vmatpush.msrb.mxu1 %v5540_v61  ;;  %1260 = vmatpush.msrb.mxu0 %v5541_v51  ;;  %v5574_v61 = vld [vmem:[#allocation81_spill] sm:$0xff]  ;;  %v5575_v51 = vld [vmem:[#allocation82_spill] sm:$0xff] }
 0x49a   :  { %1221 = vmatpush.msrb.mxu1 %v5542_v25  ;;  %1261 = vmatpush.msrb.mxu0 %v5543_v50  ;;  %v5576_v25 = vld [vmem:[#allocation12_spill] sm:$0xff]  ;;  %v5577_v50 = vld [vmem:[#allocation15_spill] sm:$0xff] }
 0x49b   :  { %1084 = vmatmul.f32.vlgmr.msra.gmra.mxu1 %v4177_v60  ;;  %1124 = vmatmul.f32.vlgmr.msra.gmra.mxu0 %v4177_v60  ;;  %v5554_v60 = vld [vmem:[#allocation44_spill] sm:$0xff] }
 0x49c   :  { %1222 = vmatpush.msrb.mxu1 %v5544_v11  ;;  %1262 = vmatpush.msrb.mxu0 %v5545_v42  ;;  %v5578_v11 = vld [vmem:[#allocation29_spill] sm:$0xff] }
 0x49d   :  { %v5579_v42 = vld [vmem:[#allocation13_spill] sm:$0xff] }
 0x49e   :  { %1223 = vmatpush.msrb.mxu1 %v5546_v38  ;;  %1263 = vmatpush.msrb.mxu0 %v5547_v41  ;;  %v5580_v38 = vld [vmem:[#allocation17_spill] sm:$0xff]  ;;  %v5581_v41 = vld [vmem:[#allocation32_spill] sm:$0xff] }
 0x4a0   :  { %1264 = vmatpush.msrb.mxu0 %v5548_v45  ;;  %1224 = vmatpush.msrb.mxu1 %v5549_v56  ;;  %v5582_v45 = vld [vmem:[#allocation14_spill] sm:$0xff]  ;;  %v5583_v56 = vld [vmem:[#allocation19_spill] sm:$0xff] }
 0x4a2   :  { %1225 = vmatpush.msrb.mxu1 %v5550_v22  ;;  %1265 = vmatpush.msrb.mxu0 %v5551_v35  ;;  %v5584_v22 = vld [vmem:[#allocation16_spill] sm:$0xff]  ;;  %v5585_v35 = vld [vmem:[#allocation21_spill] sm:$0xff] }
 0x4a4   :  { %1226 = vmatpush.msrb.mxu1 %v5552_v43  ;;  %1266 = vmatpush.msrb.mxu0 %v5553_v5  ;;  %v5586_v43 = vld [vmem:[#allocation18_spill] sm:$0xff]  ;;  %v5587_v5 = vld [vmem:[#allocation23_spill] sm:$0xff] }
 0x4a6   :  { %1227 = vmatpush.msrb.mxu1 %v5554_v60  ;;  %1267 = vmatpush.msrb.mxu0 %v5555_v62  ;;  %v944_v60 = vpop.f32.mrf.mxu3  ;;  %v1065_v62 = vld [vmem:[#allocation3 + $0x68] sm:$0xff] }
 0x4a8   :  { %1228 = vmatpush.msrb.mxu1 %v4295_v7  ;;  %1268 = vmatpush.msrb.mxu0 %v4298_v47 }
 0x4aa   :  { %1229 = vmatpush.msrb.mxu1 %v4301_v10  ;;  %1269 = vmatpush.msrb.mxu0 %v4304_v36 }
 0x4ac   :  { %1230 = vmatpush.msrb.mxu1 %v4307_v24  ;;  %1270 = vmatpush.msrb.mxu0 %v4310_v44 }
 0x4ae   :  { %1231 = vmatpush.msrb.mxu1 %v4313_v18  ;;  %1271 = vmatpush.msrb.mxu0 %v4316_v31 }
 0x4b0   :  { %1232 = vmatpush.msrb.mxu1 %v4319_v0  ;;  %1272 = vmatpush.msrb.mxu0 %v4322_v27 }
 0x4b2   :  { %1233 = vmatpush.msrb.mxu1 %v4325_v28  ;;  %1273 = vmatpush.msrb.mxu0 %v4328_v4 }
 0x4b4   :  { %1379 = vmatpush.msra.mxu1 %v5556_v48  ;;  %1419 = vmatpush.msra.mxu0 %v5557_v52  ;;  %v1105_v48 = vpop.f32.mrf.mxu3 }
 0x4b5   :  { %v1149_v52 = vadd.f32 %v1105_v48, %v1065_v62 }
 0x4b6   :  { %1380 = vmatpush.msra.mxu1 %v5558_v58  ;;  %1420 = vmatpush.msra.mxu0 %v5559_v1  ;;  %v984_v1 = vpop.f32.mrf.mxu2 }
 0x4b7   :  { %v2581_v58 = vmul.f32 -1.442695, %v1149_v52 }
 0x4b8   :  { %1381 = vmatpush.msra.mxu1 %v5560_v14  ;;  %1421 = vmatpush.msra.mxu0 %v5561_v17  ;;  %v5588_v14 = vld [vmem:[#allocation33_spill] sm:$0xff] }
 0x4b9   :  { %2698 = vpow2.f32 %v2581_v58  ;;  %v945_v17 = vadd.f32 %v944_v60, %v5588_v14 }
 0x4ba   :  { %1382 = vmatpush.msra.mxu1 %v5562_v13  ;;  %1422 = vmatpush.msra.mxu0 %v5563_v3  ;;  %v5589_v13 = vld [vmem:[#allocation36_spill] sm:$0xff] }
 0x4bb   :  { %v985_v3 = vadd.f32 %v984_v1, %v5589_v13 }
 0x4bc   :  { %1383 = vmatpush.msra.mxu1 %v5564_v8  ;;  %1423 = vmatpush.msra.mxu0 %v5565_v15 }
 0x4be   :  { %1384 = vmatpush.msra.mxu1 %v5566_v26  ;;  %1424 = vmatpush.msra.mxu0 %v5567_v29  ;;  %v1145_v60 = vpop.f32.mrf.mxu2 }
 0x4bf   :  { %v2699_v26 = vpop.eup %2698 }
 0x4c0   :  { %1385 = vmatpush.msra.mxu1 %v5568_v19  ;;  %1425 = vmatpush.msra.mxu0 %v5569_v34  ;;  %v1162_v34 = vadd.f32 1.0, %v2699_v26 }
 0x4c2   :  { %1386 = vmatpush.msra.mxu1 %v5570_v37  ;;  %1426 = vmatpush.msra.mxu0 %v5571_v39  ;;  %v1064_v37 = vld [vmem:[#allocation3 + $0x60] sm:$0xff]  ;;  %v1066_v39 = vld [vmem:[#allocation3 + $0x70] sm:$0xff]  ;;  %v1190_v1 = vand.u32 2147483648, %v1162_v34  ;;  %vm1184_vm7 = vweird.f32 %v1162_v34 }
 0x4c4   :  { %1387 = vmatpush.msra.mxu1 %v5572_v30  ;;  %1427 = vmatpush.msra.mxu0 %v5573_v16 }
 0x4c6   :  { %1388 = vmatpush.msra.mxu1 %v5574_v61  ;;  %1428 = vmatpush.msra.mxu0 %v5575_v51 }
 0x4c8   :  { %1389 = vmatpush.msra.mxu1 %v5576_v25  ;;  %1429 = vmatpush.msra.mxu0 %v5577_v50 }
 0x4ca   :  { %1390 = vmatpush.msra.mxu1 %v5578_v11  ;;  %1430 = vmatpush.msra.mxu0 %v5579_v42 }
 0x4cc   :  { %1391 = vmatpush.msra.mxu1 %v5580_v38  ;;  %1431 = vmatpush.msra.mxu0 %v5581_v41 }
 0x4ce   :  { %1392 = vmatpush.msra.mxu1 %v5582_v45  ;;  %1432 = vmatpush.msra.mxu0 %v5583_v56 }
 0x4d0   :  { %1393 = vmatpush.msra.mxu1 %v5584_v22  ;;  %1433 = vmatpush.msra.mxu0 %v5585_v35 }
 0x4d2   :  { %1394 = vmatpush.msra.mxu1 %v5586_v43  ;;  %1434 = vmatpush.msra.mxu0 %v5587_v5  ;;  %v1067_v5 = vld [vmem:[#allocation3 + $0x78] sm:$0xff] }
 0x4d3   :  { %v1151_v48 = vadd.f32 %v1145_v60, %v1067_v5 }
 0x510   :  { %v964_v8 = vpop.f32.mrf.mxu1  ;;  %v1004_v15 = vpop.f32.mrf.mxu0 }
 0x511   :  { %v4365_v29 = vadd.f32 %v964_v8, %v945_v17  ;;  %v4367_v19 = vadd.f32 %v1004_v15, %v985_v3  ;;  %v1188_v3 = vand.u32 2147483647, %v1162_v34 }
 0x513   :  { %2700 = vtanh.f32 %v4367_v19  ;;  %vm1189_vm10 = vcmp.eq.f32.partialorder %v1188_v3, 8.507059e+37  ;;  %v4458_v3 = vld [vmem:[#allocation5 + $0xa0] sm:$0xff] }
 0x514   :  { %2702 = vrcp.f32 %v1162_v34 }
 0x518   :  { %v1085_v30 = vpop.f32.mrf.mxu1  ;;  %v1125_v16 = vpop.f32.mrf.mxu0 }
 0x519   :  { %v2701_v61 = vpop.eup %2700  ;;  %v1148_v51 = vadd.f32 %v1085_v30, %v1064_v37  ;;  %v1150_v25 = vadd.f32 %v1125_v16, %v1066_v39  ;;  %v1191_v16 = vor.u32 1.1754944e-38, %v1190_v1  ;;  %v4452_v1 = vld [vmem:[#allocation5 + $0xc0] sm:$0xff] }
 0x51a   :  { %1048 = vrot.lane.b32.xlu0 %v2701_v61, %s3258_s3  ;;  %v2703_v42 = vpop.eup %2702 }
 0x51b   :  { %v2580_v50 = vmul.f32 -1.442695, %v1148_v51  ;;  %v2582_v11 = vmul.f32 -1.442695, %v1150_v25  ;;  %v1180_v38 = vmul.f32 %v2703_v42, %v1162_v34  ;;  %vm1185_vm6 = vweird.f32 %v2703_v42 }
 0x51c   :  { %vm1186_vm8 = vmor %vm1184_vm7, %vm1185_vm6 }
 0x51d   :  { %2704 = vpow2.f32 %v2580_v50  ;;  %v1181_v56 = vsub.f32 1.0, %v1180_v38 }
 0x51e   :  { %2706 = vpow2.f32 %v2582_v11 }
 0x51f   :  { %v1182_v43 = vmul.f32 %v2703_v42, %v1181_v56 }
 0x521   :  { %v1183_v52 = vadd.f32 %v2703_v42, %v1182_v43 }
 0x523   :  { %v2705_v41 = vpop.eup %2704  ;;  %v1187_v37 = vsel %vm1186_vm8, %v2703_v42, %v1183_v52 }
 0x524   :  { %v1161_v45 = vadd.f32 1.0, %v2705_v41  ;;  %v2707_v22 = vpop.eup %2706  ;;  %v1192_v25 = vsel %vm1189_vm10, %v1191_v16, %v1187_v37  ;;  %v4467_v37 = vld [vmem:[#allocation5 + $0x90] sm:$0xff] }
 0x525   :  { %v1163_v35 = vadd.f32 1.0, %v2707_v22  ;;  %v1210_v56 = vmul.f32 %v1192_v25, %v4174_v9  ;;  %v4397_v9 = vld [vmem:[#allocation5 + $0x1e0] sm:$0xff]  ;;  %v4473_v16 = vld [vmem:[#allocation5 + $0x70] sm:$0xff] }
 0x526   :  { %2708 = vrcp.f32 %v1161_v45  ;;  %v1175_v15 = vand.u32 2147483648, %v1161_v45  ;;  %v1173_v30 = vand.u32 2147483647, %v1161_v45  ;;  %vm1169_vm11 = vweird.f32 %v1161_v45  ;;  %v4482_v25 = vld [vmem:[#allocation5 + $0x20] sm:$0xff] }
 0x527   :  { %2710 = vrcp.f32 %v1163_v35  ;;  %v1205_v5 = vand.u32 2147483648, %v1163_v35  ;;  %vm1199_vm15 = vweird.f32 %v1163_v35 }
 0x528   :  { %2712 = vtanh.f32 %v1151_v48  ;;  %v1176_v50 = vor.u32 1.1754944e-38, %v1175_v15  ;;  %vm1174_vm13 = vcmp.eq.f32.partialorder %v1173_v30, 8.507059e+37  ;;  %v4470_v30 = vld [vmem:[#allocation5 + $0x60] sm:$0xff] }
 0x529   :  { %v1206_v48 = vor.u32 1.1754944e-38, %v1205_v5 }
 0x52c   :  { %v2709_v62 = vpop.eup %2708 }
 0x52d   :  { %v1165_v58 = vmul.f32 %v2709_v62, %v1161_v45  ;;  %v2711_v17 = vpop.eup %2710  ;;  %vm1170_vm9 = vweird.f32 %v2709_v62  ;;  %v1203_v45 = vand.u32 2147483647, %v1163_v35 }
 0x52e   :  { %v1195_v26 = vmul.f32 %v2711_v17, %v1163_v35  ;;  %vm1171_vm12 = vmor %vm1169_vm11, %vm1170_vm9  ;;  %v2713_v34 = vpop.eup %2712  ;;  %vm1200_vm14 = vweird.f32 %v2711_v17  ;;  %v4446_v35 = vld [vmem:[#allocation5 + $0xe0] sm:$0xff] }
 0x52f   :  { %v1166_v8 = vsub.f32 1.0, %v1165_v58  ;;  %vm1201_vm1 = vmor %vm1199_vm15, %vm1200_vm14  ;;  %vm1204_vm2 = vcmp.eq.f32.partialorder %v1203_v45, 8.507059e+37 }
 0x530   :  { %v1196_v61 = vsub.f32 1.0, %v1195_v26  ;;  %v4464_v26 = vld [vmem:[#allocation5 + $0x80] sm:$0xff] }
 0x531   :  { %v1167_v39 = vmul.f32 %v2709_v62, %v1166_v8  ;;  %v4461_v8 = vld [vmem:[#allocation5 + $0xb0] sm:$0xff] }
 0x532   :  { %v1197_v41 = vmul.f32 %v2711_v17, %v1196_v61  ;;  %v4476_v61 = vld [vmem:[#allocation5 + $0x40] sm:$0xff] }
 0x533   :  { %v1168_v51 = vadd.f32 %v2709_v62, %v1167_v39 }
 0x534   :  { %v1198_v43 = vadd.f32 %v2711_v17, %v1197_v41 }
 0x535   :  { %v1172_v11 = vsel %vm1171_vm12, %v2709_v62, %v1168_v51  ;;  %v4479_v51 = vld [vmem:[#allocation5 + $0x50] sm:$0xff] }
 0x536   :  { %v1177_v38 = vsel %vm1174_vm13, %v1176_v50, %v1172_v11  ;;  %v1202_v60 = vsel %vm1201_vm1, %v2711_v17, %v1198_v43  ;;  %v4455_v17 = vld [vmem:[#allocation5 + $0xd0] sm:$0xff]  ;;  %v4488_v11 = vld [vmem:[#allocation5] sm:$0xff] }
 0x537   :  { %v1211_v22 = vmul.f32 %v2713_v34, %v1177_v38  ;;  %v1207_v52 = vsel %vm1204_vm2, %v1206_v48, %v1202_v60  ;;  %v4485_v50 = vld [vmem:[#allocation5 + $0x30] sm:$0xff]  ;;  %5590 = vst [vmem:[#allocation20_spill] sm:$0xff] %v4488_v11 }
 0x538   :  { %v4491_v34 = vld [vmem:[#allocation5 + $0x10] sm:$0xff] }
 0x539   :  { %v4372_v42 = vadd.f32 %v1211_v22, %v1210_v56  ;;  %5591 = vst [vmem:[#allocation25_spill] sm:$0xff] %v4491_v34 }
 0x53b   :  { %2714 = vtanh.f32 %v4372_v42 }
 0x541   :  { %v2715_v62 = vpop.eup %2714 }
 0x542   :  { %v4375_v58 = vmul.f32 %v2715_v62, %v1207_v52 }
 0x544   :  { %1234 = vmatmul.f32.vlgmr.msrb.gmra.mxu1 %v4375_v58  ;;  %1274 = vmatmul.f32.vlgmr.msrb.gmra.mxu0 %v4375_v58 }
 0x545   :  { %1537 = vmatpush.msrb.mxu1 %v4181_v23  ;;  %1577 = vmatpush.msrb.mxu0 %v4184_v46  ;;  %v4400_v23 = vld [vmem:[#allocation5 + $0x1f0] sm:$0xff]  ;;  %v4403_v46 = vld [vmem:[#allocation5 + $0x1c0] sm:$0xff] }
 0x547   :  { %1538 = vmatpush.msrb.mxu1 %v4187_v49  ;;  %1578 = vmatpush.msrb.mxu0 %v4190_v63  ;;  %v4406_v49 = vld [vmem:[#allocation5 + $0x1d0] sm:$0xff]  ;;  %v4409_v63 = vld [vmem:[#allocation5 + $0x1a0] sm:$0xff] }
 0x549   :  { %1539 = vmatpush.msrb.mxu1 %v4193_v33  ;;  %1579 = vmatpush.msrb.mxu0 %v4196_v6  ;;  %v4412_v33 = vld [vmem:[#allocation5 + $0x1b0] sm:$0xff]  ;;  %v4415_v6 = vld [vmem:[#allocation5 + $0x180] sm:$0xff] }
 0x54b   :  { %1540 = vmatpush.msrb.mxu1 %v4199_v55  ;;  %1580 = vmatpush.msrb.mxu0 %v4202_v57  ;;  %v4418_v55 = vld [vmem:[#allocation5 + $0x190] sm:$0xff]  ;;  %v4421_v57 = vld [vmem:[#allocation5 + $0x160] sm:$0xff] }
 0x54c   :  { %1395 = vmatmul.f32.vlgmr.msra.gmra.mxu1 %v4375_v58  ;;  %1435 = vmatmul.f32.vlgmr.msra.gmra.mxu0 %v4375_v58 }
 0x54d   :  { %1541 = vmatpush.msrb.mxu1 %v4207_v53  ;;  %1581 = vmatpush.msrb.mxu0 %v4210_v54  ;;  %v4424_v53 = vld [vmem:[#allocation5 + $0x170] sm:$0xff]  ;;  %v4427_v54 = vld [vmem:[#allocation5 + $0x140] sm:$0xff] }
 0x54f   :  { %1542 = vmatpush.msrb.mxu1 %v4213_v40  ;;  %1582 = vmatpush.msrb.mxu0 %v4216_v32  ;;  %v4430_v40 = vld [vmem:[#allocation5 + $0x150] sm:$0xff]  ;;  %v2578_v32 = vmul.f32 -1.442695, %v4365_v29 }
 0x550   :  { %v4449_v29 = vld [vmem:[#allocation5 + $0xf0] sm:$0xff] }
 0x551   :  { %1543 = vmatpush.msrb.mxu1 %v4219_v12  ;;  %1583 = vmatpush.msrb.mxu0 %v4222_v2  ;;  %v4434_v12 = vld [vmem:[#allocation5 + $0x120] sm:$0xff]  ;;  %v4437_v2 = vld [vmem:[#allocation5 + $0x130] sm:$0xff]  ;;  %2716 = vpow2.f32 %v2578_v32 }
 0x553   :  { %1544 = vmatpush.msrb.mxu1 %v4225_v21  ;;  %1584 = vmatpush.msrb.mxu0 %v4228_v59  ;;  %v4440_v21 = vld [vmem:[#allocation5 + $0x100] sm:$0xff]  ;;  %v4443_v59 = vld [vmem:[#allocation5 + $0x110] sm:$0xff] }
 0x555   :  { %1650 = vmatpush.msra.mxu1 %v4397_v9  ;;  %1690 = vmatpush.msra.mxu0 %v4400_v23 }
 0x557   :  { %1651 = vmatpush.msra.mxu1 %v4403_v46  ;;  %1691 = vmatpush.msra.mxu0 %v4406_v49  ;;  %v2717_v15 = vpop.eup %2716 }
 0x558   :  { %v1013_v39 = vadd.f32 1.0, %v2717_v15 }
 0x559   :  { %1652 = vmatpush.msra.mxu1 %v4409_v63  ;;  %1692 = vmatpush.msra.mxu0 %v4412_v33 }
 0x55a   :  { %2718 = vrcp.f32 %v1013_v39  ;;  %v1026_v5 = vand.u32 2147483648, %v1013_v39  ;;  %vm1020_vm4 = vweird.f32 %v1013_v39  ;;  %v1024_v45 = vand.u32 2147483647, %v1013_v39 }
 0x55b   :  { %1653 = vmatpush.msra.mxu1 %v4415_v6  ;;  %1693 = vmatpush.msra.mxu0 %v4418_v55 }
 0x55c   :  { %v1027_v48 = vor.u32 1.1754944e-38, %v1026_v5  ;;  %vm1025_vm6 = vcmp.eq.f32.partialorder %v1024_v45, 8.507059e+37 }
 0x55d   :  { %1654 = vmatpush.msra.mxu1 %v4421_v57  ;;  %1694 = vmatpush.msra.mxu0 %v4424_v53 }
 0x55f   :  { %1655 = vmatpush.msra.mxu1 %v4427_v54  ;;  %1695 = vmatpush.msra.mxu0 %v4430_v40 }
 0x560   :  { %v2719_v38 = vpop.eup %2718 }
 0x561   :  { %1656 = vmatpush.msra.mxu1 %v4434_v12  ;;  %1696 = vmatpush.msra.mxu0 %v4437_v2  ;;  %v1016_v41 = vmul.f32 %v2719_v38, %v1013_v39  ;;  %vm1021_vm3 = vweird.f32 %v2719_v38  ;;  %v2579_v39 = vmul.f32 -1.442695, %v4367_v19 }
 0x562   :  { %vm1022_vm5 = vmor %vm1020_vm4, %vm1021_vm3 }
 0x563   :  { %1657 = vmatpush.msra.mxu1 %v4440_v21  ;;  %1697 = vmatpush.msra.mxu0 %v4443_v59  ;;  %v1017_v56 = vsub.f32 1.0, %v1016_v41 }
 0x565   :  { %1658 = vmatpush.msra.mxu1 %v4446_v35  ;;  %1698 = vmatpush.msra.mxu0 %v4449_v29  ;;  %v1018_v22 = vmul.f32 %v2719_v38, %v1017_v56 }
 0x567   :  { %1659 = vmatpush.msra.mxu1 %v4452_v1  ;;  %1699 = vmatpush.msra.mxu0 %v4455_v17  ;;  %v1019_v43 = vadd.f32 %v2719_v38, %v1018_v22 }
 0x569   :  { %1660 = vmatpush.msra.mxu1 %v4458_v3  ;;  %1700 = vmatpush.msra.mxu0 %v4461_v8  ;;  %v1023_v60 = vsel %vm1022_vm5, %v2719_v38, %v1019_v43 }
 0x56a   :  { %v1028_v52 = vsel %vm1025_vm6, %v1027_v48, %v1023_v60 }
 0x56b   :  { %1661 = vmatpush.msra.mxu1 %v4464_v26  ;;  %1701 = vmatpush.msra.mxu0 %v4467_v37  ;;  %v1046_v15 = vmul.f32 %v1028_v52, %v4266_v20 }
 0x56d   :  { %1662 = vmatpush.msra.mxu1 %v4470_v30  ;;  %1702 = vmatpush.msra.mxu0 %v4473_v16 }
 0x56f   :  { %1663 = vmatpush.msra.mxu1 %v4476_v61  ;;  %1703 = vmatpush.msra.mxu0 %v4479_v51 }
 0x571   :  { %1664 = vmatpush.msra.mxu1 %v4482_v25  ;;  %1704 = vmatpush.msra.mxu0 %v4485_v50 }
 0x573   :  { %1665 = vmatpush.msra.mxu1 %v4488_v11  ;;  %1705 = vmatpush.msra.mxu0 %v4491_v34 }
 0x58c   :  { %v1049_v62 = vpop.permute.xlu0 %1048 }
 0x58d   :  { %v1051_v32 = vmul.f32 %v1049_v62, %v1028_v52 }
 0x58f   :  { %1053 = vrot.lane.b32.xlu1 %v1051_v32, %s3258_s3 }
 0x601   :  { %v1054_v34 = vpop.permute.xlu1 %1053 }
 0x602   :  { %v4496_v11 = vadd.f32 %v1054_v34, %v1046_v15  ;;  %v4503_v15 = vld [vmem:[#allocation7 + $0xf0] sm:$0xff] }
 0x604   :  { %2720 = vtanh.f32 %v4496_v11 }
 0x605   :  { %2722 = vpow2.f32 %v2579_v39  ;;  %v4509_v39 = vld [vmem:[#allocation7 + $0xe0] sm:$0xff] }
 0x60a   :  { %v2721_v41 = vpop.eup %2720 }
 0x60b   :  { %1059 = vrot.lane.b32.xlu2 %v2721_v41, %s3258_s3  ;;  %v2723_v38 = vpop.eup %2722  ;;  %v4506_v41 = vld [vmem:[#allocation7 + $0xf8] sm:$0xff] }
 0x60c   :  { %v1014_v56 = vadd.f32 1.0, %v2723_v38  ;;  %v4512_v38 = vld [vmem:[#allocation7 + $0xe8] sm:$0xff] }
 0x60e   :  { %2724 = vrcp.f32 %v1014_v56  ;;  %v1041_v20 = vand.u32 2147483648, %v1014_v56  ;;  %vm1035_vm8 = vweird.f32 %v1014_v56  ;;  %v1039_v34 = vand.u32 2147483647, %v1014_v56 }
 0x610   :  { %v1042_v62 = vor.u32 1.1754944e-38, %v1041_v20  ;;  %vm1040_vm10 = vcmp.eq.f32.partialorder %v1039_v34, 8.507059e+37  ;;  %v4535_v20 = vld [vmem:[#allocation7 + $0xa0] sm:$0xff]  ;;  %v4538_v34 = vld [vmem:[#allocation7 + $0xa8] sm:$0xff] }
 0x611   :  { %5597 = vst [vmem:[#allocation34_spill] sm:$0xff] %v4535_v20 }
 0x612   :  { %5598 = vst [vmem:[#allocation28_spill] sm:$0xff] %v4538_v34 }
 0x614   :  { %v2725_v22 = vpop.eup %2724 }
 0x615   :  { %v1031_v43 = vmul.f32 %v2725_v22, %v1014_v56  ;;  %vm1036_vm7 = vweird.f32 %v2725_v22  ;;  %v4515_v56 = vld [vmem:[#allocation7 + $0xd0] sm:$0xff] }
 0x616   :  { %vm1037_vm9 = vmor %vm1035_vm8, %vm1036_vm7 }
 0x617   :  { %v1032_v5 = vsub.f32 1.0, %v1031_v43  ;;  %v4521_v43 = vld [vmem:[#allocation7 + $0xc0] sm:$0xff] }
 0x618   :  { %5593 = vst [vmem:[#allocation27_spill] sm:$0xff] %v4521_v43 }
 0x619   :  { %v1033_v45 = vmul.f32 %v2725_v22, %v1032_v5  ;;  %v4524_v5 = vld [vmem:[#allocation7 + $0xc8] sm:$0xff] }
 0x61a   :  { %5594 = vst [vmem:[#allocation24_spill] sm:$0xff] %v4524_v5 }
 0x61b   :  { %v1034_v60 = vadd.f32 %v2725_v22, %v1033_v45  ;;  %v4529_v45 = vld [vmem:[#allocation7 + $0xb0] sm:$0xff] }
 0x61c   :  { %5595 = vst [vmem:[#allocation30_spill] sm:$0xff] %v4529_v45 }
 0x61d   :  { %v1038_v48 = vsel %vm1037_vm9, %v2725_v22, %v1034_v60  ;;  %v4518_v22 = vld [vmem:[#allocation7 + $0xd8] sm:$0xff] }
 0x61e   :  { %v1043_v52 = vsel %vm1040_vm10, %v1042_v62, %v1038_v48  ;;  %5592 = vst [vmem:[#allocation22_spill] sm:$0xff] %v4518_v22  ;;  %v4532_v60 = vld [vmem:[#allocation7 + $0xb8] sm:$0xff]  ;;  %v4547_v62 = vld [vmem:[#allocation7 + $0x80] sm:$0xff] }
 0x61f   :  { %5596 = vst [vmem:[#allocation26_spill] sm:$0xff] %v4532_v60  ;;  %v4541_v48 = vld [vmem:[#allocation7 + $0x98] sm:$0xff] }
 0x620   :  { %5599 = vst [vmem:[#allocation31_spill] sm:$0xff] %v4541_v48 }
 0x621   :  { %5601 = vst [vmem:[#allocation39_spill] sm:$0xff] %v4547_v62 }
 0x665   :  { %v1060_v32 = vpop.permute.xlu2 %1059 }
 0x666   :  { %v1062_v19 = vmul.f32 %v1060_v32, %v1043_v52  ;;  %v4550_v52 = vld [vmem:[#allocation7 + $0x88] sm:$0xff]  ;;  %v4553_v32 = vld [vmem:[#allocation7 + $0x70] sm:$0xff] }
 0x667   :  { %5602 = vst [vmem:[#allocation42_spill] sm:$0xff] %v4550_v52 }
 0x668   :  { %2583 = vmatmul.msk.f32.vlgmr.msrb.gmra.mxu3 %vm341_vm0, %v1062_v19  ;;  %2584 = vmatmul.msk.f32.vlgmr.msrb.gmra.mxu2 %vm341_vm0, %v1062_v19  ;;  %5603 = vst [vmem:[#allocation45_spill] sm:$0xff] %v4553_v32  ;;  %v4556_v19 = vld [vmem:[#allocation7 + $0x78] sm:$0xff] }
 0x669   :  { %1509 = vmatpush.msrb.mxu3 %v4503_v15  ;;  %1549 = vmatpush.msrb.mxu2 %v4506_v41  ;;  %5604 = vst [vmem:[#allocation48_spill] sm:$0xff] %v4556_v19 }
 0x66b   :  { %1510 = vmatpush.msrb.mxu3 %v4509_v39  ;;  %1550 = vmatpush.msrb.mxu2 %v4512_v38 }
 0x66d   :  { %1511 = vmatpush.msrb.mxu3 %v4515_v56  ;;  %1551 = vmatpush.msrb.mxu2 %v4518_v22 }
 0x66f   :  { %1512 = vmatpush.msrb.mxu3 %v4521_v43  ;;  %1552 = vmatpush.msrb.mxu2 %v4524_v5 }
 0x670   :  { %1375 = vmatmul.f32.vlgmr.msra.gmra.mxu3 %v4375_v58  ;;  %1415 = vmatmul.f32.vlgmr.msra.gmra.mxu2 %v4375_v58  ;;  %v4544_v58 = vld [vmem:[#allocation7 + $0x90] sm:$0xff] }
 0x671   :  { %1513 = vmatpush.msrb.mxu3 %v4529_v45  ;;  %1553 = vmatpush.msrb.mxu2 %v4532_v60  ;;  %5600 = vst [vmem:[#allocation35_spill] sm:$0xff] %v4544_v58 }
 0x673   :  { %1514 = vmatpush.msrb.mxu3 %v4535_v20  ;;  %1554 = vmatpush.msrb.mxu2 %v4538_v34  ;;  %v1358_v34 = vld [vmem:[#allocation3 + $0x98] sm:$0xff] }
 0x675   :  { %1555 = vmatpush.msrb.mxu2 %v4541_v48  ;;  %1515 = vmatpush.msrb.mxu3 %v4544_v58  ;;  %v4559_v48 = vld [vmem:[#allocation7 + $0x60] sm:$0xff]  ;;  %v4562_v58 = vld [vmem:[#allocation7 + $0x68] sm:$0xff] }
 0x676   :  { %5605 = vst [vmem:[#allocation38_spill] sm:$0xff] %v4559_v48 }
 0x677   :  { %1516 = vmatpush.msrb.mxu3 %v4547_v62  ;;  %1556 = vmatpush.msrb.mxu2 %v4550_v52  ;;  %5606 = vst [vmem:[#allocation53_spill] sm:$0xff] %v4562_v58 }
 0x679   :  { %1517 = vmatpush.msrb.mxu3 %v4553_v32  ;;  %1557 = vmatpush.msrb.mxu2 %v4556_v19  ;;  %v1355_v19 = vld [vmem:[#allocation3 + $0x80] sm:$0xff]  ;;  %v1357_v32 = vld [vmem:[#allocation3 + $0x90] sm:$0xff] }
 0x67b   :  { %1518 = vmatpush.msrb.mxu3 %v4559_v48  ;;  %1558 = vmatpush.msrb.mxu2 %v4562_v58 }
 0x67d   :  { %1519 = vmatpush.msrb.mxu3 %v4295_v7  ;;  %1559 = vmatpush.msrb.mxu2 %v4298_v47  ;;  %v4577_v7 = vld [vmem:[#allocation5 + $0x1e8] sm:$0xff]  ;;  %v4580_v47 = vld [vmem:[#allocation5 + $0x1f8] sm:$0xff] }
 0x67e   :  { %5607 = vst [vmem:[#allocation57_spill] sm:$0xff] %v4577_v7 }
 0x67f   :  { %1520 = vmatpush.msrb.mxu3 %v4301_v10  ;;  %1560 = vmatpush.msrb.mxu2 %v4304_v36  ;;  %5608 = vst [vmem:[#allocation61_spill] sm:$0xff] %v4580_v47  ;;  %v4583_v10 = vld [vmem:[#allocation5 + $0x1c8] sm:$0xff]  ;;  %v4586_v36 = vld [vmem:[#allocation5 + $0x1d8] sm:$0xff] }
 0x680   :  { %5609 = vst [vmem:[#allocation65_spill] sm:$0xff] %v4583_v10 }
 0x681   :  { %1521 = vmatpush.msrb.mxu3 %v4307_v24  ;;  %1561 = vmatpush.msrb.mxu2 %v4310_v44  ;;  %5610 = vst [vmem:[#allocation69_spill] sm:$0xff] %v4586_v36  ;;  %v4589_v24 = vld [vmem:[#allocation5 + $0x1a8] sm:$0xff]  ;;  %v4592_v44 = vld [vmem:[#allocation5 + $0x1b8] sm:$0xff] }
 0x682   :  { %5611 = vst [vmem:[#allocation73_spill] sm:$0xff] %v4589_v24 }
 0x683   :  { %1522 = vmatpush.msrb.mxu3 %v4313_v18  ;;  %1562 = vmatpush.msrb.mxu2 %v4316_v31  ;;  %5612 = vst [vmem:[#allocation40_spill] sm:$0xff] %v4592_v44  ;;  %v4595_v18 = vld [vmem:[#allocation5 + $0x188] sm:$0xff]  ;;  %v4598_v31 = vld [vmem:[#allocation5 + $0x198] sm:$0xff] }
 0x684   :  { %5613 = vst [vmem:[#allocation43_spill] sm:$0xff] %v4595_v18 }
 0x685   :  { %1523 = vmatpush.msrb.mxu3 %v4319_v0  ;;  %1563 = vmatpush.msrb.mxu2 %v4322_v27  ;;  %5614 = vst [vmem:[#allocation46_spill] sm:$0xff] %v4598_v31  ;;  %v4601_v0 = vld [vmem:[#allocation5 + $0x168] sm:$0xff]  ;;  %v4604_v27 = vld [vmem:[#allocation5 + $0x178] sm:$0xff] }
 0x686   :  { %5615 = vst [vmem:[#allocation49_spill] sm:$0xff] %v4601_v0 }
 0x687   :  { %1524 = vmatpush.msrb.mxu3 %v4325_v28  ;;  %1564 = vmatpush.msrb.mxu2 %v4328_v4  ;;  %5616 = vst [vmem:[#allocation52_spill] sm:$0xff] %v4604_v27  ;;  %v4607_v28 = vld [vmem:[#allocation5 + $0x148] sm:$0xff]  ;;  %v4610_v4 = vld [vmem:[#allocation5 + $0x158] sm:$0xff] }
 0x688   :  { %5617 = vst [vmem:[#allocation56_spill] sm:$0xff] %v4607_v28 }
 0x689   :  { %1670 = vmatpush.msra.mxu3 %v4577_v7  ;;  %1710 = vmatpush.msra.mxu2 %v4580_v47  ;;  %5618 = vst [vmem:[#allocation60_spill] sm:$0xff] %v4610_v4 }
 0x68b   :  { %1671 = vmatpush.msra.mxu3 %v4583_v10  ;;  %1711 = vmatpush.msra.mxu2 %v4586_v36  ;;  %v1275_v10 = vpop.f32.mrf.mxu0 }
 0x68c   :  { %v1276_v47 = vadd.f32 %v1275_v10, %v5589_v13 }
 0x68d   :  { %1672 = vmatpush.msra.mxu3 %v4589_v24  ;;  %1712 = vmatpush.msra.mxu2 %v4592_v44  ;;  %v1356_v44 = vld [vmem:[#allocation3 + $0x88] sm:$0xff] }
 0x68f   :  { %1673 = vmatpush.msra.mxu3 %v4595_v18  ;;  %1713 = vmatpush.msra.mxu2 %v4598_v31  ;;  %v4613_v18 = vld [vmem:[#allocation5 + $0x128] sm:$0xff]  ;;  %v4616_v31 = vld [vmem:[#allocation5 + $0x138] sm:$0xff] }
 0x690   :  { %5619 = vst [vmem:[#allocation64_spill] sm:$0xff] %v4613_v18 }
 0x691   :  { %1674 = vmatpush.msra.mxu3 %v4601_v0  ;;  %1714 = vmatpush.msra.mxu2 %v4604_v27  ;;  %5620 = vst [vmem:[#allocation68_spill] sm:$0xff] %v4616_v31  ;;  %v4619_v0 = vld [vmem:[#allocation5 + $0x108] sm:$0xff]  ;;  %v4622_v27 = vld [vmem:[#allocation5 + $0x118] sm:$0xff] }
 0x692   :  { %5621 = vst [vmem:[#allocation72_spill] sm:$0xff] %v4619_v0 }
 0x693   :  { %1675 = vmatpush.msra.mxu3 %v4607_v28  ;;  %1715 = vmatpush.msra.mxu2 %v4610_v4  ;;  %5622 = vst [vmem:[#allocation76_spill] sm:$0xff] %v4622_v27  ;;  %v4625_v28 = vld [vmem:[#allocation5 + $0xe8] sm:$0xff]  ;;  %v4628_v4 = vld [vmem:[#allocation5 + $0xf8] sm:$0xff]  ;;  %v1436_v20 = vpop.f32.mrf.mxu0 }
 0x694   :  { %5623 = vst [vmem:[#allocation37_spill] sm:$0xff] %v4625_v28 }
 0x695   :  { %1676 = vmatpush.msra.mxu3 %v4613_v18  ;;  %1716 = vmatpush.msra.mxu2 %v4616_v31  ;;  %5624 = vst [vmem:[#allocation51_spill] sm:$0xff] %v4628_v4  ;;  %v4631_v18 = vld [vmem:[#allocation5 + $0xc8] sm:$0xff]  ;;  %v4634_v31 = vld [vmem:[#allocation5 + $0xd8] sm:$0xff] }
 0x696   :  { %5625 = vst [vmem:[#allocation41_spill] sm:$0xff] %v4631_v18 }
 0x697   :  { %1677 = vmatpush.msra.mxu3 %v4619_v0  ;;  %1717 = vmatpush.msra.mxu2 %v4622_v27  ;;  %5626 = vst [vmem:[#allocation55_spill] sm:$0xff] %v4634_v31  ;;  %v4637_v0 = vld [vmem:[#allocation5 + $0xa8] sm:$0xff]  ;;  %v4640_v27 = vld [vmem:[#allocation5 + $0xb8] sm:$0xff] }
 0x698   :  { %5627 = vst [vmem:[#allocation44_spill] sm:$0xff] %v4637_v0 }
 0x699   :  { %1678 = vmatpush.msra.mxu3 %v4625_v28  ;;  %1718 = vmatpush.msra.mxu2 %v4628_v4  ;;  %5628 = vst [vmem:[#allocation10_spill] sm:$0xff] %v4640_v27  ;;  %v4643_v28 = vld [vmem:[#allocation5 + $0x88] sm:$0xff]  ;;  %v4646_v4 = vld [vmem:[#allocation5 + $0x98] sm:$0xff] }
 0x69a   :  { %5629 = vst [vmem:[#allocation59_spill] sm:$0xff] %v4643_v28 }
 0x69b   :  { %1679 = vmatpush.msra.mxu3 %v4631_v18  ;;  %1719 = vmatpush.msra.mxu2 %v4634_v31  ;;  %5630 = vst [vmem:[#allocation47_spill] sm:$0xff] %v4646_v4  ;;  %v4649_v18 = vld [vmem:[#allocation5 + $0x68] sm:$0xff]  ;;  %v4652_v31 = vld [vmem:[#allocation5 + $0x78] sm:$0xff] }
 0x69c   :  { %5631 = vst [vmem:[#allocation63_spill] sm:$0xff] %v4649_v18 }
 0x69d   :  { %1680 = vmatpush.msra.mxu3 %v4637_v0  ;;  %1720 = vmatpush.msra.mxu2 %v4640_v27  ;;  %5632 = vst [vmem:[#allocation50_spill] sm:$0xff] %v4652_v31  ;;  %v4655_v0 = vld [vmem:[#allocation5 + $0x48] sm:$0xff]  ;;  %v4658_v27 = vld [vmem:[#allocation5 + $0x58] sm:$0xff] }
 0x69e   :  { %5633 = vst [vmem:[#allocation67_spill] sm:$0xff] %v4655_v0 }
 0x69f   :  { %1681 = vmatpush.msra.mxu3 %v4643_v28  ;;  %1721 = vmatpush.msra.mxu2 %v4646_v4  ;;  %5634 = vst [vmem:[#allocation54_spill] sm:$0xff] %v4658_v27  ;;  %v4661_v28 = vld [vmem:[#allocation5 + $0x28] sm:$0xff]  ;;  %v4664_v4 = vld [vmem:[#allocation5 + $0x38] sm:$0xff] }
 0x6a0   :  { %5635 = vst [vmem:[#allocation71_spill] sm:$0xff] %v4661_v28 }
 0x6a1   :  { %1682 = vmatpush.msra.mxu3 %v4649_v18  ;;  %1722 = vmatpush.msra.mxu2 %v4652_v31  ;;  %5636 = vst [vmem:[#allocation58_spill] sm:$0xff] %v4664_v4  ;;  %v4667_v18 = vld [vmem:[#allocation5 + $0x8] sm:$0xff]  ;;  %v4670_v31 = vld [vmem:[#allocation5 + $0x18] sm:$0xff] }
 0x6a2   :  { %5637 = vst [vmem:[#allocation75_spill] sm:$0xff] %v4667_v18 }
 0x6a3   :  { %1683 = vmatpush.msra.mxu3 %v4655_v0  ;;  %1723 = vmatpush.msra.mxu2 %v4658_v27  ;;  %5638 = vst [vmem:[#allocation62_spill] sm:$0xff] %v4670_v31  ;;  %v1235_v0 = vpop.f32.mrf.mxu1 }
 0x6a5   :  { %1684 = vmatpush.msra.mxu3 %v4661_v28  ;;  %1724 = vmatpush.msra.mxu2 %v4664_v4  ;;  %v1236_v28 = vadd.f32 %v1235_v0, %v5588_v14 }
 0x6a7   :  { %1685 = vmatpush.msra.mxu3 %v4667_v18  ;;  %1725 = vmatpush.msra.mxu2 %v4670_v31 }
 0x6ab   :  { %v1396_v24 = vpop.f32.mrf.mxu1 }
 0x6ac   :  { %v1440_v27 = vadd.f32 %v1396_v24, %v1356_v44 }
 0x6ae   :  { %v2588_v36 = vmul.f32 -1.442695, %v1440_v27 }
 0x6b0   :  { %2726 = vpow2.f32 %v2588_v36 }
 0x6b6   :  { %v2727_v58 = vpop.eup %2726 }
 0x6b7   :  { %v1453_v31 = vadd.f32 1.0, %v2727_v58 }
 0x6b9   :  { %vm1475_vm12 = vweird.f32 %v1453_v31 }
 0x6eb   :  { %v1255_v4 = vpop.f32.mrf.mxu3  ;;  %v1295_v7 = vpop.f32.mrf.mxu2 }
 0x6ec   :  { %v4675_v48 = vadd.f32 %v1255_v4, %v1236_v28  ;;  %v4677_v18 = vadd.f32 %v1295_v7, %v1276_v47 }
 0x6ee   :  { %2728 = vtanh.f32 %v4677_v18 }
 0x6ef   :  { %2730 = vrcp.f32 %v1453_v31 }
 0x6f3   :  { %v1376_v24 = vpop.f32.mrf.mxu3  ;;  %v1416_v36 = vpop.f32.mrf.mxu2 }
 0x6f4   :  { %v2729_v44 = vpop.eup %2728  ;;  %v1439_v27 = vadd.f32 %v1376_v24, %v1355_v19  ;;  %v1441_v0 = vadd.f32 %v1416_v36, %v1357_v32  ;;  %v1442_v32 = vadd.f32 %v1436_v20, %v1358_v34 }
 0x6f5   :  { %1339 = vrot.lane.b32.xlu0 %v2729_v44, %s3258_s3  ;;  %v2731_v28 = vpop.eup %2730  ;;  %v1481_v44 = vand.u32 2147483648, %v1453_v31 }
 0x6f6   :  { %v2587_v10 = vmul.f32 -1.442695, %v1439_v27  ;;  %v2589_v13 = vmul.f32 -1.442695, %v1441_v0  ;;  %v1471_v7 = vmul.f32 %v2731_v28, %v1453_v31  ;;  %vm1476_vm11 = vweird.f32 %v2731_v28 }
 0x6f7   :  { %vm1477_vm13 = vmor %vm1475_vm12, %vm1476_vm11  ;;  %v1482_v60 = vor.u32 1.1754944e-38, %v1481_v44 }
 0x6f8   :  { %2732 = vpow2.f32 %v2587_v10  ;;  %v1472_v14 = vsub.f32 1.0, %v1471_v7 }
 0x6f9   :  { %2734 = vpow2.f32 %v2589_v13  ;;  %v1479_v13 = vand.u32 2147483647, %v1453_v31 }
 0x6fa   :  { %v1473_v62 = vmul.f32 %v2731_v28, %v1472_v14 }
 0x6fb   :  { %vm1480_vm15 = vcmp.eq.f32.partialorder %v1479_v13, 8.507059e+37 }
 0x6fc   :  { %v1474_v24 = vadd.f32 %v2731_v28, %v1473_v62 }
 0x6fe   :  { %v2733_v47 = vpop.eup %2732 }
 0x6ff   :  { %v1452_v4 = vadd.f32 1.0, %v2733_v47  ;;  %v2735_v58 = vpop.eup %2734  ;;  %v1478_v47 = vsel %vm1477_vm13, %v2731_v28, %v1474_v24 }
 0x700   :  { %v1454_v52 = vadd.f32 1.0, %v2735_v58  ;;  %v1483_v34 = vsel %vm1480_vm15, %v1482_v60, %v1478_v47  ;;  %v4715_v47 = vld [vmem:[#allocation7 + $0x130] sm:$0xff] }
 0x701   :  { %2736 = vrcp.f32 %v1452_v4  ;;  %v1466_v10 = vand.u32 2147483648, %v1452_v4  ;;  %v1464_v14 = vand.u32 2147483647, %v1452_v4  ;;  %vm1460_vm1 = vweird.f32 %v1452_v4 }
 0x702   :  { %2738 = vrcp.f32 %v1454_v52  ;;  %v1496_v44 = vand.u32 2147483648, %v1454_v52  ;;  %vm1490_vm5 = vweird.f32 %v1454_v52 }
 0x703   :  { %2740 = vtanh.f32 %v1442_v32  ;;  %v1467_v62 = vor.u32 1.1754944e-38, %v1466_v10  ;;  %vm1465_vm3 = vcmp.eq.f32.partialorder %v1464_v14, 8.507059e+37  ;;  %v1501_v32 = vmul.f32 %v1483_v34, %v4372_v42  ;;  %v4689_v42 = vld [vmem:[#allocation7 + $0x170] sm:$0xff]  ;;  %v4707_v10 = vld [vmem:[#allocation7 + $0x140] sm:$0xff] }
 0x704   :  { %v1497_v13 = vor.u32 1.1754944e-38, %v1496_v44  ;;  %v4721_v14 = vld [vmem:[#allocation7 + $0x120] sm:$0xff]  ;;  %v4727_v34 = vld [vmem:[#allocation7 + $0x110] sm:$0xff] }
 0x707   :  { %v2737_v19 = vpop.eup %2736 }
 0x708   :  { %v1456_v36 = vmul.f32 %v2737_v19, %v1452_v4  ;;  %v2739_v27 = vpop.eup %2738  ;;  %vm1461_vm14 = vweird.f32 %v2737_v19  ;;  %v1494_v4 = vand.u32 2147483647, %v1454_v52 }
 0x709   :  { %v1486_v7 = vmul.f32 %v2739_v27, %v1454_v52  ;;  %vm1462_vm2 = vmor %vm1460_vm1, %vm1461_vm14  ;;  %v2741_v31 = vpop.eup %2740  ;;  %vm1491_vm4 = vweird.f32 %v2739_v27  ;;  %v4701_v52 = vld [vmem:[#allocation7 + $0x150] sm:$0xff] }
 0x70a   :  { %v1457_v0 = vsub.f32 1.0, %v1456_v36  ;;  %vm1492_vm6 = vmor %vm1490_vm5, %vm1491_vm4  ;;  %vm1495_vm7 = vcmp.eq.f32.partialorder %v1494_v4, 8.507059e+37  ;;  %v5641_v4 = vld [vmem:[#allocation22_spill] sm:$0xff] }
 0x70b   :  { %v1487_v45 = vsub.f32 1.0, %v1486_v7  ;;  %v4710_v7 = vld [vmem:[#allocation7 + $0x148] sm:$0xff] }
 0x70c   :  { %v1458_v58 = vmul.f32 %v2737_v19, %v1457_v0 }
 0x70d   :  { %v1488_v43 = vmul.f32 %v2739_v27, %v1487_v45  ;;  %v4698_v45 = vld [vmem:[#allocation7 + $0x168] sm:$0xff] }
 0x70e   :  { %v1459_v20 = vadd.f32 %v2737_v19, %v1458_v58  ;;  %v4718_v58 = vld [vmem:[#allocation7 + $0x138] sm:$0xff] }
 0x70f   :  { %v1489_v24 = vadd.f32 %v2739_v27, %v1488_v43  ;;  %v4695_v43 = vld [vmem:[#allocation7 + $0x160] sm:$0xff] }
 0x710   :  { %v1463_v5 = vsel %vm1462_vm2, %v2737_v19, %v1459_v20  ;;  %v4724_v20 = vld [vmem:[#allocation7 + $0x128] sm:$0xff] }
 0x711   :  { %v1468_v36 = vsel %vm1465_vm3, %v1467_v62, %v1463_v5  ;;  %v1493_v60 = vsel %vm1492_vm6, %v2739_v27, %v1489_v24  ;;  %v4704_v27 = vld [vmem:[#allocation7 + $0x158] sm:$0xff] }
 0x712   :  { %v1502_v22 = vmul.f32 %v2741_v31, %v1468_v36  ;;  %v1498_v0 = vsel %vm1495_vm7, %v1497_v13, %v1493_v60  ;;  %v4730_v62 = vld [vmem:[#allocation7 + $0x118] sm:$0xff]  ;;  %v4733_v31 = vld [vmem:[#allocation7 + $0x100] sm:$0xff]  ;;  %v4736_v36 = vld [vmem:[#allocation7 + $0x108] sm:$0xff] }
 0x713   :  { %v5642_v60 = vld [vmem:[#allocation27_spill] sm:$0xff]  ;;  %v5643_v13 = vld [vmem:[#allocation24_spill] sm:$0xff] }
 0x714   :  { %v4682_v28 = vadd.f32 %v1502_v22, %v1501_v32  ;;  %v4692_v22 = vld [vmem:[#allocation7 + $0x178] sm:$0xff] }
 0x716   :  { %2742 = vtanh.f32 %v4682_v28 }
 0x71c   :  { %v2743_v19 = vpop.eup %2742 }
 0x71d   :  { %v4685_v5 = vmul.f32 %v2743_v19, %v1498_v0  ;;  %v5644_v19 = vld [vmem:[#allocation30_spill] sm:$0xff]  ;;  %v5650_v0 = vld [vmem:[#allocation39_spill] sm:$0xff] }
 0x71f   :  { %1525 = vmatmul.f32.vlgmr.msrb.gmra.mxu3 %v4685_v5  ;;  %1565 = vmatmul.f32.vlgmr.msrb.gmra.mxu2 %v4685_v5 }
 0x720   :  { %1828 = vmatpush.msrb.mxu3 %v4689_v42  ;;  %1868 = vmatpush.msrb.mxu2 %v4692_v22 }
 0x722   :  { %1829 = vmatpush.msrb.mxu3 %v4695_v43  ;;  %1869 = vmatpush.msrb.mxu2 %v4698_v45 }
 0x724   :  { %1830 = vmatpush.msrb.mxu3 %v4701_v52  ;;  %1870 = vmatpush.msrb.mxu2 %v4704_v27 }
 0x726   :  { %1831 = vmatpush.msrb.mxu3 %v4707_v10  ;;  %1871 = vmatpush.msrb.mxu2 %v4710_v7 }
 0x727   :  { %1686 = vmatmul.f32.vlgmr.msra.gmra.mxu3 %v4685_v5  ;;  %1726 = vmatmul.f32.vlgmr.msra.gmra.mxu2 %v4685_v5 }
 0x728   :  { %1832 = vmatpush.msrb.mxu3 %v4715_v47  ;;  %1872 = vmatpush.msrb.mxu2 %v4718_v58 }
 0x72a   :  { %1833 = vmatpush.msrb.mxu3 %v4721_v14  ;;  %1873 = vmatpush.msrb.mxu2 %v4724_v20 }
 0x72c   :  { %1834 = vmatpush.msrb.mxu3 %v4727_v34  ;;  %1874 = vmatpush.msrb.mxu2 %v4730_v62 }
 0x72e   :  { %1835 = vmatpush.msrb.mxu3 %v4733_v31  ;;  %1875 = vmatpush.msrb.mxu2 %v4736_v36 }
 0x730   :  { %1941 = vmatpush.msra.mxu3 %v4397_v9  ;;  %1981 = vmatpush.msra.mxu2 %v4400_v23  ;;  %v2585_v9 = vmul.f32 -1.442695, %v4675_v48 }
 0x732   :  { %1942 = vmatpush.msra.mxu3 %v4403_v46  ;;  %1982 = vmatpush.msra.mxu2 %v4406_v49  ;;  %2744 = vpow2.f32 %v2585_v9  ;;  %v5639_v49 = vld [vmem:[#allocation20_spill] sm:$0xff]  ;;  %v5651_v9 = vld [vmem:[#allocation42_spill] sm:$0xff] }
 0x734   :  { %1943 = vmatpush.msra.mxu3 %v4409_v63  ;;  %1983 = vmatpush.msra.mxu2 %v4412_v33  ;;  %v5640_v63 = vld [vmem:[#allocation25_spill] sm:$0xff] }
 0x736   :  { %1944 = vmatpush.msra.mxu3 %v4415_v6  ;;  %1984 = vmatpush.msra.mxu2 %v4418_v55 }
 0x738   :  { %1945 = vmatpush.msra.mxu3 %v4421_v57  ;;  %1985 = vmatpush.msra.mxu2 %v4424_v53  ;;  %v2745_v23 = vpop.eup %2744 }
 0x739   :  { %v1304_v46 = vadd.f32 1.0, %v2745_v23  ;;  %v5652_v23 = vld [vmem:[#allocation45_spill] sm:$0xff] }
 0x73a   :  { %1946 = vmatpush.msra.mxu3 %v4427_v54  ;;  %1986 = vmatpush.msra.mxu2 %v4430_v40 }
 0x73b   :  { %2746 = vrcp.f32 %v1304_v46  ;;  %v1317_v54 = vand.u32 2147483648, %v1304_v46  ;;  %vm1311_vm9 = vweird.f32 %v1304_v46  ;;  %v1315_v40 = vand.u32 2147483647, %v1304_v46 }
 0x73c   :  { %1947 = vmatpush.msra.mxu3 %v4434_v12  ;;  %1987 = vmatpush.msra.mxu2 %v4437_v2 }
 0x73d   :  { %v1318_v2 = vor.u32 1.1754944e-38, %v1317_v54  ;;  %vm1316_vm11 = vcmp.eq.f32.partialorder %v1315_v40, 8.507059e+37  ;;  %v4821_v54 = vld [vmem:[#allocation7 + $0x20] sm:$0xff]  ;;  %v4824_v40 = vld [vmem:[#allocation7 + $0x28] sm:$0xff] }
 0x73e   :  { %1948 = vmatpush.msra.mxu3 %v4440_v21  ;;  %1988 = vmatpush.msra.mxu2 %v4443_v59 }
 0x740   :  { %1949 = vmatpush.msra.mxu3 %v4446_v35  ;;  %1989 = vmatpush.msra.mxu2 %v4449_v29 }
 0x741   :  { %v2747_v33 = vpop.eup %2746 }
 0x742   :  { %1950 = vmatpush.msra.mxu3 %v4452_v1  ;;  %1990 = vmatpush.msra.mxu2 %v4455_v17  ;;  %v1307_v6 = vmul.f32 %v2747_v33, %v1304_v46  ;;  %vm1312_vm8 = vweird.f32 %v2747_v33  ;;  %v5653_v46 = vld [vmem:[#allocation48_spill] sm:$0xff] }
 0x743   :  { %vm1313_vm10 = vmor %vm1311_vm9, %vm1312_vm8 }
 0x744   :  { %1951 = vmatpush.msra.mxu3 %v4458_v3  ;;  %1991 = vmatpush.msra.mxu2 %v4461_v8  ;;  %v1308_v55 = vsub.f32 1.0, %v1307_v6  ;;  %v2586_v8 = vmul.f32 -1.442695, %v4677_v18  ;;  %v4809_v6 = vld [vmem:[#allocation7 + $0x40] sm:$0xff] }
 0x746   :  { %1952 = vmatpush.msra.mxu3 %v4464_v26  ;;  %1992 = vmatpush.msra.mxu2 %v4467_v37  ;;  %v1309_v57 = vmul.f32 %v2747_v33, %v1308_v55  ;;  %v4812_v55 = vld [vmem:[#allocation7 + $0x48] sm:$0xff] }
 0x748   :  { %1953 = vmatpush.msra.mxu3 %v4470_v30  ;;  %1993 = vmatpush.msra.mxu2 %v4473_v16  ;;  %v1310_v53 = vadd.f32 %v2747_v33, %v1309_v57  ;;  %v4815_v57 = vld [vmem:[#allocation7 + $0x30] sm:$0xff] }
 0x74a   :  { %1954 = vmatpush.msra.mxu3 %v4476_v61  ;;  %1994 = vmatpush.msra.mxu2 %v4479_v51  ;;  %v1314_v12 = vsel %vm1313_vm10, %v2747_v33, %v1310_v53  ;;  %v4806_v33 = vld [vmem:[#allocation7 + $0x58] sm:$0xff] }
 0x74b   :  { %v1319_v59 = vsel %vm1316_vm11, %v1318_v2, %v1314_v12  ;;  %v4818_v53 = vld [vmem:[#allocation7 + $0x38] sm:$0xff]  ;;  %v4827_v12 = vld [vmem:[#allocation7 + $0x10] sm:$0xff] }
 0x74c   :  { %1955 = vmatpush.msra.mxu3 %v4482_v25  ;;  %1995 = vmatpush.msra.mxu2 %v4485_v50  ;;  %v1337_v29 = vmul.f32 %v1319_v59, %v4496_v11  ;;  %v4830_v2 = vld [vmem:[#allocation7 + $0x18] sm:$0xff] }
 0x74e   :  { %1956 = vmatpush.msra.mxu3 %v5639_v49  ;;  %1996 = vmatpush.msra.mxu2 %v5640_v63  ;;  %v5655_v49 = vld [vmem:[#allocation53_spill] sm:$0xff]  ;;  %v4803_v63 = vld [vmem:[#allocation7 + $0x50] sm:$0xff] }
 0x767   :  { %v1340_v21 = vpop.permute.xlu0 %1339 }
 0x768   :  { %v1342_v35 = vmul.f32 %v1340_v21, %v1319_v59  ;;  %v4833_v21 = vld [vmem:[#allocation7] sm:$0xff]  ;;  %v4836_v59 = vld [vmem:[#allocation7 + $0x8] sm:$0xff] }
 0x76a   :  { %1344 = vrot.lane.b32.xlu1 %v1342_v35, %s3258_s3  ;;  %v5656_v35 = vld [vmem:[#allocation57_spill] sm:$0xff] }
 0x7dc   :  { %v1345_v1 = vpop.permute.xlu1 %1344 }
 0x7dd   :  { %v4774_v17 = vadd.f32 %v1345_v1, %v1337_v29  ;;  %v5657_v29 = vld [vmem:[#allocation61_spill] sm:$0xff] }
 0x7de   :  { %v5658_v1 = vld [vmem:[#allocation65_spill] sm:$0xff] }
 0x7df   :  { %2748 = vtanh.f32 %v4774_v17 }
 0x7e0   :  { %2750 = vpow2.f32 %v2586_v8  ;;  %v5660_v8 = vld [vmem:[#allocation73_spill] sm:$0xff] }
 0x7e5   :  { %v2749_v3 = vpop.eup %2748 }
 0x7e6   :  { %1350 = vrot.lane.b32.xlu2 %v2749_v3, %s3258_s3  ;;  %v2751_v26 = vpop.eup %2750  ;;  %v5659_v3 = vld [vmem:[#allocation69_spill] sm:$0xff] }
 0x7e7   :  { %v1305_v37 = vadd.f32 1.0, %v2751_v26  ;;  %v5661_v26 = vld [vmem:[#allocation40_spill] sm:$0xff] }
 0x7e9   :  { %2752 = vrcp.f32 %v1305_v37  ;;  %v1332_v50 = vand.u32 2147483648, %v1305_v37  ;;  %vm1326_vm13 = vweird.f32 %v1305_v37  ;;  %v1330_v11 = vand.u32 2147483647, %v1305_v37 }
 0x7eb   :  { %v1333_v32 = vor.u32 1.1754944e-38, %v1332_v50  ;;  %vm1331_vm15 = vcmp.eq.f32.partialorder %v1330_v11, 8.507059e+37  ;;  %v5668_v50 = vld [vmem:[#allocation64_spill] sm:$0xff] }
 0x7ec   :  { %v5669_v11 = vld [vmem:[#allocation68_spill] sm:$0xff] }
 0x7ef   :  { %v2753_v30 = vpop.eup %2752 }
 0x7f0   :  { %v1322_v16 = vmul.f32 %v2753_v30, %v1305_v37  ;;  %vm1327_vm12 = vweird.f32 %v2753_v30  ;;  %v5662_v37 = vld [vmem:[#allocation43_spill] sm:$0xff] }
 0x7f1   :  { %vm1328_vm14 = vmor %vm1326_vm13, %vm1327_vm12 }
 0x7f2   :  { %v1323_v61 = vsub.f32 1.0, %v1322_v16  ;;  %v5664_v16 = vld [vmem:[#allocation49_spill] sm:$0xff] }
 0x7f4   :  { %v1324_v51 = vmul.f32 %v2753_v30, %v1323_v61  ;;  %v5665_v61 = vld [vmem:[#allocation52_spill] sm:$0xff] }
 0x7f6   :  { %v1325_v25 = vadd.f32 %v2753_v30, %v1324_v51  ;;  %v5666_v51 = vld [vmem:[#allocation56_spill] sm:$0xff] }
 0x7f8   :  { %v1329_v48 = vsel %vm1328_vm14, %v2753_v30, %v1325_v25  ;;  %v5663_v30 = vld [vmem:[#allocation46_spill] sm:$0xff]  ;;  %v5667_v25 = vld [vmem:[#allocation60_spill] sm:$0xff] }
 0x7f9   :  { %v1334_v24 = vsel %vm1331_vm15, %v1333_v32, %v1329_v48  ;;  %v5670_v48 = vld [vmem:[#allocation72_spill] sm:$0xff] }
 0x7fa   :  { %v5671_v32 = vld [vmem:[#allocation76_spill] sm:$0xff] }
 0x840   :  { %v1351_v44 = vpop.permute.xlu2 %1350 }
 0x841   :  { %v1353_v18 = vmul.f32 %v1351_v44, %v1334_v24  ;;  %v5672_v24 = vld [vmem:[#allocation37_spill] sm:$0xff]  ;;  %v5673_v44 = vld [vmem:[#allocation51_spill] sm:$0xff] }
 0x843   :  { %2590 = vmatmul.msk.f32.vlgmr.msrb.gmra.mxu1 %vm341_vm0, %v1353_v18  ;;  %2591 = vmatmul.msk.f32.vlgmr.msrb.gmra.mxu0 %vm341_vm0, %v1353_v18  ;;  %v5674_v18 = vld [vmem:[#allocation41_spill] sm:$0xff] }
 0x844   :  { %1800 = vmatpush.msrb.mxu1 %v4503_v15  ;;  %1840 = vmatpush.msrb.mxu0 %v4506_v41  ;;  %v5645_v15 = vld [vmem:[#allocation26_spill] sm:$0xff] }
 0x845   :  { %v5646_v41 = vld [vmem:[#allocation34_spill] sm:$0xff] }
 0x846   :  { %1801 = vmatpush.msrb.mxu1 %v4509_v39  ;;  %1841 = vmatpush.msrb.mxu0 %v4512_v38  ;;  %v5647_v39 = vld [vmem:[#allocation28_spill] sm:$0xff]  ;;  %v5648_v38 = vld [vmem:[#allocation31_spill] sm:$0xff] }
 0x848   :  { %1802 = vmatpush.msrb.mxu1 %v4515_v56  ;;  %1842 = vmatpush.msrb.mxu0 %v5641_v4  ;;  %v5649_v56 = vld [vmem:[#allocation35_spill] sm:$0xff] }
 0x849   :  { %v5675_v4 = vld [vmem:[#allocation55_spill] sm:$0xff] }
 0x84a   :  { %1803 = vmatpush.msrb.mxu1 %v5642_v60  ;;  %1843 = vmatpush.msrb.mxu0 %v5643_v13  ;;  %v5676_v60 = vld [vmem:[#allocation44_spill] sm:$0xff]  ;;  %v5677_v13 = vld [vmem:[#allocation10_spill] sm:$0xff] }
 0x84b   :  { %1666 = vmatmul.f32.vlgmr.msra.gmra.mxu1 %v4685_v5  ;;  %1706 = vmatmul.f32.vlgmr.msra.gmra.mxu0 %v4685_v5  ;;  %v5654_v5 = vld [vmem:[#allocation38_spill] sm:$0xff] }
 0x84c   :  { %1804 = vmatpush.msrb.mxu1 %v5644_v19  ;;  %1844 = vmatpush.msrb.mxu0 %v5645_v15  ;;  %v5678_v19 = vld [vmem:[#allocation59_spill] sm:$0xff] }
 0x84d   :  { %v5679_v15 = vld [vmem:[#allocation47_spill] sm:$0xff] }
 0x84e   :  { %1805 = vmatpush.msrb.mxu1 %v5646_v41  ;;  %1845 = vmatpush.msrb.mxu0 %v5647_v39  ;;  %v5680_v41 = vld [vmem:[#allocation63_spill] sm:$0xff]  ;;  %v5681_v39 = vld [vmem:[#allocation50_spill] sm:$0xff] }
 0x850   :  { %1846 = vmatpush.msrb.mxu0 %v5648_v38  ;;  %1806 = vmatpush.msrb.mxu1 %v5649_v56  ;;  %v5682_v38 = vld [vmem:[#allocation67_spill] sm:$0xff]  ;;  %v5683_v56 = vld [vmem:[#allocation54_spill] sm:$0xff] }
 0x852   :  { %1807 = vmatpush.msrb.mxu1 %v5650_v0  ;;  %1847 = vmatpush.msrb.mxu0 %v5651_v9  ;;  %v5684_v0 = vld [vmem:[#allocation71_spill] sm:$0xff]  ;;  %v5685_v9 = vld [vmem:[#allocation58_spill] sm:$0xff] }
 0x854   :  { %1808 = vmatpush.msrb.mxu1 %v5652_v23  ;;  %1848 = vmatpush.msrb.mxu0 %v5653_v46  ;;  %v5686_v23 = vld [vmem:[#allocation75_spill] sm:$0xff]  ;;  %v5687_v46 = vld [vmem:[#allocation62_spill] sm:$0xff] }
 0x856   :  { %1809 = vmatpush.msrb.mxu1 %v5654_v5  ;;  %1849 = vmatpush.msrb.mxu0 %v5655_v49  ;;  %v1526_v5 = vpop.f32.mrf.mxu3  ;;  %v1647_v49 = vld [vmem:[#allocation3 + $0xa8] sm:$0xff] }
 0x858   :  { %1810 = vmatpush.msrb.mxu1 %v4803_v63  ;;  %1850 = vmatpush.msrb.mxu0 %v4806_v33 }
 0x85a   :  { %1811 = vmatpush.msrb.mxu1 %v4809_v6  ;;  %1851 = vmatpush.msrb.mxu0 %v4812_v55 }
 0x85c   :  { %1812 = vmatpush.msrb.mxu1 %v4815_v57  ;;  %1852 = vmatpush.msrb.mxu0 %v4818_v53 }
 0x85e   :  { %1813 = vmatpush.msrb.mxu1 %v4821_v54  ;;  %1853 = vmatpush.msrb.mxu0 %v4824_v40 }
 0x860   :  { %1814 = vmatpush.msrb.mxu1 %v4827_v12  ;;  %1854 = vmatpush.msrb.mxu0 %v4830_v2 }
 0x862   :  { %1815 = vmatpush.msrb.mxu1 %v4833_v21  ;;  %1855 = vmatpush.msrb.mxu0 %v4836_v59 }
 0x864   :  { %1961 = vmatpush.msra.mxu1 %v5656_v35  ;;  %2001 = vmatpush.msra.mxu0 %v5657_v29  ;;  %v1687_v35 = vpop.f32.mrf.mxu3 }
 0x865   :  { %v1731_v29 = vadd.f32 %v1687_v35, %v1647_v49 }
 0x866   :  { %1962 = vmatpush.msra.mxu1 %v5658_v1  ;;  %2002 = vmatpush.msra.mxu0 %v5659_v3  ;;  %v1566_v3 = vpop.f32.mrf.mxu2 }
 0x867   :  { %v2595_v1 = vmul.f32 -1.442695, %v1731_v29 }
 0x868   :  { %1963 = vmatpush.msra.mxu1 %v5660_v8  ;;  %2003 = vmatpush.msra.mxu0 %v5661_v26  ;;  %v5688_v8 = vld [vmem:[#allocation33_spill] sm:$0xff] }
 0x869   :  { %2754 = vpow2.f32 %v2595_v1  ;;  %v1527_v26 = vadd.f32 %v1526_v5, %v5688_v8 }
 0x86a   :  { %1964 = vmatpush.msra.mxu1 %v5662_v37  ;;  %2004 = vmatpush.msra.mxu0 %v5663_v30  ;;  %v5689_v37 = vld [vmem:[#allocation36_spill] sm:$0xff] }
 0x86b   :  { %v1567_v30 = vadd.f32 %v1566_v3, %v5689_v37 }
 0x86c   :  { %1965 = vmatpush.msra.mxu1 %v5664_v16  ;;  %2005 = vmatpush.msra.mxu0 %v5665_v61 }
 0x86e   :  { %1966 = vmatpush.msra.mxu1 %v5666_v51  ;;  %2006 = vmatpush.msra.mxu0 %v5667_v25  ;;  %v1727_v5 = vpop.f32.mrf.mxu2 }
 0x86f   :  { %v2755_v51 = vpop.eup %2754 }
 0x870   :  { %1967 = vmatpush.msra.mxu1 %v5668_v50  ;;  %2007 = vmatpush.msra.mxu0 %v5669_v11  ;;  %v1744_v11 = vadd.f32 1.0, %v2755_v51 }
 0x872   :  { %1968 = vmatpush.msra.mxu1 %v5670_v48  ;;  %2008 = vmatpush.msra.mxu0 %v5671_v32  ;;  %v1646_v48 = vld [vmem:[#allocation3 + $0xa0] sm:$0xff]  ;;  %v1648_v32 = vld [vmem:[#allocation3 + $0xb0] sm:$0xff]  ;;  %v1772_v3 = vand.u32 2147483648, %v1744_v11  ;;  %vm1766_vm2 = vweird.f32 %v1744_v11 }
 0x874   :  { %1969 = vmatpush.msra.mxu1 %v5672_v24  ;;  %2009 = vmatpush.msra.mxu0 %v5673_v44 }
 0x876   :  { %1970 = vmatpush.msra.mxu1 %v5674_v18  ;;  %2010 = vmatpush.msra.mxu0 %v5675_v4 }
 0x878   :  { %1971 = vmatpush.msra.mxu1 %v5676_v60  ;;  %2011 = vmatpush.msra.mxu0 %v5677_v13 }
 0x87a   :  { %1972 = vmatpush.msra.mxu1 %v5678_v19  ;;  %2012 = vmatpush.msra.mxu0 %v5679_v15 }
 0x87c   :  { %1973 = vmatpush.msra.mxu1 %v5680_v41  ;;  %2013 = vmatpush.msra.mxu0 %v5681_v39 }
 0x87e   :  { %1974 = vmatpush.msra.mxu1 %v5682_v38  ;;  %2014 = vmatpush.msra.mxu0 %v5683_v56 }
 0x880   :  { %1975 = vmatpush.msra.mxu1 %v5684_v0  ;;  %2015 = vmatpush.msra.mxu0 %v5685_v9 }
 0x882   :  { %1976 = vmatpush.msra.mxu1 %v5686_v23  ;;  %2016 = vmatpush.msra.mxu0 %v5687_v46  ;;  %v1649_v46 = vld [vmem:[#allocation3 + $0xb8] sm:$0xff] }
 0x883   :  { %v1733_v35 = vadd.f32 %v1727_v5, %v1649_v46 }
 0x8c0   :  { %v1546_v16 = vpop.f32.mrf.mxu1  ;;  %v1586_v61 = vpop.f32.mrf.mxu0 }
 0x8c1   :  { %v4873_v25 = vadd.f32 %v1546_v16, %v1527_v26  ;;  %v4875_v50 = vadd.f32 %v1586_v61, %v1567_v30  ;;  %v1770_v30 = vand.u32 2147483647, %v1744_v11 }
 0x8c3   :  { %2756 = vtanh.f32 %v4875_v50  ;;  %vm1771_vm5 = vcmp.eq.f32.partialorder %v1770_v30, 8.507059e+37  ;;  %v3093_v30 = vld [vmem:[#allocation5 + $0xd0] sm:$0xff] }
 0x8c4   :  { %2758 = vrcp.f32 %v1744_v11 }
 0x8c8   :  { %v1667_v24 = vpop.f32.mrf.mxu1  ;;  %v1707_v44 = vpop.f32.mrf.mxu0 }
 0x8c9   :  { %v2757_v18 = vpop.eup %2756  ;;  %v1730_v4 = vadd.f32 %v1667_v24, %v1646_v48  ;;  %v1732_v60 = vadd.f32 %v1707_v44, %v1648_v32  ;;  %v1773_v44 = vor.u32 1.1754944e-38, %v1772_v3  ;;  %v3091_v3 = vld [vmem:[#allocation5 + $0xf0] sm:$0xff] }
 0x8ca   :  { %1630 = vrot.lane.b32.xlu0 %v2757_v18, %s3258_s3  ;;  %v2759_v15 = vpop.eup %2758 }
 0x8cb   :  { %v2594_v13 = vmul.f32 -1.442695, %v1730_v4  ;;  %v2596_v19 = vmul.f32 -1.442695, %v1732_v60  ;;  %v1762_v41 = vmul.f32 %v2759_v15, %v1744_v11  ;;  %vm1767_vm1 = vweird.f32 %v2759_v15 }
 0x8cc   :  { %vm1768_vm3 = vmor %vm1766_vm2, %vm1767_vm1 }
 0x8cd   :  { %2760 = vpow2.f32 %v2594_v13  ;;  %v1763_v56 = vsub.f32 1.0, %v1762_v41 }
 0x8ce   :  { %2762 = vpow2.f32 %v2596_v19 }
 0x8cf   :  { %v1764_v23 = vmul.f32 %v2759_v15, %v1763_v56 }
 0x8d1   :  { %v1765_v29 = vadd.f32 %v2759_v15, %v1764_v23 }
 0x8d3   :  { %v2761_v39 = vpop.eup %2760  ;;  %v1769_v48 = vsel %vm1768_vm3, %v2759_v15, %v1765_v29 }
 0x8d4   :  { %v1743_v38 = vadd.f32 1.0, %v2761_v39  ;;  %v2763_v0 = vpop.eup %2762  ;;  %v1774_v60 = vsel %vm1771_vm5, %v1773_v44, %v1769_v48  ;;  %v3097_v48 = vld [vmem:[#allocation5 + $0x90] sm:$0xff] }
 0x8d5   :  { %v1745_v9 = vadd.f32 1.0, %v2763_v0  ;;  %v1792_v56 = vmul.f32 %v1774_v60, %v4682_v28  ;;  %v3074_v28 = vld [vmem:[#allocation5 + $0x1e0] sm:$0xff]  ;;  %v3099_v44 = vld [vmem:[#allocation5 + $0x70] sm:$0xff] }
 0x8d6   :  { %2764 = vrcp.f32 %v1743_v38  ;;  %v1757_v61 = vand.u32 2147483648, %v1743_v38  ;;  %v1755_v24 = vand.u32 2147483647, %v1743_v38  ;;  %vm1751_vm6 = vweird.f32 %v1743_v38  ;;  %v3102_v60 = vld [vmem:[#allocation5 + $0x20] sm:$0xff] }
 0x8d7   :  { %2766 = vrcp.f32 %v1745_v9  ;;  %v1787_v46 = vand.u32 2147483648, %v1745_v9  ;;  %vm1781_vm10 = vweird.f32 %v1745_v9 }
 0x8d8   :  { %2768 = vtanh.f32 %v1733_v35  ;;  %v1758_v13 = vor.u32 1.1754944e-38, %v1757_v61  ;;  %vm1756_vm8 = vcmp.eq.f32.partialorder %v1755_v24, 8.507059e+37  ;;  %v3098_v24 = vld [vmem:[#allocation5 + $0x60] sm:$0xff] }
 0x8d9   :  { %v1788_v35 = vor.u32 1.1754944e-38, %v1787_v46 }
 0x8dc   :  { %v2765_v49 = vpop.eup %2764 }
 0x8dd   :  { %v1747_v1 = vmul.f32 %v2765_v49, %v1743_v38  ;;  %v2767_v26 = vpop.eup %2766  ;;  %vm1752_vm4 = vweird.f32 %v2765_v49  ;;  %v1785_v38 = vand.u32 2147483647, %v1745_v9 }
 0x8de   :  { %v1777_v51 = vmul.f32 %v2767_v26, %v1745_v9  ;;  %vm1753_vm7 = vmor %vm1751_vm6, %vm1752_vm4  ;;  %v2769_v11 = vpop.eup %2768  ;;  %vm1782_vm9 = vweird.f32 %v2767_v26  ;;  %v3090_v9 = vld [vmem:[#allocation5 + $0xe0] sm:$0xff] }
 0x8df   :  { %v1748_v16 = vsub.f32 1.0, %v1747_v1  ;;  %vm1783_vm11 = vmor %vm1781_vm10, %vm1782_vm9  ;;  %vm1786_vm12 = vcmp.eq.f32.partialorder %v1785_v38, 8.507059e+37 }
 0x8e0   :  { %v1778_v18 = vsub.f32 1.0, %v1777_v51  ;;  %v3096_v51 = vld [vmem:[#allocation5 + $0x80] sm:$0xff] }
 0x8e1   :  { %v1749_v32 = vmul.f32 %v2765_v49, %v1748_v16  ;;  %v3094_v16 = vld [vmem:[#allocation5 + $0xa0] sm:$0xff] }
 0x8e2   :  { %v1779_v39 = vmul.f32 %v2767_v26, %v1778_v18  ;;  %v3100_v18 = vld [vmem:[#allocation5 + $0x40] sm:$0xff] }
 0x8e3   :  { %v1750_v4 = vadd.f32 %v2765_v49, %v1749_v32 }
 0x8e4   :  { %v1780_v23 = vadd.f32 %v2767_v26, %v1779_v39 }
 0x8e5   :  { %v1754_v19 = vsel %vm1753_vm7, %v2765_v49, %v1750_v4  ;;  %v3101_v4 = vld [vmem:[#allocation5 + $0x50] sm:$0xff] }
 0x8e6   :  { %v1759_v41 = vsel %vm1756_vm8, %v1758_v13, %v1754_v19  ;;  %v1784_v5 = vsel %vm1783_vm11, %v2767_v26, %v1780_v23  ;;  %v3092_v26 = vld [vmem:[#allocation5 + $0xc0] sm:$0xff]  ;;  %v3103_v13 = vld [vmem:[#allocation5 + $0x30] sm:$0xff] }
 0x8e7   :  { %v1793_v0 = vmul.f32 %v2769_v11, %v1759_v41  ;;  %v1789_v29 = vsel %vm1786_vm12, %v1788_v35, %v1784_v5  ;;  %v3104_v19 = vld [vmem:[#allocation5] sm:$0xff]  ;;  %v3105_v11 = vld [vmem:[#allocation5 + $0x10] sm:$0xff] }
 0x8e9   :  { %v4880_v15 = vadd.f32 %v1793_v0, %v1792_v56 }
 0x8eb   :  { %2770 = vtanh.f32 %v4880_v15 }
 0x8f1   :  { %v2771_v49 = vpop.eup %2770 }
 0x8f2   :  { %v4883_v1 = vmul.f32 %v2771_v49, %v1789_v29 }
 0x8f4   :  { %1816 = vmatmul.f32.vlgmr.msrb.gmra.mxu1 %v4883_v1  ;;  %1856 = vmatmul.f32.vlgmr.msrb.gmra.mxu0 %v4883_v1 }
 0x8f5   :  { %2119 = vmatpush.msrb.mxu1 %v4689_v42  ;;  %2159 = vmatpush.msrb.mxu0 %v4692_v22  ;;  %v3075_v42 = vld [vmem:[#allocation5 + $0x1f0] sm:$0xff]  ;;  %v3076_v22 = vld [vmem:[#allocation5 + $0x1c0] sm:$0xff] }
 0x8f7   :  { %2120 = vmatpush.msrb.mxu1 %v4695_v43  ;;  %2160 = vmatpush.msrb.mxu0 %v4698_v45  ;;  %v3077_v43 = vld [vmem:[#allocation5 + $0x1d0] sm:$0xff]  ;;  %v3078_v45 = vld [vmem:[#allocation5 + $0x1a0] sm:$0xff] }
 0x8f9   :  { %2121 = vmatpush.msrb.mxu1 %v4701_v52  ;;  %2161 = vmatpush.msrb.mxu0 %v4704_v27  ;;  %v3079_v52 = vld [vmem:[#allocation5 + $0x1b0] sm:$0xff]  ;;  %v3080_v27 = vld [vmem:[#allocation5 + $0x180] sm:$0xff] }
 0x8fb   :  { %2122 = vmatpush.msrb.mxu1 %v4707_v10  ;;  %2162 = vmatpush.msrb.mxu0 %v4710_v7  ;;  %v3081_v10 = vld [vmem:[#allocation5 + $0x190] sm:$0xff]  ;;  %v3082_v7 = vld [vmem:[#allocation5 + $0x160] sm:$0xff] }
 0x8fc   :  { %1977 = vmatmul.f32.vlgmr.msra.gmra.mxu1 %v4883_v1  ;;  %2017 = vmatmul.f32.vlgmr.msra.gmra.mxu0 %v4883_v1 }
 0x8fd   :  { %2123 = vmatpush.msrb.mxu1 %v4715_v47  ;;  %2163 = vmatpush.msrb.mxu0 %v4718_v58  ;;  %v3083_v47 = vld [vmem:[#allocation5 + $0x170] sm:$0xff]  ;;  %v3084_v58 = vld [vmem:[#allocation5 + $0x140] sm:$0xff] }
 0x8ff   :  { %2124 = vmatpush.msrb.mxu1 %v4721_v14  ;;  %2164 = vmatpush.msrb.mxu0 %v4724_v20  ;;  %v3085_v14 = vld [vmem:[#allocation5 + $0x150] sm:$0xff]  ;;  %v2592_v20 = vmul.f32 -1.442695, %v4873_v25 }
 0x900   :  { %v3095_v25 = vld [vmem:[#allocation5 + $0xb0] sm:$0xff] }
 0x901   :  { %2125 = vmatpush.msrb.mxu1 %v4727_v34  ;;  %2165 = vmatpush.msrb.mxu0 %v4730_v62  ;;  %v3086_v34 = vld [vmem:[#allocation5 + $0x120] sm:$0xff]  ;;  %v3087_v62 = vld [vmem:[#allocation5 + $0x130] sm:$0xff]  ;;  %2772 = vpow2.f32 %v2592_v20 }
 0x903   :  { %2126 = vmatpush.msrb.mxu1 %v4733_v31  ;;  %2166 = vmatpush.msrb.mxu0 %v4736_v36  ;;  %v3088_v31 = vld [vmem:[#allocation5 + $0x100] sm:$0xff]  ;;  %v3089_v36 = vld [vmem:[#allocation5 + $0x110] sm:$0xff] }
 0x905   :  { %2232 = vmatpush.msra.mxu1 %v3074_v28  ;;  %2272 = vmatpush.msra.mxu0 %v3075_v42 }
 0x907   :  { %2233 = vmatpush.msra.mxu1 %v3076_v22  ;;  %2273 = vmatpush.msra.mxu0 %v3077_v43  ;;  %v2773_v61 = vpop.eup %2772 }
 0x908   :  { %v1595_v32 = vadd.f32 1.0, %v2773_v61  ;;  %v4930_v61 = vld [vmem:[#allocation7 + $0xd8] sm:$0xff] }
 0x909   :  { %2234 = vmatpush.msra.mxu1 %v3078_v45  ;;  %2274 = vmatpush.msra.mxu0 %v3079_v52  ;;  %v2593_v52 = vmul.f32 -1.442695, %v4875_v50 }
 0x90a   :  { %2774 = vrcp.f32 %v1595_v32  ;;  %v1608_v46 = vand.u32 2147483648, %v1595_v32  ;;  %vm1602_vm14 = vweird.f32 %v1595_v32  ;;  %v1606_v38 = vand.u32 2147483647, %v1595_v32 }
 0x90b   :  { %2235 = vmatpush.msra.mxu1 %v3080_v27  ;;  %2275 = vmatpush.msra.mxu0 %v3081_v10 }
 0x90c   :  { %v1609_v35 = vor.u32 1.1754944e-38, %v1608_v46  ;;  %vm1607_vm1 = vcmp.eq.f32.partialorder %v1606_v38, 8.507059e+37  ;;  %v3129_v46 = vld [vmem:[#allocation5 + $0x1d8] sm:$0xff]  ;;  %v3130_v38 = vld [vmem:[#allocation5 + $0x1a8] sm:$0xff] }
 0x90d   :  { %2236 = vmatpush.msra.mxu1 %v3082_v7  ;;  %2276 = vmatpush.msra.mxu0 %v3083_v47 }
 0x90f   :  { %2237 = vmatpush.msra.mxu1 %v3084_v58  ;;  %2277 = vmatpush.msra.mxu0 %v3085_v14 }
 0x910   :  { %v2775_v41 = vpop.eup %2774 }
 0x911   :  { %2238 = vmatpush.msra.mxu1 %v3086_v34  ;;  %2278 = vmatpush.msra.mxu0 %v3087_v62  ;;  %v1598_v39 = vmul.f32 %v2775_v41, %v1595_v32  ;;  %vm1603_vm13 = vweird.f32 %v2775_v41  ;;  %v4941_v32 = vld [vmem:[#allocation7 + $0xb0] sm:$0xff] }
 0x912   :  { %vm1604_vm15 = vmor %vm1602_vm14, %vm1603_vm13 }
 0x913   :  { %2239 = vmatpush.msra.mxu1 %v3088_v31  ;;  %2279 = vmatpush.msra.mxu0 %v3089_v36  ;;  %v1599_v56 = vsub.f32 1.0, %v1598_v39  ;;  %v4974_v39 = vld [vmem:[#allocation7 + $0x68] sm:$0xff] }
 0x915   :  { %2240 = vmatpush.msra.mxu1 %v3090_v9  ;;  %2280 = vmatpush.msra.mxu0 %v3091_v3  ;;  %v1600_v0 = vmul.f32 %v2775_v41, %v1599_v56  ;;  %v4915_v3 = vld [vmem:[#allocation7 + $0xf0] sm:$0xff]  ;;  %v3126_v56 = vld [vmem:[#allocation5 + $0x1e8] sm:$0xff] }
 0x917   :  { %2241 = vmatpush.msra.mxu1 %v3092_v26  ;;  %2281 = vmatpush.msra.mxu0 %v3093_v30  ;;  %v1601_v23 = vadd.f32 %v2775_v41, %v1600_v0  ;;  %v4918_v26 = vld [vmem:[#allocation7 + $0xf8] sm:$0xff]  ;;  %v4921_v30 = vld [vmem:[#allocation7 + $0xe0] sm:$0xff] }
 0x918   :  { %v3127_v0 = vld [vmem:[#allocation5 + $0x1f8] sm:$0xff] }
 0x919   :  { %2242 = vmatpush.msra.mxu1 %v3094_v16  ;;  %2282 = vmatpush.msra.mxu0 %v3095_v25  ;;  %v1605_v5 = vsel %vm1604_vm15, %v2775_v41, %v1601_v23  ;;  %v4924_v16 = vld [vmem:[#allocation7 + $0xe8] sm:$0xff]  ;;  %v4927_v25 = vld [vmem:[#allocation7 + $0xd0] sm:$0xff]  ;;  %v4971_v41 = vld [vmem:[#allocation7 + $0x60] sm:$0xff] }
 0x91a   :  { %v1610_v29 = vsel %vm1607_vm1, %v1609_v35, %v1605_v5  ;;  %v3128_v23 = vld [vmem:[#allocation5 + $0x1c8] sm:$0xff]  ;;  %v3131_v5 = vld [vmem:[#allocation5 + $0x1b8] sm:$0xff] }
 0x91b   :  { %2243 = vmatpush.msra.mxu1 %v3096_v51  ;;  %2283 = vmatpush.msra.mxu0 %v3097_v48  ;;  %v1628_v42 = vmul.f32 %v1610_v29, %v4774_v17  ;;  %v4933_v51 = vld [vmem:[#allocation7 + $0xc0] sm:$0xff]  ;;  %v4936_v48 = vld [vmem:[#allocation7 + $0xc8] sm:$0xff] }
 0x91c   :  { %v3132_v35 = vld [vmem:[#allocation5 + $0x188] sm:$0xff] }
 0x91d   :  { %2244 = vmatpush.msra.mxu1 %v3098_v24  ;;  %2284 = vmatpush.msra.mxu0 %v3099_v44  ;;  %v4944_v24 = vld [vmem:[#allocation7 + $0xb8] sm:$0xff]  ;;  %v4947_v44 = vld [vmem:[#allocation7 + $0xa0] sm:$0xff] }
 0x91f   :  { %2245 = vmatpush.msra.mxu1 %v3100_v18  ;;  %2285 = vmatpush.msra.mxu0 %v3101_v4  ;;  %v4950_v18 = vld [vmem:[#allocation7 + $0xa8] sm:$0xff]  ;;  %v4953_v4 = vld [vmem:[#allocation7 + $0x98] sm:$0xff] }
 0x921   :  { %2246 = vmatpush.msra.mxu1 %v3102_v60  ;;  %2286 = vmatpush.msra.mxu0 %v3103_v13  ;;  %v4959_v60 = vld [vmem:[#allocation7 + $0x80] sm:$0xff]  ;;  %v4962_v13 = vld [vmem:[#allocation7 + $0x88] sm:$0xff] }
 0x923   :  { %2247 = vmatpush.msra.mxu1 %v3104_v19  ;;  %2287 = vmatpush.msra.mxu0 %v3105_v11  ;;  %v4965_v19 = vld [vmem:[#allocation7 + $0x70] sm:$0xff]  ;;  %v4968_v11 = vld [vmem:[#allocation7 + $0x78] sm:$0xff] }
 0x93c   :  { %v1631_v49 = vpop.permute.xlu0 %1630 }
 0x93d   :  { %v1633_v28 = vmul.f32 %v1631_v49, %v1610_v29  ;;  %v3133_v49 = vld [vmem:[#allocation5 + $0x198] sm:$0xff]  ;;  %v3134_v29 = vld [vmem:[#allocation5 + $0x168] sm:$0xff] }
 0x93f   :  { %1635 = vrot.lane.b32.xlu1 %v1633_v28, %s3258_s3  ;;  %v3135_v28 = vld [vmem:[#allocation5 + $0x178] sm:$0xff] }
 0x9b1   :  { %v1636_v22 = vpop.permute.xlu1 %1635 }
 0x9b2   :  { %v4908_v43 = vadd.f32 %v1636_v22, %v1628_v42  ;;  %v3136_v42 = vld [vmem:[#allocation5 + $0x148] sm:$0xff]  ;;  %v3137_v22 = vld [vmem:[#allocation5 + $0x158] sm:$0xff] }
 0x9b4   :  { %2776 = vtanh.f32 %v4908_v43 }
 0x9b5   :  { %2778 = vpow2.f32 %v2593_v52  ;;  %v3139_v52 = vld [vmem:[#allocation5 + $0x138] sm:$0xff] }
 0x9ba   :  { %v2777_v45 = vpop.eup %2776 }
 0x9bb   :  { %1641 = vrot.lane.b32.xlu2 %v2777_v45, %s3258_s3  ;;  %v2779_v27 = vpop.eup %2778  ;;  %v3138_v45 = vld [vmem:[#allocation5 + $0x128] sm:$0xff] }
 0x9bc   :  { %v1596_v10 = vadd.f32 1.0, %v2779_v27  ;;  %v3140_v27 = vld [vmem:[#allocation5 + $0x108] sm:$0xff] }
 0x9be   :  { %2780 = vrcp.f32 %v1596_v10  ;;  %v1623_v17 = vand.u32 2147483648, %v1596_v10  ;;  %vm1617_vm3 = vweird.f32 %v1596_v10  ;;  %v1621_v34 = vand.u32 2147483647, %v1596_v10 }
 0x9c0   :  { %v1624_v31 = vor.u32 1.1754944e-38, %v1623_v17  ;;  %vm1622_vm5 = vcmp.eq.f32.partialorder %v1621_v34, 8.507059e+37  ;;  %v3147_v17 = vld [vmem:[#allocation5 + $0xb8] sm:$0xff]  ;;  %v3148_v34 = vld [vmem:[#allocation5 + $0x88] sm:$0xff] }
 0x9c4   :  { %v2781_v7 = vpop.eup %2780 }
 0x9c5   :  { %v1613_v47 = vmul.f32 %v2781_v7, %v1596_v10  ;;  %vm1618_vm2 = vweird.f32 %v2781_v7  ;;  %v3141_v10 = vld [vmem:[#allocation5 + $0x118] sm:$0xff] }
 0x9c6   :  { %vm1619_vm4 = vmor %vm1617_vm3, %vm1618_vm2 }
 0x9c7   :  { %v1614_v58 = vsub.f32 1.0, %v1613_v47  ;;  %v3143_v47 = vld [vmem:[#allocation5 + $0xf8] sm:$0xff] }
 0x9c9   :  { %v1615_v14 = vmul.f32 %v2781_v7, %v1614_v58  ;;  %v3144_v58 = vld [vmem:[#allocation5 + $0xc8] sm:$0xff] }
 0x9cb   :  { %v1616_v20 = vadd.f32 %v2781_v7, %v1615_v14  ;;  %v3145_v14 = vld [vmem:[#allocation5 + $0xd8] sm:$0xff] }
 0x9cd   :  { %v1620_v62 = vsel %vm1619_vm4, %v2781_v7, %v1616_v20  ;;  %v3142_v7 = vld [vmem:[#allocation5 + $0xe8] sm:$0xff] }
 0x9ce   :  { %v1625_v36 = vsel %vm1622_vm5, %v1624_v31, %v1620_v62  ;;  %v3146_v20 = vld [vmem:[#allocation5 + $0xa8] sm:$0xff]  ;;  %v3149_v62 = vld [vmem:[#allocation5 + $0x98] sm:$0xff] }
 0x9cf   :  { %v3150_v31 = vld [vmem:[#allocation5 + $0x68] sm:$0xff] }
 0xa15   :  { %v1642_v9 = vpop.permute.xlu2 %1641 }
 0xa16   :  { %v1644_v50 = vmul.f32 %v1642_v9, %v1625_v36  ;;  %v3151_v36 = vld [vmem:[#allocation5 + $0x78] sm:$0xff]  ;;  %v3152_v9 = vld [vmem:[#allocation5 + $0x48] sm:$0xff] }
 0xa18   :  { %2597 = vmatmul.msk.f32.vlgmr.msrb.gmra.mxu3 %vm341_vm0, %v1644_v50  ;;  %2598 = vmatmul.msk.f32.vlgmr.msrb.gmra.mxu2 %vm341_vm0, %v1644_v50  ;;  %v3153_v50 = vld [vmem:[#allocation5 + $0x58] sm:$0xff] }
 0xa19   :  { %2091 = vmatpush.msrb.mxu3 %v4915_v3  ;;  %2131 = vmatpush.msrb.mxu2 %v4918_v26 }
 0xa1b   :  { %2092 = vmatpush.msrb.mxu3 %v4921_v30  ;;  %2132 = vmatpush.msrb.mxu2 %v4924_v16 }
 0xa1d   :  { %2093 = vmatpush.msrb.mxu3 %v4927_v25  ;;  %2133 = vmatpush.msrb.mxu2 %v4930_v61 }
 0xa1f   :  { %2094 = vmatpush.msrb.mxu3 %v4933_v51  ;;  %2134 = vmatpush.msrb.mxu2 %v4936_v48 }
 0xa20   :  { %1957 = vmatmul.f32.vlgmr.msra.gmra.mxu3 %v4883_v1  ;;  %1997 = vmatmul.f32.vlgmr.msra.gmra.mxu2 %v4883_v1  ;;  %v4956_v1 = vld [vmem:[#allocation7 + $0x90] sm:$0xff] }
 0xa21   :  { %2095 = vmatpush.msrb.mxu3 %v4941_v32  ;;  %2135 = vmatpush.msrb.mxu2 %v4944_v24 }
 0xa23   :  { %2096 = vmatpush.msrb.mxu3 %v4947_v44  ;;  %2136 = vmatpush.msrb.mxu2 %v4950_v18 }
 0xa25   :  { %2137 = vmatpush.msrb.mxu2 %v4953_v4  ;;  %2097 = vmatpush.msrb.mxu3 %v4956_v1 }
 0xa27   :  { %2098 = vmatpush.msrb.mxu3 %v4959_v60  ;;  %2138 = vmatpush.msrb.mxu2 %v4962_v13 }
 0xa29   :  { %2099 = vmatpush.msrb.mxu3 %v4965_v19  ;;  %2139 = vmatpush.msrb.mxu2 %v4968_v11 }
 0xa2b   :  { %2100 = vmatpush.msrb.mxu3 %v4971_v41  ;;  %2140 = vmatpush.msrb.mxu2 %v4974_v39 }
 0xa2d   :  { %2101 = vmatpush.msrb.mxu3 %v4803_v63  ;;  %2141 = vmatpush.msrb.mxu2 %v4806_v33 }
 0xa2f   :  { %2102 = vmatpush.msrb.mxu3 %v4809_v6  ;;  %2142 = vmatpush.msrb.mxu2 %v4812_v55 }
 0xa31   :  { %2103 = vmatpush.msrb.mxu3 %v4815_v57  ;;  %2143 = vmatpush.msrb.mxu2 %v4818_v53 }
 0xa33   :  { %2104 = vmatpush.msrb.mxu3 %v4821_v54  ;;  %2144 = vmatpush.msrb.mxu2 %v4824_v40 }
 0xa35   :  { %2105 = vmatpush.msrb.mxu3 %v4827_v12  ;;  %2145 = vmatpush.msrb.mxu2 %v4830_v2 }
 0xa37   :  { %2106 = vmatpush.msrb.mxu3 %v4833_v21  ;;  %2146 = vmatpush.msrb.mxu2 %v4836_v59 }
 0xa39   :  { %2252 = vmatpush.msra.mxu3 %v3126_v56  ;;  %2292 = vmatpush.msra.mxu2 %v3127_v0  ;;  %v3154_v56 = vld [vmem:[#allocation5 + $0x28] sm:$0xff]  ;;  %v3155_v0 = vld [vmem:[#allocation5 + $0x38] sm:$0xff] }
 0xa3b   :  { %2253 = vmatpush.msra.mxu3 %v3128_v23  ;;  %2293 = vmatpush.msra.mxu2 %v3129_v46  ;;  %v3156_v23 = vld [vmem:[#allocation5 + $0x8] sm:$0xff]  ;;  %v3157_v46 = vld [vmem:[#allocation5 + $0x18] sm:$0xff] }
 0xa3d   :  { %2254 = vmatpush.msra.mxu3 %v3130_v38  ;;  %2294 = vmatpush.msra.mxu2 %v3131_v5  ;;  %v1817_v38 = vpop.f32.mrf.mxu1  ;;  %v1938_v5 = vld [vmem:[#allocation3 + $0xc8] sm:$0xff] }
 0xa3f   :  { %2255 = vmatpush.msra.mxu3 %v3132_v35  ;;  %2295 = vmatpush.msra.mxu2 %v3133_v49 }
 0xa41   :  { %2256 = vmatpush.msra.mxu3 %v3134_v29  ;;  %2296 = vmatpush.msra.mxu2 %v3135_v28  ;;  %v1857_v28 = vpop.f32.mrf.mxu0 }
 0xa43   :  { %2257 = vmatpush.msra.mxu3 %v3136_v42  ;;  %2297 = vmatpush.msra.mxu2 %v3137_v22  ;;  %v1818_v42 = vadd.f32 %v1817_v38, %v5688_v8  ;;  %v1858_v22 = vadd.f32 %v1857_v28, %v5689_v37 }
 0xa45   :  { %2258 = vmatpush.msra.mxu3 %v3138_v45  ;;  %2298 = vmatpush.msra.mxu2 %v3139_v52  ;;  %v1978_v35 = vpop.f32.mrf.mxu1 }
 0xa46   :  { %v2022_v49 = vadd.f32 %v1978_v35, %v1938_v5 }
 0xa47   :  { %2259 = vmatpush.msra.mxu3 %v3140_v27  ;;  %2299 = vmatpush.msra.mxu2 %v3141_v10 }
 0xa48   :  { %v2602_v29 = vmul.f32 -1.442695, %v2022_v49  ;;  %v1940_v49 = vld [vmem:[#allocation3 + $0xd8] sm:$0xff] }
 0xa49   :  { %2260 = vmatpush.msra.mxu3 %v3142_v7  ;;  %2300 = vmatpush.msra.mxu2 %v3143_v47 }
 0xa4a   :  { %2782 = vpow2.f32 %v2602_v29  ;;  %v2018_v29 = vpop.f32.mrf.mxu0 }
 0xa4b   :  { %2261 = vmatpush.msra.mxu3 %v3144_v58  ;;  %2301 = vmatpush.msra.mxu2 %v3145_v14  ;;  %v1937_v58 = vld [vmem:[#allocation3 + $0xc0] sm:$0xff]  ;;  %v1939_v14 = vld [vmem:[#allocation3 + $0xd0] sm:$0xff] }
 0xa4d   :  { %2262 = vmatpush.msra.mxu3 %v3146_v20  ;;  %2302 = vmatpush.msra.mxu2 %v3147_v17 }
 0xa4f   :  { %2263 = vmatpush.msra.mxu3 %v3148_v34  ;;  %2303 = vmatpush.msra.mxu2 %v3149_v62 }
 0xa50   :  { %v2783_v27 = vpop.eup %2782 }
 0xa51   :  { %2264 = vmatpush.msra.mxu3 %v3150_v31  ;;  %2304 = vmatpush.msra.mxu2 %v3151_v36  ;;  %v2035_v47 = vadd.f32 1.0, %v2783_v27 }
 0xa53   :  { %2265 = vmatpush.msra.mxu3 %v3152_v9  ;;  %2305 = vmatpush.msra.mxu2 %v3153_v50  ;;  %vm2057_vm7 = vweird.f32 %v2035_v47 }
 0xa55   :  { %2266 = vmatpush.msra.mxu3 %v3154_v56  ;;  %2306 = vmatpush.msra.mxu2 %v3155_v0 }
 0xa57   :  { %2267 = vmatpush.msra.mxu3 %v3156_v23  ;;  %2307 = vmatpush.msra.mxu2 %v3157_v46 }
 0xa9b   :  { %v1837_v45 = vpop.f32.mrf.mxu3  ;;  %v1877_v52 = vpop.f32.mrf.mxu2 }
 0xa9c   :  { %v4991_v10 = vadd.f32 %v1837_v45, %v1818_v42  ;;  %v4993_v7 = vadd.f32 %v1877_v52, %v1858_v22  ;;  %v2024_v42 = vadd.f32 %v2018_v29, %v1940_v49  ;;  %v2063_v52 = vand.u32 2147483648, %v2035_v47 }
 0xa9e   :  { %2784 = vtanh.f32 %v4993_v7 }
 0xa9f   :  { %2786 = vrcp.f32 %v2035_v47 }
 0xaa3   :  { %v1958_v20 = vpop.f32.mrf.mxu3  ;;  %v1998_v17 = vpop.f32.mrf.mxu2 }
 0xaa4   :  { %v2785_v34 = vpop.eup %2784  ;;  %v2021_v62 = vadd.f32 %v1958_v20, %v1937_v58  ;;  %v2023_v31 = vadd.f32 %v1998_v17, %v1939_v14  ;;  %v2061_v58 = vand.u32 2147483647, %v2035_v47 }
 0xaa5   :  { %1921 = vrot.lane.b32.xlu0 %v2785_v34, %s3258_s3  ;;  %v2787_v50 = vpop.eup %2786 }
 0xaa6   :  { %v2601_v36 = vmul.f32 -1.442695, %v2021_v62  ;;  %v2603_v9 = vmul.f32 -1.442695, %v2023_v31  ;;  %v2053_v56 = vmul.f32 %v2787_v50, %v2035_v47  ;;  %vm2058_vm6 = vweird.f32 %v2787_v50 }
 0xaa7   :  { %vm2059_vm8 = vmor %vm2057_vm7, %vm2058_vm6  ;;  %vm2062_vm10 = vcmp.eq.f32.partialorder %v2061_v58, 8.507059e+37 }
 0xaa8   :  { %2788 = vpow2.f32 %v2601_v36  ;;  %v2054_v46 = vsub.f32 1.0, %v2053_v56  ;;  %v2064_v36 = vor.u32 1.1754944e-38, %v2063_v52 }
 0xaa9   :  { %2790 = vpow2.f32 %v2603_v9 }
 0xaaa   :  { %v2055_v35 = vmul.f32 %v2787_v50, %v2054_v46 }
 0xaac   :  { %v2056_v22 = vadd.f32 %v2787_v50, %v2055_v35 }
 0xaae   :  { %v2789_v0 = vpop.eup %2788  ;;  %v2060_v34 = vsel %vm2059_vm8, %v2787_v50, %v2056_v22 }
 0xaaf   :  { %v2034_v23 = vadd.f32 1.0, %v2789_v0  ;;  %v2791_v38 = vpop.eup %2790  ;;  %v2065_v0 = vsel %vm2062_vm10, %v2064_v36, %v2060_v34  ;;  %v3160_v34 = vld [vmem:[#allocation7 + $0x160] sm:$0xff]  ;;  %v3165_v36 = vld [vmem:[#allocation7 + $0x148] sm:$0xff] }
 0xab0   :  { %v2036_v5 = vadd.f32 1.0, %v2791_v38  ;;  %v2083_v29 = vmul.f32 %v2065_v0, %v4880_v15  ;;  %v3158_v15 = vld [vmem:[#allocation7 + $0x170] sm:$0xff]  ;;  %v3168_v0 = vld [vmem:[#allocation7 + $0x120] sm:$0xff] }
 0xab1   :  { %2792 = vrcp.f32 %v2034_v23  ;;  %v2048_v20 = vand.u32 2147483648, %v2034_v23  ;;  %v2046_v31 = vand.u32 2147483647, %v2034_v23  ;;  %vm2042_vm11 = vweird.f32 %v2034_v23 }
 0xab2   :  { %2794 = vrcp.f32 %v2036_v5  ;;  %vm2072_vm15 = vweird.f32 %v2036_v5 }
 0xab3   :  { %2796 = vtanh.f32 %v2024_v42  ;;  %v2049_v46 = vor.u32 1.1754944e-38, %v2048_v20  ;;  %vm2047_vm13 = vcmp.eq.f32.partialorder %v2046_v31, 8.507059e+37  ;;  %v3164_v31 = vld [vmem:[#allocation7 + $0x140] sm:$0xff] }
 0xab7   :  { %v2793_v28 = vpop.eup %2792 }
 0xab8   :  { %v2038_v45 = vmul.f32 %v2793_v28, %v2034_v23  ;;  %v2795_v27 = vpop.eup %2794  ;;  %vm2043_vm9 = vweird.f32 %v2793_v28  ;;  %v2076_v23 = vand.u32 2147483647, %v2036_v5 }
 0xab9   :  { %v2068_v17 = vmul.f32 %v2795_v27, %v2036_v5  ;;  %vm2044_vm12 = vmor %vm2042_vm11, %vm2043_vm9  ;;  %v2797_v47 = vpop.eup %2796  ;;  %vm2073_vm14 = vweird.f32 %v2795_v27 }
 0xaba   :  { %v2039_v14 = vsub.f32 1.0, %v2038_v45  ;;  %v2078_v45 = vand.u32 2147483648, %v2036_v5  ;;  %vm2074_vm1 = vmor %vm2072_vm15, %vm2073_vm14  ;;  %vm2077_vm2 = vcmp.eq.f32.partialorder %v2076_v23, 8.507059e+37  ;;  %v3162_v5 = vld [vmem:[#allocation7 + $0x150] sm:$0xff] }
 0xabb   :  { %v2069_v9 = vsub.f32 1.0, %v2068_v17  ;;  %v3159_v17 = vld [vmem:[#allocation7 + $0x178] sm:$0xff] }
 0xabc   :  { %v2040_v62 = vmul.f32 %v2793_v28, %v2039_v14  ;;  %v2079_v58 = vor.u32 1.1754944e-38, %v2078_v45 }
 0xabd   :  { %v2070_v49 = vmul.f32 %v2795_v27, %v2069_v9  ;;  %v3166_v9 = vld [vmem:[#allocation7 + $0x130] sm:$0xff] }
 0xabe   :  { %v2041_v56 = vadd.f32 %v2793_v28, %v2040_v62  ;;  %v3161_v62 = vld [vmem:[#allocation7 + $0x168] sm:$0xff] }
 0xabf   :  { %v2071_v22 = vadd.f32 %v2795_v27, %v2070_v49  ;;  %v3173_v49 = vld [vmem:[#allocation7 + $0x108] sm:$0xff] }
 0xac0   :  { %v2045_v38 = vsel %vm2044_vm12, %v2793_v28, %v2041_v56  ;;  %v3167_v56 = vld [vmem:[#allocation7 + $0x138] sm:$0xff] }
 0xac1   :  { %v2050_v35 = vsel %vm2047_vm13, %v2049_v46, %v2045_v38  ;;  %v2075_v52 = vsel %vm2074_vm1, %v2795_v27, %v2071_v22  ;;  %v3163_v27 = vld [vmem:[#allocation7 + $0x158] sm:$0xff]  ;;  %v3169_v46 = vld [vmem:[#allocation7 + $0x128] sm:$0xff]  ;;  %v3170_v38 = vld [vmem:[#allocation7 + $0x110] sm:$0xff] }
 0xac2   :  { %v2084_v42 = vmul.f32 %v2797_v47, %v2050_v35  ;;  %v2080_v14 = vsel %vm2077_vm2, %v2079_v58, %v2075_v52  ;;  %v3171_v47 = vld [vmem:[#allocation7 + $0x118] sm:$0xff]  ;;  %v3172_v35 = vld [vmem:[#allocation7 + $0x100] sm:$0xff] }
 0xac4   :  { %v4998_v50 = vadd.f32 %v2084_v42, %v2083_v29  ;;  %v2599_v29 = vmul.f32 -1.442695, %v4991_v10 }
 0xac6   :  { %2798 = vtanh.f32 %v4998_v50 }
 0xac7   :  { %2800 = vpow2.f32 %v2599_v29 }
 0xacc   :  { %v2799_v28 = vpop.eup %2798 }
 0xacd   :  { %v5001_v20 = vmul.f32 %v2799_v28, %v2080_v14  ;;  %v2801_v42 = vpop.eup %2800 }
 0xace   :  { %v1886_v22 = vadd.f32 1.0, %v2801_v42 }
 0xacf   :  { %2107 = vmatmul.f32.vlgmr.msrb.gmra.mxu3 %v5001_v20  ;;  %2147 = vmatmul.f32.vlgmr.msrb.gmra.mxu2 %v5001_v20 }
 0xad0   :  { %2410 = vmatpush.msrb.mxu3 %v3158_v15  ;;  %2450 = vmatpush.msrb.mxu2 %v3159_v17  ;;  %2802 = vrcp.f32 %v1886_v22  ;;  %v1899_v14 = vand.u32 2147483648, %v1886_v22  ;;  %vm1893_vm4 = vweird.f32 %v1886_v22  ;;  %v1897_v15 = vand.u32 2147483647, %v1886_v22 }
 0xad2   :  { %2411 = vmatpush.msrb.mxu3 %v3160_v34  ;;  %2451 = vmatpush.msrb.mxu2 %v3161_v62  ;;  %v1900_v34 = vor.u32 1.1754944e-38, %v1899_v14  ;;  %vm1898_vm6 = vcmp.eq.f32.partialorder %v1897_v15, 8.507059e+37 }
 0xad4   :  { %2412 = vmatpush.msrb.mxu3 %v3162_v5  ;;  %2452 = vmatpush.msrb.mxu2 %v3163_v27 }
 0xad6   :  { %2413 = vmatpush.msrb.mxu3 %v3164_v31  ;;  %2453 = vmatpush.msrb.mxu2 %v3165_v36  ;;  %v2803_v45 = vpop.eup %2802 }
 0xad7   :  { %2268 = vmatmul.f32.vlgmr.msra.gmra.mxu3 %v5001_v20  ;;  %2308 = vmatmul.f32.vlgmr.msra.gmra.mxu2 %v5001_v20  ;;  %v1889_v23 = vmul.f32 %v2803_v45, %v1886_v22  ;;  %vm1894_vm3 = vweird.f32 %v2803_v45 }
 0xad8   :  { %2414 = vmatpush.msrb.mxu3 %v3166_v9  ;;  %2454 = vmatpush.msrb.mxu2 %v3167_v56  ;;  %vm1895_vm5 = vmor %vm1893_vm4, %vm1894_vm3  ;;  %v2600_v56 = vmul.f32 -1.442695, %v4993_v7 }
 0xad9   :  { %v1890_v52 = vsub.f32 1.0, %v1889_v23 }
 0xada   :  { %2415 = vmatpush.msrb.mxu3 %v3168_v0  ;;  %2455 = vmatpush.msrb.mxu2 %v3169_v46 }
 0xadb   :  { %v1891_v58 = vmul.f32 %v2803_v45, %v1890_v52 }
 0xadc   :  { %2416 = vmatpush.msrb.mxu3 %v3170_v38  ;;  %2456 = vmatpush.msrb.mxu2 %v3171_v47 }
 0xadd   :  { %v1892_v28 = vadd.f32 %v2803_v45, %v1891_v58 }
 0xade   :  { %2417 = vmatpush.msrb.mxu3 %v3172_v35  ;;  %2457 = vmatpush.msrb.mxu2 %v3173_v49 }
 0xadf   :  { %v1896_v17 = vsel %vm1895_vm5, %v2803_v45, %v1892_v28 }
 0xae0   :  { %v1901_v5 = vsel %vm1898_vm6, %v1900_v34, %v1896_v17 }
 0xae1   :  { %v1919_v27 = vmul.f32 %v1901_v5, %v4908_v43 }
 0xb17   :  { %v1922_v62 = vpop.permute.xlu0 %1921 }
 0xb18   :  { %v1924_v10 = vmul.f32 %v1922_v62, %v1901_v5 }
 0xb1a   :  { %1926 = vrot.lane.b32.xlu1 %v1924_v10, %s3258_s3 }
 0xb8c   :  { %v1927_v31 = vpop.permute.xlu1 %1926 }
 0xb8d   :  { %v5010_v36 = vadd.f32 %v1927_v31, %v1919_v27 }
 0xb8f   :  { %2804 = vtanh.f32 %v5010_v36 }
 0xb90   :  { %2806 = vpow2.f32 %v2600_v56 }
 0xb95   :  { %v2805_v9 = vpop.eup %2804 }
 0xb96   :  { %1932 = vrot.lane.b32.xlu2 %v2805_v9, %s3258_s3  ;;  %v2807_v0 = vpop.eup %2806 }
 0xb97   :  { %v1887_v46 = vadd.f32 1.0, %v2807_v0 }
 0xb99   :  { %2808 = vrcp.f32 %v1887_v46  ;;  %v1914_v43 = vand.u32 2147483648, %v1887_v46  ;;  %vm1908_vm8 = vweird.f32 %v1887_v46  ;;  %v1912_v42 = vand.u32 2147483647, %v1887_v46 }
 0xb9b   :  { %v1915_v45 = vor.u32 1.1754944e-38, %v1914_v43  ;;  %vm1913_vm10 = vcmp.eq.f32.partialorder %v1912_v42, 8.507059e+37 }
 0xb9f   :  { %v2809_v38 = vpop.eup %2808 }
 0xba0   :  { %v1904_v47 = vmul.f32 %v2809_v38, %v1887_v46  ;;  %vm1909_vm7 = vweird.f32 %v2809_v38 }
 0xba1   :  { %vm1910_vm9 = vmor %vm1908_vm8, %vm1909_vm7 }
 0xba2   :  { %v1905_v35 = vsub.f32 1.0, %v1904_v47 }
 0xba4   :  { %v1906_v49 = vmul.f32 %v2809_v38, %v1905_v35 }
 0xba6   :  { %v1907_v29 = vadd.f32 %v2809_v38, %v1906_v49 }
 0xba8   :  { %v1911_v22 = vsel %vm1910_vm9, %v2809_v38, %v1907_v29 }
 0xba9   :  { %v1916_v23 = vsel %vm1913_vm10, %v1915_v45, %v1911_v22 }
 0xbf0   :  { %v1933_v52 = vpop.permute.xlu2 %1932 }
 0xbf1   :  { %v1935_v7 = vmul.f32 %v1933_v52, %v1916_v23 }
 0xbf3   :  { %2604 = vmatmul.msk.f32.vlgmr.msrb.gmra.mxu1 %vm341_vm0, %v1935_v7  ;;  %2605 = vmatmul.msk.f32.vlgmr.msrb.gmra.mxu0 %vm341_vm0, %v1935_v7 }
 0xbf4   :  { %2382 = vmatpush.msrb.mxu1 %v4915_v3  ;;  %2422 = vmatpush.msrb.mxu0 %v4918_v26 }
 0xbf6   :  { %2383 = vmatpush.msrb.mxu1 %v4921_v30  ;;  %2423 = vmatpush.msrb.mxu0 %v4924_v16  ;;  %v2230_v16 = vld [vmem:[#allocation3 + $0xf0] sm:$0xff] }
 0xbf8   :  { %2384 = vmatpush.msrb.mxu1 %v4927_v25  ;;  %2424 = vmatpush.msrb.mxu0 %v4930_v61 }
 0xbfa   :  { %2385 = vmatpush.msrb.mxu1 %v4933_v51  ;;  %2425 = vmatpush.msrb.mxu0 %v4936_v48 }
 0xbfb   :  { %2248 = vmatmul.f32.vlgmr.msra.gmra.mxu1 %v5001_v20  ;;  %2288 = vmatmul.f32.vlgmr.msra.gmra.mxu0 %v5001_v20 }
 0xbfc   :  { %2386 = vmatpush.msrb.mxu1 %v4941_v32  ;;  %2426 = vmatpush.msrb.mxu0 %v4944_v24 }
 0xbfe   :  { %2387 = vmatpush.msrb.mxu1 %v4947_v44  ;;  %2427 = vmatpush.msrb.mxu0 %v4950_v18 }
 0xc00   :  { %2388 = vmatpush.msrb.mxu1 %v4956_v1  ;;  %2428 = vmatpush.msrb.mxu0 %v4953_v4 }
 0xc02   :  { %2389 = vmatpush.msrb.mxu1 %v4959_v60  ;;  %2429 = vmatpush.msrb.mxu0 %v4962_v13 }
 0xc04   :  { %2390 = vmatpush.msrb.mxu1 %v4965_v19  ;;  %2430 = vmatpush.msrb.mxu0 %v4968_v11 }
 0xc06   :  { %2391 = vmatpush.msrb.mxu1 %v4971_v41  ;;  %2431 = vmatpush.msrb.mxu0 %v4974_v39  ;;  %v2231_v39 = vld [vmem:[#allocation3 + $0xf8] sm:$0xff] }
 0xc08   :  { %2392 = vmatpush.msrb.mxu1 %v4803_v63  ;;  %2432 = vmatpush.msrb.mxu0 %v4806_v33  ;;  %v2108_v63 = vpop.f32.mrf.mxu3  ;;  %v2229_v33 = vld [vmem:[#allocation3 + $0xe8] sm:$0xff] }
 0xc0a   :  { %2393 = vmatpush.msrb.mxu1 %v4809_v6  ;;  %2433 = vmatpush.msrb.mxu0 %v4812_v55 }
 0xc0c   :  { %2394 = vmatpush.msrb.mxu1 %v4815_v57  ;;  %2434 = vmatpush.msrb.mxu0 %v4818_v53  ;;  %v2148_v57 = vpop.f32.mrf.mxu2  ;;  %v2109_v53 = vadd.f32 %v2108_v63, %v5688_v8 }
 0xc0e   :  { %2395 = vmatpush.msrb.mxu1 %v4821_v54  ;;  %2435 = vmatpush.msrb.mxu0 %v4824_v40  ;;  %v2149_v54 = vadd.f32 %v2148_v57, %v5689_v37 }
 0xc10   :  { %2396 = vmatpush.msrb.mxu1 %v4827_v12  ;;  %2436 = vmatpush.msrb.mxu0 %v4830_v2  ;;  %v2269_v6 = vpop.f32.mrf.mxu3 }
 0xc11   :  { %v2313_v55 = vadd.f32 %v2269_v6, %v2229_v33 }
 0xc12   :  { %2397 = vmatpush.msrb.mxu1 %v4833_v21  ;;  %2437 = vmatpush.msrb.mxu0 %v4836_v59  ;;  %v2228_v59 = vld [vmem:[#allocation3 + $0xe0] sm:$0xff] }
 0xc13   :  { %v2609_v3 = vmul.f32 -1.442695, %v2313_v55 }
 0xc14   :  { %v2309_v20 = vpop.f32.mrf.mxu2 }
 0xc15   :  { %2810 = vpow2.f32 %v2609_v3  ;;  %v2315_v28 = vadd.f32 %v2309_v20, %v2231_v39 }
 0xc1b   :  { %v2811_v12 = vpop.eup %2810 }
 0xc1c   :  { %v2326_v21 = vadd.f32 1.0, %v2811_v12 }
 0xc1e   :  { %v2354_v17 = vand.u32 2147483648, %v2326_v21  ;;  %vm2348_vm12 = vweird.f32 %v2326_v21  ;;  %v2352_v62 = vand.u32 2147483647, %v2326_v21 }
 0xc20   :  { %v2355_v46 = vor.u32 1.1754944e-38, %v2354_v17  ;;  %vm2353_vm15 = vcmp.eq.f32.partialorder %v2352_v62, 8.507059e+37 }
 0xc70   :  { %v2128_v40 = vpop.f32.mrf.mxu1  ;;  %v2168_v26 = vpop.f32.mrf.mxu0 }
 0xc71   :  { %v5053_v30 = vadd.f32 %v2128_v40, %v2109_v53  ;;  %v5055_v2 = vadd.f32 %v2168_v26, %v2149_v54 }
 0xc73   :  { %2812 = vtanh.f32 %v5055_v2  ;;  %v2606_v54 = vmul.f32 -1.442695, %v5053_v30 }
 0xc74   :  { %2814 = vrcp.f32 %v2326_v21 }
 0xc78   :  { %v2249_v25 = vpop.f32.mrf.mxu1  ;;  %v2289_v61 = vpop.f32.mrf.mxu0 }
 0xc79   :  { %v2813_v51 = vpop.eup %2812  ;;  %v2312_v48 = vadd.f32 %v2249_v25, %v2228_v59  ;;  %v2314_v32 = vadd.f32 %v2289_v61, %v2230_v16 }
 0xc7a   :  { %2212 = vrot.lane.b32.xlu0 %v2813_v51, %s3258_s3  ;;  %v2815_v18 = vpop.eup %2814 }
 0xc7b   :  { %v2608_v24 = vmul.f32 -1.442695, %v2312_v48  ;;  %v2610_v44 = vmul.f32 -1.442695, %v2314_v32  ;;  %v2344_v4 = vmul.f32 %v2815_v18, %v2326_v21  ;;  %vm2349_vm11 = vweird.f32 %v2815_v18 }
 0xc7c   :  { %vm5059_vm13 = vmor %vm2348_vm12, %vm2349_vm11 }
 0xc7d   :  { %2816 = vpow2.f32 %v2608_v24  ;;  %v2345_v13 = vsub.f32 1.0, %v2344_v4 }
 0xc7e   :  { %2818 = vpow2.f32 %v2610_v44 }
 0xc7f   :  { %v2346_v41 = vmul.f32 %v2815_v18, %v2345_v13 }
 0xc81   :  { %v2347_v14 = vadd.f32 %v2815_v18, %v2346_v41 }
 0xc83   :  { %v2817_v1 = vpop.eup %2816  ;;  %v2351_v9 = vsel %vm5059_vm13, %v2815_v18, %v2347_v14 }
 0xc84   :  { %v2325_v60 = vadd.f32 1.0, %v2817_v1  ;;  %v2819_v19 = vpop.eup %2818  ;;  %v2356_v49 = vsel %vm2353_vm15, %v2355_v46, %v2351_v9 }
 0xc85   :  { %v2327_v11 = vadd.f32 1.0, %v2819_v19  ;;  %v2374_v45 = vmul.f32 %v2356_v49, %v4998_v50 }
 0xc86   :  { %2820 = vrcp.f32 %v2325_v60  ;;  %v2339_v27 = vand.u32 2147483648, %v2325_v60  ;;  %v2337_v0 = vand.u32 2147483647, %v2325_v60  ;;  %vm2333_vm1 = vweird.f32 %v2325_v60 }
 0xc87   :  { %2822 = vrcp.f32 %v2327_v11  ;;  %v2369_v63 = vand.u32 2147483648, %v2327_v11  ;;  %vm2363_vm5 = vweird.f32 %v2327_v11  ;;  %v2367_v33 = vand.u32 2147483647, %v2327_v11 }
 0xc88   :  { %2824 = vtanh.f32 %v2315_v28  ;;  %v2340_v35 = vor.u32 1.1754944e-38, %v2339_v27  ;;  %vm2338_vm3 = vcmp.eq.f32.partialorder %v2337_v0, 8.507059e+37 }
 0xc89   :  { %v2370_v55 = vor.u32 1.1754944e-38, %v2369_v63  ;;  %vm2368_vm7 = vcmp.eq.f32.partialorder %v2367_v33, 8.507059e+37  ;;  %v2525_v33 = vld [vmem:[%s5114_s4 + $0x38] sm:$0xff] }
 0xc8a   :  { %2541 = vmatpush.msra.mxu3 %v2525_v33 }
 0xc8c   :  { %v2821_v58 = vpop.eup %2820 }
 0xc8d   :  { %v2329_v15 = vmul.f32 %v2821_v58, %v2325_v60  ;;  %v2823_v34 = vpop.eup %2822  ;;  %vm2334_vm14 = vweird.f32 %v2821_v58  ;;  %v2607_v60 = vmul.f32 -1.442695, %v5055_v2 }
 0xc8e   :  { %v2359_v31 = vmul.f32 %v2823_v34, %v2327_v11  ;;  %vm2335_vm2 = vmor %vm2333_vm1, %vm2334_vm14  ;;  %v2825_v43 = vpop.eup %2824  ;;  %vm2364_vm4 = vweird.f32 %v2823_v34 }
 0xc8f   :  { %v2330_v5 = vsub.f32 1.0, %v2329_v15  ;;  %vm2365_vm6 = vmor %vm2363_vm5, %vm2364_vm4 }
 0xc90   :  { %v2360_v38 = vsub.f32 1.0, %v2359_v31 }
 0xc91   :  { %v2331_v56 = vmul.f32 %v2821_v58, %v2330_v5 }
 0xc92   :  { %v2361_v22 = vmul.f32 %v2823_v34, %v2360_v38 }
 0xc93   :  { %v2332_v47 = vadd.f32 %v2821_v58, %v2331_v56 }
 0xc94   :  { %v2362_v7 = vadd.f32 %v2823_v34, %v2361_v22 }
 0xc95   :  { %v2336_v29 = vsel %vm2335_vm2, %v2821_v58, %v2332_v47 }
 0xc96   :  { %v2341_v42 = vsel %vm2338_vm3, %v2340_v35, %v2336_v29  ;;  %v2366_v6 = vsel %vm2365_vm6, %v2823_v34, %v2362_v7 }
 0xc97   :  { %v2375_v23 = vmul.f32 %v2825_v43, %v2341_v42  ;;  %v2371_v57 = vsel %vm2368_vm7, %v2370_v55, %v2366_v6  ;;  %v2524_v6 = vld [vmem:[%s5114_s4 + $0x30] sm:$0xff]  ;;  %v2523_v55 = vld [vmem:[%s5114_s4 + $0x28] sm:$0xff] }
 0xc98   :  { %2542 = vmatpush.msra.mxu3 %v2524_v6 }
 0xc99   :  { %v2376_v52 = vadd.f32 %v2375_v23, %v2374_v45 }
 0xc9a   :  { %2543 = vmatpush.msra.mxu3 %v2523_v55 }
 0xc9b   :  { %2826 = vtanh.f32 %v2376_v52 }
 0xc9c   :  { %2828 = vpow2.f32 %v2606_v54  ;;  %v2519_v54 = vld [vmem:[%s5114_s4 + $0x8] sm:$0xff] }
 0xca1   :  { %v2827_v3 = vpop.eup %2826 }
 0xca2   :  { %v2378_v53 = vmul.f32 %v2827_v3, %v2371_v57  ;;  %v2829_v50 = vpop.eup %2828  ;;  %v2522_v3 = vld [vmem:[%s5114_s4 + $0x20] sm:$0xff]  ;;  %v2521_v57 = vld [vmem:[%s5114_s4 + $0x18] sm:$0xff] }
 0xca3   :  { %v2177_v40 = vadd.f32 1.0, %v2829_v50  ;;  %2544 = vmatpush.msra.mxu3 %v2522_v3 }
 0xca4   :  { %2398 = vmatmul.f32.vlgmr.msrb.gmra.mxu1 %v2378_v53  ;;  %2438 = vmatmul.f32.vlgmr.msrb.gmra.mxu0 %v2378_v53  ;;  %v2520_v53 = vld [vmem:[%s5114_s4 + $0x10] sm:$0xff] }
 0xca5   :  { %2830 = vrcp.f32 %v2177_v40  ;;  %v2190_v25 = vand.u32 2147483648, %v2177_v40  ;;  %vm2184_vm9 = vweird.f32 %v2177_v40  ;;  %v2188_v61 = vand.u32 2147483647, %v2177_v40  ;;  %2545 = vmatpush.msra.mxu3 %v2521_v57 }
 0xca7   :  { %v2191_v48 = vor.u32 1.1754944e-38, %v2190_v25  ;;  %vm2189_vm11 = vcmp.eq.f32.partialorder %v2188_v61, 8.507059e+37  ;;  %2546 = vmatpush.msra.mxu3 %v2520_v53  ;;  %v2518_v25 = vld [vmem:[%s5114_s4] sm:$0xff] }
 0xca9   :  { %2547 = vmatpush.msra.mxu3 %v2519_v54 }
 0xcab   :  { %v2831_v26 = vpop.eup %2830  ;;  %2548 = vmatpush.msra.mxu3 %v2518_v25 }
 0xcac   :  { %v2180_v12 = vmul.f32 %v2831_v26, %v2177_v40  ;;  %vm2185_vm8 = vweird.f32 %v2831_v26 }
 0xcad   :  { %vm2186_vm10 = vmor %vm2184_vm9, %vm2185_vm8  ;;  %vm2553_vm9 = vcmask 7168  }
 0xcae   :  { %v2181_v21 = vsub.f32 1.0, %v2180_v12 }
 0xcb0   :  { %v2182_v59 = vmul.f32 %v2831_v26, %v2181_v21 }
 0xcb2   :  { %v2183_v16 = vadd.f32 %v2831_v26, %v2182_v59 }
 0xcb4   :  { %v2187_v51 = vsel %vm2186_vm10, %v2831_v26, %v2183_v16 }
 0xcb5   :  { %v2192_v24 = vsel %vm2189_vm11, %v2191_v48, %v2187_v51 }
 0xcb6   :  { %v2210_v44 = vmul.f32 %v2192_v24, %v5010_v36 }
 0xcec   :  { %v2213_v32 = vpop.permute.xlu0 %2212 }
 0xced   :  { %v2215_v30 = vmul.f32 %v2213_v32, %v2192_v24 }
 0xcef   :  { %2217 = vrot.lane.b32.xlu1 %v2215_v30, %s3258_s3 }
 0xd21   :  { %v2439_v62 = vpop.f32.mrf.mxu0  ;;  %v2399_v9 = vpop.f32.mrf.mxu1 }
 0xd22   :  { %v2440_v5 = vadd.f32 %v2439_v62, %v5689_v37  ;;  %v2400_v0 = vadd.f32 %v2399_v9, %v5688_v8 }
 0xd61   :  { %v2218_v18 = vpop.permute.xlu1 %2217 }
 0xd62   :  { %v5069_v4 = vadd.f32 %v2218_v18, %v2210_v44 }
 0xd64   :  { %2832 = vtanh.f32 %v5069_v4 }
 0xd65   :  { %2834 = vpow2.f32 %v2607_v60 }
 0xd6a   :  { %v2833_v1 = vpop.eup %2832 }
 0xd6b   :  { %2223 = vrot.lane.b32.xlu2 %v2833_v1, %s3258_s3  ;;  %v2835_v13 = vpop.eup %2834 }
 0xd6c   :  { %v2178_v19 = vadd.f32 1.0, %v2835_v13 }
 0xd6e   :  { %2836 = vrcp.f32 %v2178_v19  ;;  %v2205_v36 = vand.u32 2147483648, %v2178_v19  ;;  %vm2199_vm13 = vweird.f32 %v2178_v19  ;;  %v2203_v28 = vand.u32 2147483647, %v2178_v19 }
 0xd70   :  { %v2206_v15 = vor.u32 1.1754944e-38, %v2205_v36  ;;  %vm2204_vm15 = vcmp.eq.f32.partialorder %v2203_v28, 8.507059e+37 }
 0xd74   :  { %v2837_v11 = vpop.eup %2836 }
 0xd75   :  { %v2195_v41 = vmul.f32 %v2837_v11, %v2178_v19  ;;  %vm2200_vm12 = vweird.f32 %v2837_v11  ;;  %v2625_v19 = vld [vmem:[#allocation2] ss:$0 sm:$0xff] }
 0xd76   :  { %vm2201_vm14 = vmor %vm2199_vm13, %vm2200_vm12 }
 0xd77   :  { %v2196_v39 = vsub.f32 1.0, %v2195_v41 }
 0xd79   :  { %v2197_v20 = vmul.f32 %v2837_v11, %v2196_v39 }
 0xd7b   :  { %v2198_v58 = vadd.f32 %v2837_v11, %v2197_v20 }
 0xd7d   :  { %v2202_v14 = vsel %vm2201_vm14, %v2837_v11, %v2198_v58 }
 0xd7e   :  { %v2207_v17 = vsel %vm2204_vm15, %v2206_v15, %v2202_v14 }
 0xdc5   :  { %v2224_v34 = vpop.permute.xlu2 %2223 }
 0xdc6   :  { %v2226_v2 = vmul.f32 %v2224_v34, %v2207_v17 }
 0xdc8   :  { %2611 = vmatmul.msk.f32.vlgmr.msrb.gmra.mxu3 %vm341_vm0, %v2226_v2  ;;  %2612 = vmatmul.msk.f32.vlgmr.msrb.gmra.mxu2 %vm341_vm0, %v2226_v2 }
 0xe4b   :  { %v2459_v10 = vpop.f32.mrf.mxu2  ;;  %v2419_v56 = vpop.f32.mrf.mxu3 }
 0xe4c   :  { %v2460_v27 = vadd.f32 %v2459_v10, %v2440_v5  ;;  %v2420_v46 = vadd.f32 %v2419_v56, %v2400_v0 }
 0xe4e   :  { %2838 = vtanh.f32 %v2460_v27  ;;  %v2613_v38 = vmul.f32 -1.442695, %v2420_v46  ;;  %v2614_v21 = vmul.f32 -1.442695, %v2460_v27 }
 0xe50   :  { %2840 = vpow2.f32 %v2613_v38 }
 0xe54   :  { %v2839_v31 = vpop.eup %2838 }
 0xe55   :  { %2503 = vrot.lane.b32.xlu0 %v2839_v31, %s3258_s3 }
 0xe56   :  { %v2841_v47 = vpop.eup %2840 }
 0xe57   :  { %v2468_v35 = vadd.f32 1.0, %v2841_v47 }
 0xe59   :  { %2842 = vrcp.f32 %v2468_v35  ;;  %v2481_v22 = vand.u32 2147483648, %v2468_v35  ;;  %vm2475_vm2 = vweird.f32 %v2468_v35  ;;  %v2479_v45 = vand.u32 2147483647, %v2468_v35 }
 0xe5b   :  { %v2482_v52 = vor.u32 1.1754944e-38, %v2481_v22  ;;  %vm2480_vm4 = vcmp.eq.f32.partialorder %v2479_v45, 8.507059e+37 }
 0xe5f   :  { %v2843_v49 = vpop.eup %2842 }
 0xe60   :  { %v2471_v29 = vmul.f32 %v2843_v49, %v2468_v35  ;;  %vm2476_vm1 = vweird.f32 %v2843_v49 }
 0xe61   :  { %vm2477_vm3 = vmor %vm2475_vm2, %vm2476_vm1 }
 0xe62   :  { %v2472_v43 = vsub.f32 1.0, %v2471_v29 }
 0xe64   :  { %v2473_v37 = vmul.f32 %v2843_v49, %v2472_v43 }
 0xe66   :  { %v2474_v42 = vadd.f32 %v2843_v49, %v2473_v37 }
 0xe68   :  { %v2478_v23 = vsel %vm2477_vm3, %v2843_v49, %v2474_v42 }
 0xe69   :  { %v2483_v7 = vsel %vm2480_vm4, %v2482_v52, %v2478_v23 }
 0xe6a   :  { %v2501_v50 = vmul.f32 %v2483_v7, %v5069_v4 }
 0xec7   :  { %v2504_v8 = vpop.permute.xlu0 %2503 }
 0xec8   :  { %v2506_v63 = vmul.f32 %v2504_v8, %v2483_v7 }
 0xeca   :  { %2508 = vrot.lane.b32.xlu1 %v2506_v63, %s3258_s3 }
 0xf3c   :  { %v2509_v40 = vpop.permute.xlu1 %2508 }
 0xf3d   :  { %v2511_v26 = vadd.f32 %v2509_v40, %v2501_v50 }
 0xf3f   :  { %2844 = vtanh.f32 %v2511_v26 }
 0xf40   :  { %2846 = vpow2.f32 %v2614_v21 }
 0xf45   :  { %v2845_v12 = vpop.eup %2844 }
 0xf46   :  { %2514 = vrot.lane.b32.xlu2 %v2845_v12, %s3258_s3  ;;  %v2847_v59 = vpop.eup %2846 }
 0xf47   :  { %v2469_v16 = vadd.f32 1.0, %v2847_v59 }
 0xf49   :  { %2848 = vrcp.f32 %v2469_v16  ;;  %v2496_v30 = vand.u32 2147483648, %v2469_v16  ;;  %vm2490_vm6 = vweird.f32 %v2469_v16  ;;  %v2494_v44 = vand.u32 2147483647, %v2469_v16 }
 0xf4b   :  { %v2497_v4 = vor.u32 1.1754944e-38, %v2496_v30  ;;  %vm2495_vm8 = vcmp.eq.f32.partialorder %v2494_v44, 8.507059e+37 }
 0xf4f   :  { %v2849_v61 = vpop.eup %2848 }
 0xf50   :  { %v2486_v51 = vmul.f32 %v2849_v61, %v2469_v16  ;;  %vm2491_vm5 = vweird.f32 %v2849_v61 }
 0xf51   :  { %vm2492_vm7 = vmor %vm2490_vm6, %vm2491_vm5 }
 0xf52   :  { %v2487_v48 = vsub.f32 1.0, %v2486_v51 }
 0xf54   :  { %v2488_v32 = vmul.f32 %v2849_v61, %v2487_v48 }
 0xf56   :  { %v2489_v24 = vadd.f32 %v2849_v61, %v2488_v32 }
 0xf58   :  { %v2493_v18 = vsel %vm2492_vm7, %v2849_v61, %v2489_v24 }
 0xf59   :  { %v2498_v1 = vsel %vm2495_vm8, %v2497_v4, %v2493_v18 }
 0xfa0   :  { %v2515_v60 = vpop.permute.xlu2 %2514 }
 0xfa1   :  { %v2517_v13 = vmul.f32 %v2515_v60, %v2498_v1 }
 0xfa3   :  { %2615 = vmatmul.msk.f32.vlgmr.msra.gmra.mxu3 %vm341_vm0, %v2517_v13 }
0x1026   :  { %v2550_v11 = vpop.f32.mrf.mxu3 }
0x1027   :  { %v2551_v41 = vadd.f32 %v2625_v19, %v2550_v11 }
0x1029   :  { %2554 = vst.msk [vmem:[%s5116_s6] sm:$0xff] %vm2553_vm9, %v2551_v41 }
0x102a   :  { %2559 = vsyncpa [#allocation4], 1 }
0x102b   :  { %2560 = vsyncpa [#allocation6], 1 }

</bundles_post_ra>
